<compile_context>
chip_gen: v5e
topology: v5e:2x2
jax: 0.10.0
libtpu: 0.0.40
codegen_flags: <defaults>
</compile_context>

<pallas_src>
import math

import numpy as np
import jax
import jax.numpy as jnp
from jax.experimental import pallas as pl
from jax.experimental.pallas import tpu as pltpu

L_IN = 32           # input sequence length implied by fc1 (32 * 8 after two /2 pools)
TB_DEFAULT = 256    # batch tile: multiple of 256 (v6e/v7x MXU) and of 128 (v5e)


# ---------------------------------------------------------------------------
# Host-side constant-matrix builders (run once in the wrapper, outside kernel)
# ---------------------------------------------------------------------------
def _conv1_pool_matrix(w1, parity, T=L_IN):
    """Fold Conv1d(1->C,k3,p1) restricted to output times 2*t+parity.

    Returns A (T, C*(T//2)) so that  conv1_out[b, c, 2*t+parity] = x[b,:] @ A.
    """
    C = w1.shape[0]                                   # (C, 1, 3)
    To = T // 2
    s = jnp.arange(T)[:, None]                        # input time index (rows)
    j = jnp.arange(C * To)[None, :]                   # output feature index (cols)
    c, to = j // To, j % To
    t = 2 * to + parity                               # pre-pool output time
    k = s - t + 1                                     # conv tap index
    valid = (k >= 0) & (k <= 2)
    kc = jnp.clip(k, 0, 2)
    return jnp.where(valid, w1[c, 0, kc], 0.0).astype(jnp.float32)


def _conv2_pool_matrix(w2, parity, T=L_IN // 2):
    """Fold Conv1d(Ci->Co,k3,p1) restricted to output times 2*t+parity.

    Channel-major layout on both sides: rows ci*T+s, cols co*(T//2)+t_out.
    """
    Co, Ci, _ = w2.shape                              # (32, 16, 3)
    To = T // 2
    i = jnp.arange(Ci * T)[:, None]
    j = jnp.arange(Co * To)[None, :]
    ci, s = i // T, i % T
    co, to = j // To, j % To
    t = 2 * to + parity
    k = s - t + 1
    valid = (k >= 0) & (k <= 2)
    kc = jnp.clip(k, 0, 2)
    return jnp.where(valid, w2[co, ci, kc], 0.0).astype(jnp.float32)


# ---------------------------------------------------------------------------
# Kernel: one batch tile (TB samples) per grid step, everything on the MXU
# ---------------------------------------------------------------------------
def _voice_net_kernel(x_ref, a1e_ref, a1o_ref, b1_ref,
                      a2e_ref, a2o_ref, b2_ref,
                      wf1_ref, bf1_ref, wf2_ref, bf2_ref, o_ref):
    f32 = jnp.float32
    x = x_ref[...]                                                     # (TB, 32)

    # conv1 + bias at even/odd output times, ReLU + maxpool fused via
    # max-then-relu (ReLU monotone): (TB,32)x(32,256) twice -> (TB, 16*16).
    b1 = b1_ref[...]
    h1e = jnp.dot(x, a1e_ref[...], preferred_element_type=f32) + b1
    h1o = jnp.dot(x, a1o_ref[...], preferred_element_type=f32) + b1
    p1 = jnp.maximum(jnp.maximum(h1e, h1o), 0.0)                       # (TB, 256)

    # conv2 + bias at even/odd output times, ReLU + maxpool fused:
    # (TB,256)x(256,256) twice -> (TB, 32*8) = (TB, 256), channel-major so the
    # column order matches torch's x.view(B, -1).
    b2 = b2_ref[...]
    h2e = jnp.dot(p1, a2e_ref[...], preferred_element_type=f32) + b2
    h2o = jnp.dot(p1, a2o_ref[...], preferred_element_type=f32) + b2
    p2 = jnp.maximum(jnp.maximum(h2e, h2o), 0.0)                       # (TB, 256)

    # fc1 + ReLU: (TB,256) x (256,64)
    f1 = jnp.dot(p2, wf1_ref[...], preferred_element_type=f32) + bf1_ref[...]
    f1 = jnp.maximum(f1, 0.0)

    # fc2 (output padded to 128 lanes for an unmasked, lane-dense store)
    o_ref[...] = jnp.dot(f1, wf2_ref[...], preferred_element_type=f32) + bf2_ref[...]


# ---------------------------------------------------------------------------
# Wrapper
# ---------------------------------------------------------------------------
def voice_detection_net_pallas(x_ncw, params, tb=TB_DEFAULT):
    """x_ncw: (B, 1, 32) float32, PyTorch NCW layout. Returns (B, 2)."""
    B, c_in, L = x_ncw.shape
    assert c_in == 1 and L == L_IN

    # Lane-dense 2-D input slab; pad batch to a multiple of the batch tile.
    x2d = x_ncw.reshape(B, L).astype(jnp.float32)
    n_blocks = pl.cdiv(B, tb)
    b_pad = n_blocks * tb
    if b_pad != B:
        x2d = jnp.pad(x2d, ((0, b_pad - B), (0, 0)))

    # Host-side constants (layout glue only; built once).
    T1o = L_IN // 2                                             # 16
    T2o = L_IN // 4                                             # 8
    a1e = _conv1_pool_matrix(params["conv1_w"], 0)              # (32, 256)
    a1o = _conv1_pool_matrix(params["conv1_w"], 1)              # (32, 256)
    b1 = jnp.repeat(params["conv1_b"].astype(jnp.float32), T1o).reshape(1, 16 * T1o)
    a2e = _conv2_pool_matrix(params["conv2_w"], 0)              # (256, 256)
    a2o = _conv2_pool_matrix(params["conv2_w"], 1)              # (256, 256)
    b2 = jnp.repeat(params["conv2_b"].astype(jnp.float32), T2o).reshape(1, 32 * T2o)
    wf1 = params["fc1_w"].T.astype(jnp.float32)                 # (256, 64)
    bf1 = params["fc1_b"].reshape(1, 64).astype(jnp.float32)
    wf2 = jnp.zeros((64, 128), jnp.float32).at[:, :2].set(params["fc2_w"].T)
    bf2 = jnp.zeros((1, 128), jnp.float32).at[:, :2].set(params["fc2_b"])

    const = lambda b: (0, 0)                                    # VMEM-resident weights
    out = pl.pallas_call(
        _voice_net_kernel,
        out_shape=jax.ShapeDtypeStruct((b_pad, 128), jnp.float32),
        grid=(n_blocks,),
        in_specs=[
            pl.BlockSpec((tb, L_IN), lambda b: (b, 0)),         # x batch tile
            pl.BlockSpec((L_IN, 16 * T1o), const),              # conv1 even-time matrix
            pl.BlockSpec((L_IN, 16 * T1o), const),              # conv1 odd-time matrix
            pl.BlockSpec((1, 16 * T1o), const),                 # conv1 bias (flat)
            pl.BlockSpec((16 * T1o, 32 * T2o), const),          # conv2 even-time matrix
            pl.BlockSpec((16 * T1o, 32 * T2o), const),          # conv2 odd-time matrix
            pl.BlockSpec((1, 32 * T2o), const),                 # conv2 bias (flat)
            pl.BlockSpec((256, 64), const),                     # fc1 weight
            pl.BlockSpec((1, 64), const),                       # fc1 bias
            pl.BlockSpec((64, 128), const),                     # fc2 weight (padded)
            pl.BlockSpec((1, 128), const),                      # fc2 bias (padded)
        ],
        out_specs=pl.BlockSpec((tb, 128), lambda b: (b, 0)),    # lane-dense output
        compiler_params=pltpu.CompilerParams(
            dimension_semantics=("parallel",),                  # v7x: 2 TCs
            vmem_limit_bytes=32 * 1024 * 1024,
        ),
    )(x2d, a1e, a1o, b1, a2e, a2o, b2, wf1, bf1, wf2, bf2)

    return out[:B, :2]


# ---------------------------------------------------------------------------
# Pure-JAX reference replicating the PyTorch forward (NCW)
# ---------------------------------------------------------------------------
def reference_forward(x, p):
    dn = ("NCH", "OIH", "NCH")
    h = jax.lax.conv_general_dilated(x, p["conv1_w"], (1,), [(1, 1)],
                                     dimension_numbers=dn)
    h = jax.nn.relu(h + p["conv1_b"][None, :, None])
    B, C, T = h.shape
    h = jnp.max(h.reshape(B, C, T // 2, 2), axis=-1)
    h = jax.lax.conv_general_dilated(h, p["conv2_w"], (1,), [(1, 1)],
                                     dimension_numbers=dn)
    h = jax.nn.relu(h + p["conv2_b"][None, :, None])
    B, C, T = h.shape
    h = jnp.max(h.reshape(B, C, T // 2, 2), axis=-1)
    h = h.reshape(B, -1)
    h = jax.nn.relu(h @ p["fc1_w"].T + p["fc1_b"])
    return h @ p["fc2_w"].T + p["fc2_b"]


def init_params(key):
    """Deterministic synthetic parameters with PyTorch shapes."""
    ks = jax.random.split(key, 8)

    def u(k, shape, fan_in):
        bound = 1.0 / math.sqrt(fan_in)
        return jax.random.uniform(k, shape, jnp.float32, -bound, bound)

    return {
        "conv1_w": u(ks[0], (16, 1, 3), 3),
        "conv1_b": u(ks[1], (16,), 3),
        "conv2_w": u(ks[2], (32, 16, 3), 48),
        "conv2_b": u(ks[3], (32,), 48),
        "fc1_w": u(ks[4], (64, 256), 256),
        "fc1_b": u(ks[5], (64,), 256),
        "fc2_w": u(ks[6], (2, 64), 64),
        "fc2_b": u(ks[7], (2,), 64),
    }


if __name__ == "__main__":
    key = jax.random.PRNGKey(0)
    k_params, k_x = jax.random.split(key)
    params = init_params(k_params)

    B = 4
    x = jax.random.normal(k_x, (B, 1, L_IN), jnp.float32)   # PyTorch NCW input

    out = jax.block_until_ready(voice_detection_net_pallas(x, params))
    ref = jax.block_until_ready(reference_forward(x, params))

    assert out.shape == (B, 2)
    np.testing.assert_allclose(np.asarray(out), np.asarray(ref),
                               rtol=5e-4, atol=5e-4)
    print("KERNEL_OK")
</pallas_src>

<mosaic_0001>
module attributes {stable_mosaic.version = 11 : i64} {
  func.func @_voice_net_kernel(%arg0: i32, %arg1: memref<256x32xf32, #tpu.memory_space<vmem>>, %arg2: memref<32x256xf32, #tpu.memory_space<vmem>>, %arg3: memref<32x256xf32, #tpu.memory_space<vmem>>, %arg4: memref<1x256xf32, #tpu.memory_space<vmem>>, %arg5: memref<256x256xf32, #tpu.memory_space<vmem>>, %arg6: memref<256x256xf32, #tpu.memory_space<vmem>>, %arg7: memref<1x256xf32, #tpu.memory_space<vmem>>, %arg8: memref<256x64xf32, #tpu.memory_space<vmem>>, %arg9: memref<1x64xf32, #tpu.memory_space<vmem>>, %arg10: memref<64x128xf32, #tpu.memory_space<vmem>>, %arg11: memref<1x128xf32, #tpu.memory_space<vmem>>, %arg12: memref<256x128xf32, #tpu.memory_space<vmem>>) attributes {dimension_semantics = [#tpu.dimension_semantics<parallel>], iteration_bounds = array<i64: 1>, scalar_prefetch = 0 : i64, scratch_operands = 0 : i64, tpu.core_type = #tpu.core_type<tc>, window_params = [{transform_indices = @transform_0, window_bounds = array<i64: 256, 32>}, {pipeline_mode = #tpu.pipeline_mode<synchronous>, transform_indices = @transform_1, window_bounds = array<i64: 32, 256>}, {pipeline_mode = #tpu.pipeline_mode<synchronous>, transform_indices = @transform_2, window_bounds = array<i64: 32, 256>}, {pipeline_mode = #tpu.pipeline_mode<synchronous>, transform_indices = @transform_3, window_bounds = array<i64: 1, 256>}, {pipeline_mode = #tpu.pipeline_mode<synchronous>, transform_indices = @transform_4, window_bounds = array<i64: 256, 256>}, {pipeline_mode = #tpu.pipeline_mode<synchronous>, transform_indices = @transform_5, window_bounds = array<i64: 256, 256>}, {pipeline_mode = #tpu.pipeline_mode<synchronous>, transform_indices = @transform_6, window_bounds = array<i64: 1, 256>}, {pipeline_mode = #tpu.pipeline_mode<synchronous>, transform_indices = @transform_7, window_bounds = array<i64: 256, 64>}, {pipeline_mode = #tpu.pipeline_mode<synchronous>, transform_indices = @transform_8, window_bounds = array<i64: 1, 64>}, {pipeline_mode = #tpu.pipeline_mode<synchronous>, transform_indices = @transform_9, window_bounds = array<i64: 64, 128>}, {pipeline_mode = #tpu.pipeline_mode<synchronous>, transform_indices = @transform_10, window_bounds = array<i64: 1, 128>}, {transform_indices = @transform_11, window_bounds = array<i64: 256, 128>}]} {
    %c0 = arith.constant 0 : index
    %c0_0 = arith.constant 0 : index
    %0 = vector.load %arg1[%c0, %c0_0] : memref<256x32xf32, #tpu.memory_space<vmem>>, vector<256x32xf32>
    %c0_1 = arith.constant 0 : index
    %c0_2 = arith.constant 0 : index
    %1 = vector.load %arg4[%c0_1, %c0_2] : memref<1x256xf32, #tpu.memory_space<vmem>>, vector<1x256xf32>
    %c0_3 = arith.constant 0 : index
    %c0_4 = arith.constant 0 : index
    %2 = vector.load %arg2[%c0_3, %c0_4] : memref<32x256xf32, #tpu.memory_space<vmem>>, vector<32x256xf32>
    %cst = arith.constant dense<0.000000e+00> : vector<256x256xf32>
    %3 = tpu.matmul %0, %2, %cst {dimension_numbers = #tpu.dot_dimension_numbers<[1], [0], [0], [1], [0, 0, 1, 1], [], []>} : vector<256x32xf32>, vector<32x256xf32>, vector<256x256xf32> -> vector<256x256xf32>
    %4 = vector.broadcast %1 : vector<1x256xf32> to vector<256x256xf32>
    %5 = arith.addf %3, %4 : vector<256x256xf32>
    %c0_5 = arith.constant 0 : index
    %c0_6 = arith.constant 0 : index
    %6 = vector.load %arg3[%c0_5, %c0_6] : memref<32x256xf32, #tpu.memory_space<vmem>>, vector<32x256xf32>
    %cst_7 = arith.constant dense<0.000000e+00> : vector<256x256xf32>
    %7 = tpu.matmul %0, %6, %cst_7 {dimension_numbers = #tpu.dot_dimension_numbers<[1], [0], [0], [1], [0, 0, 1, 1], [], []>} : vector<256x32xf32>, vector<32x256xf32>, vector<256x256xf32> -> vector<256x256xf32>
    %8 = vector.broadcast %1 : vector<1x256xf32> to vector<256x256xf32>
    %9 = arith.addf %7, %8 : vector<256x256xf32>
    %10 = arith.maximumf %5, %9 : vector<256x256xf32>
    %cst_8 = arith.constant 0.000000e+00 : f32
    %11 = vector.broadcast %cst_8 : f32 to vector<256x256xf32>
    %12 = arith.maximumf %10, %11 : vector<256x256xf32>
    %c0_9 = arith.constant 0 : index
    %c0_10 = arith.constant 0 : index
    %13 = vector.load %arg7[%c0_9, %c0_10] : memref<1x256xf32, #tpu.memory_space<vmem>>, vector<1x256xf32>
    %c0_11 = arith.constant 0 : index
    %c0_12 = arith.constant 0 : index
    %14 = vector.load %arg5[%c0_11, %c0_12] : memref<256x256xf32, #tpu.memory_space<vmem>>, vector<256x256xf32>
    %cst_13 = arith.constant dense<0.000000e+00> : vector<256x256xf32>
    %15 = tpu.matmul %12, %14, %cst_13 {dimension_numbers = #tpu.dot_dimension_numbers<[1], [0], [0], [1], [0, 0, 1, 1], [], []>} : vector<256x256xf32>, vector<256x256xf32>, vector<256x256xf32> -> vector<256x256xf32>
    %16 = vector.broadcast %13 : vector<1x256xf32> to vector<256x256xf32>
    %17 = arith.addf %15, %16 : vector<256x256xf32>
    %c0_14 = arith.constant 0 : index
    %c0_15 = arith.constant 0 : index
    %18 = vector.load %arg6[%c0_14, %c0_15] : memref<256x256xf32, #tpu.memory_space<vmem>>, vector<256x256xf32>
    %cst_16 = arith.constant dense<0.000000e+00> : vector<256x256xf32>
    %19 = tpu.matmul %12, %18, %cst_16 {dimension_numbers = #tpu.dot_dimension_numbers<[1], [0], [0], [1], [0, 0, 1, 1], [], []>} : vector<256x256xf32>, vector<256x256xf32>, vector<256x256xf32> -> vector<256x256xf32>
    %20 = vector.broadcast %13 : vector<1x256xf32> to vector<256x256xf32>
    %21 = arith.addf %19, %20 : vector<256x256xf32>
    %22 = arith.maximumf %17, %21 : vector<256x256xf32>
    %cst_17 = arith.constant 0.000000e+00 : f32
    %23 = vector.broadcast %cst_17 : f32 to vector<256x256xf32>
    %24 = arith.maximumf %22, %23 : vector<256x256xf32>
    %c0_18 = arith.constant 0 : index
    %c0_19 = arith.constant 0 : index
    %25 = vector.load %arg8[%c0_18, %c0_19] : memref<256x64xf32, #tpu.memory_space<vmem>>, vector<256x64xf32>
    %cst_20 = arith.constant dense<0.000000e+00> : vector<256x64xf32>
    %26 = tpu.matmul %24, %25, %cst_20 {dimension_numbers = #tpu.dot_dimension_numbers<[1], [0], [0], [1], [0, 0, 1, 1], [], []>} : vector<256x256xf32>, vector<256x64xf32>, vector<256x64xf32> -> vector<256x64xf32>
    %c0_21 = arith.constant 0 : index
    %c0_22 = arith.constant 0 : index
    %27 = vector.load %arg9[%c0_21, %c0_22] : memref<1x64xf32, #tpu.memory_space<vmem>>, vector<1x64xf32>
    %28 = vector.broadcast %27 : vector<1x64xf32> to vector<256x64xf32>
    %29 = arith.addf %26, %28 : vector<256x64xf32>
    %cst_23 = arith.constant 0.000000e+00 : f32
    %30 = vector.broadcast %cst_23 : f32 to vector<256x64xf32>
    %31 = arith.maximumf %29, %30 : vector<256x64xf32>
    %c0_24 = arith.constant 0 : index
    %c0_25 = arith.constant 0 : index
    %32 = vector.load %arg10[%c0_24, %c0_25] : memref<64x128xf32, #tpu.memory_space<vmem>>, vector<64x128xf32>
    %cst_26 = arith.constant dense<0.000000e+00> : vector<256x128xf32>
    %33 = tpu.matmul %31, %32, %cst_26 {dimension_numbers = #tpu.dot_dimension_numbers<[1], [0], [0], [1], [0, 0, 1, 1], [], []>} : vector<256x64xf32>, vector<64x128xf32>, vector<256x128xf32> -> vector<256x128xf32>
    %c0_27 = arith.constant 0 : index
    %c0_28 = arith.constant 0 : index
    %34 = vector.load %arg11[%c0_27, %c0_28] : memref<1x128xf32, #tpu.memory_space<vmem>>, vector<1x128xf32>
    %35 = vector.broadcast %34 : vector<1x128xf32> to vector<256x128xf32>
    %36 = arith.addf %33, %35 : vector<256x128xf32>
    %c0_29 = arith.constant 0 : index
    %c0_30 = arith.constant 0 : index
    %37 = vector.load %arg12[%c0_29, %c0_30] : memref<256x128xf32, #tpu.memory_space<vmem>>, vector<256x128xf32>
    tpu.vector_store %arg12[%c0_29, %c0_30], %36 {strides = array<i32>} : memref<256x128xf32, #tpu.memory_space<vmem>>, vector<256x128xf32>,
    return
  }
  func.func @transform_0(%arg0: i32) -> (i32, i32) {
    %c0_i32 = arith.constant 0 : i32
    %c0_i32_0 = arith.constant 0 : i32
    return %arg0, %c0_i32 : i32, i32
  }
  func.func @transform_1(%arg0: i32) -> (i32, i32) {
    %c0_i32 = arith.constant 0 : i32
    %c0_i32_0 = arith.constant 0 : i32
    %c0_i32_1 = arith.constant 0 : i32
    return %c0_i32, %c0_i32_0 : i32, i32
  }
  func.func @transform_2(%arg0: i32) -> (i32, i32) {
    %c0_i32 = arith.constant 0 : i32
    %c0_i32_0 = arith.constant 0 : i32
    %c0_i32_1 = arith.constant 0 : i32
    return %c0_i32, %c0_i32_0 : i32, i32
  }
  func.func @transform_3(%arg0: i32) -> (i32, i32) {
    %c0_i32 = arith.constant 0 : i32
    %c0_i32_0 = arith.constant 0 : i32
    %c0_i32_1 = arith.constant 0 : i32
    return %c0_i32, %c0_i32_0 : i32, i32
  }
  func.func @transform_4(%arg0: i32) -> (i32, i32) {
    %c0_i32 = arith.constant 0 : i32
    %c0_i32_0 = arith.constant 0 : i32
    %c0_i32_1 = arith.constant 0 : i32
    return %c0_i32, %c0_i32_0 : i32, i32
  }
  func.func @transform_5(%arg0: i32) -> (i32, i32) {
    %c0_i32 = arith.constant 0 : i32
    %c0_i32_0 = arith.constant 0 : i32
    %c0_i32_1 = arith.constant 0 : i32
    return %c0_i32, %c0_i32_0 : i32, i32
  }
  func.func @transform_6(%arg0: i32) -> (i32, i32) {
    %c0_i32 = arith.constant 0 : i32
    %c0_i32_0 = arith.constant 0 : i32
    %c0_i32_1 = arith.constant 0 : i32
    return %c0_i32, %c0_i32_0 : i32, i32
  }
  func.func @transform_7(%arg0: i32) -> (i32, i32) {
    %c0_i32 = arith.constant 0 : i32
    %c0_i32_0 = arith.constant 0 : i32
    %c0_i32_1 = arith.constant 0 : i32
    return %c0_i32, %c0_i32_0 : i32, i32
  }
  func.func @transform_8(%arg0: i32) -> (i32, i32) {
    %c0_i32 = arith.constant 0 : i32
    %c0_i32_0 = arith.constant 0 : i32
    %c0_i32_1 = arith.constant 0 : i32
    return %c0_i32, %c0_i32_0 : i32, i32
  }
  func.func @transform_9(%arg0: i32) -> (i32, i32) {
    %c0_i32 = arith.constant 0 : i32
    %c0_i32_0 = arith.constant 0 : i32
    %c0_i32_1 = arith.constant 0 : i32
    return %c0_i32, %c0_i32_0 : i32, i32
  }
  func.func @transform_10(%arg0: i32) -> (i32, i32) {
    %c0_i32 = arith.constant 0 : i32
    %c0_i32_0 = arith.constant 0 : i32
    %c0_i32_1 = arith.constant 0 : i32
    return %c0_i32, %c0_i32_0 : i32, i32
  }
  func.func @transform_11(%arg0: i32) -> (i32, i32) {
    %c0_i32 = arith.constant 0 : i32
    %c0_i32_0 = arith.constant 0 : i32
    return %arg0, %c0_i32 : i32, i32
  }
}

</mosaic_0001>

<bundles_post_ra>
// kernel: tpu_custom_call.1
= control target key start
LH: loop header
LB: loop body
LE: loop exit
PB: predicated region body
PF: predicated region fallthrough
CT: control target
= control target key end

     0   :  { %16 = vsyncpa [#allocation3], 0  ;;  %s5429_s0 = inlined_call_operand.vmem [shape: f32[256,32], index: 0, kind: input, shape index: {}]   ;;  %s5430_s1 = inlined_call_operand.vmem [shape: f32[32,256], index: 1, kind: input, shape index: {}]   ;;  %s5431_s2 = inlined_call_operand.hbm [shape: f32[32,256], index: 2, kind: input, shape index: {}]   ;;  %s5432_s3 = inlined_call_operand.hbm [shape: f32[1,256], index: 3, kind: input, shape index: {}]   ;;  %s5433_s4 = inlined_call_operand.vmem [shape: f32[256,256], index: 4, kind: input, shape index: {}]   ;;  %s5434_s5 = inlined_call_operand.hbm [shape: f32[256,256], index: 5, kind: input, shape index: {}]   ;;  %s5435_s6 = inlined_call_operand.hbm [shape: f32[1,256], index: 6, kind: input, shape index: {}]   ;;  %s5436_s7 = inlined_call_operand.vmem [shape: f32[256,64], index: 7, kind: input, shape index: {}]   ;;  %s5437_s8 = inlined_call_operand.vmem [shape: f32[1,64], index: 8, kind: input, shape index: {}]   ;;  %s5438_s9 = inlined_call_operand.hbm [shape: f32[64,128], index: 9, kind: input, shape index: {}]   ;;  %s5439_s10 = inlined_call_operand.vmem [shape: f32[1,128], index: 10, kind: input, shape index: {}]   ;;  %s5440_s11 = inlined_call_operand.hbm [shape: f32[256,128], index: 11, kind: output, shape index: {}]  }
   0x1   :  { %17 = vsyncpa [#allocation6], 0 }
   0x2   :  { %18 = vsyncpa [#allocation9], 0  ;;  %s42_s19 = sshll.u32 %s5432_s3, 4  ;;  %s43_s19 = int_to_ptr.hbm [resolvable:$true] %s42_s19 }
   0x3   :  { %19 = vsyncpa [#allocation4], 0  ;;  %s2923_s20 = smov [#allocation5]   ;;  %s68_s24 = sshll.u32 %s5435_s6, 4  ;;  %s69_s24 = int_to_ptr.hbm [resolvable:$true] %s68_s24 }
   0x4   :  { %s44_s21 = sshll.u32 %s2923_s20, 4  ;;  %s2924_s25 = smov [#allocation8]   ;;  %s45_s21 = int_to_ptr.vmem [resolvable:$true] %s44_s21 }
   0x5   :  { %47 = dma.hbm_to_vmem [thread:$0]  %s43_s19, 32, %s45_s21, [#allocation6]  }
   0x6   :  { %s70_s26 = sshll.u32 %s2924_s25, 4  ;;  %s28_s29 = sshll.u32 %s5431_s2, 4  ;;  %s71_s26 = int_to_ptr.vmem [resolvable:$true] %s70_s26  ;;  %s29_s29 = int_to_ptr.hbm [resolvable:$true] %s28_s29 }
   0x7   :  { %73 = dma.hbm_to_vmem [thread:$0]  %s69_s24, 32, %s71_s26, [#allocation9]  }
   0x8   :  { %s2925_s3 = smov [#allocation2]   ;;  %s54_s14 = sshll.u32 %s5434_s5, 4  ;;  %s55_s14 = int_to_ptr.hbm [resolvable:$true] %s54_s14 }
   0x9   :  { %s30_s30 = sshll.u32 %s2925_s3, 4  ;;  %s2926_s15 = smov 256   ;;  %s31_s30 = int_to_ptr.vmem [resolvable:$true] %s30_s30 }
   0xa   :  { %s2927_s6 = smov 16   ;;  %s2928_s16 = smov [#allocation7]  }
   0xb   :  { %36 = dma.hbm_to_vmem [thread:$0]  %s29_s29, 1024, %s31_s30, [#allocation3], %s2926_s15, %s2926_s15, %s2927_s6  }
   0xc   :  { %s56_s17 = sshll.u32 %s2928_s16, 4  ;;  %s82_s2 = sshll.u32 %s5438_s9, 4  ;;  %s57_s17 = int_to_ptr.vmem [resolvable:$true] %s56_s17  ;;  %s83_s2 = int_to_ptr.hbm [resolvable:$true] %s82_s2 }
   0xd   :  { %62 = dma.hbm_to_vmem [thread:$0]  %s55_s14, 8192, %s57_s17, [#allocation6], %s2926_s15, %s2926_s15, %s2927_s6  }
   0xe   :  { %s2929_s20 = smov [#allocation10]   ;;  %s2930_s22 = smov 128  }
   0xf   :  { %s84_s21 = sshll.u32 %s2929_s20, 4  ;;  %s2931_s23 = smov 8   ;;  %s85_s21 = int_to_ptr.vmem [resolvable:$true] %s84_s21 }
  0x10   :  { %90 = dma.hbm_to_vmem [thread:$0]  %s83_s2, 1024, %s85_s21, [#allocation9], %s2930_s22, %s2930_s22, %s2931_s23  }
  0x11   :  { %2915 = dma.done.wait [#allocation3], 1024  }
  0x12   :  { %2916 = vsyncadd [#allocation3], 4294966272 }
  0x13   :  { %2917 = dma.done.wait [#allocation6], 8224  }
  0x14   :  { %2918 = vsyncadd [#allocation6], 4294959072 }
  0x15   :  { %2919 = dma.done.wait [#allocation9], 1056  }
  0x16   :  { %2920 = vsyncadd [#allocation9], 4294966240  ;;  %v152_v0 = vld [vmem:[%s5430_s1 + $0x30] sm:$0xff]  ;;  %v150_v2 = vld [vmem:[%s5430_s1 + $0x20] sm:$0xff]  ;;  %vm159_vm0 = vcmask 261120   ;;  %vm2316_vm1 = vcmask 523264  }
  0x17   :  { %v488_v1 = vld [vmem:[#allocation2 + $0x30] sm:$0xff]  ;;  %268 = vmatpush.msra.mxu0 %v152_v0  ;;  %2739 = vmatpush.msra.mxu3 %v152_v0  ;;  %v486_v3 = vld [vmem:[#allocation2 + $0x20] sm:$0xff]  ;;  %v153_v6 = vld [vmem:[%s5430_s1 + $0x38] sm:$0xff]  ;;  %s2564_s12 = sshll.u32 %s5440_s11, 4  ;;  %s2565_s12 = int_to_ptr.hbm [resolvable:$true] %s2564_s12 }
  0x18   :  { %502 = vmatpush.msra.mxu2 %v488_v1  ;;  %v148_v4 = vld [vmem:[%s5430_s1 + $0x10] sm:$0xff]  ;;  %v146_v7 = vld [vmem:[%s5430_s1] sm:$0xff]  ;;  %381 = vmatpush.msra.mxu1 %v153_v6  ;;  %v151_v10 = vld [vmem:[%s5430_s1 + $0x28] sm:$0xff] }
  0x19   :  { %269 = vmatpush.msra.mxu0 %v150_v2  ;;  %2740 = vmatpush.msra.mxu3 %v150_v2  ;;  %v484_v5 = vld [vmem:[#allocation2 + $0x10] sm:$0xff]  ;;  %v482_v8 = vld [vmem:[#allocation2] sm:$0xff]  ;;  %v149_v12 = vld [vmem:[%s5430_s1 + $0x18] sm:$0xff] }
  0x1a   :  { %503 = vmatpush.msra.mxu2 %v486_v3  ;;  %v3029_v9 = vld [vmem:[%s5429_s0] sm:$0xff]  ;;  %382 = vmatpush.msra.mxu1 %v151_v10  ;;  %v3051_v13 = vld [vmem:[%s5429_s0 + $0x8] sm:$0xff]  ;;  %v3067_v15 = vld [vmem:[%s5429_s0 + $0x10] sm:$0xff] }
  0x1b   :  { %270 = vmatpush.msra.mxu0 %v148_v4  ;;  %2741 = vmatpush.msra.mxu3 %v148_v4  ;;  %v3037_v11 = vld [vmem:[%s5429_s0 + $0xc0] sm:$0xff]  ;;  %v3056_v14 = vld [vmem:[%s5429_s0 + $0xc8] sm:$0xff]  ;;  %v3072_v16 = vld [vmem:[%s5429_s0 + $0xd0] sm:$0xff] }
  0x1c   :  { %504 = vmatpush.msra.mxu2 %v484_v5  ;;  %383 = vmatpush.msra.mxu1 %v149_v12  ;;  %v147_v17 = vld [vmem:[%s5430_s1 + $0x8] sm:$0xff]  ;;  %v3088_v18 = vld [vmem:[%s5429_s0 + $0x18] sm:$0xff]  ;;  %v3106_v20 = vld [vmem:[%s5429_s0 + $0x20] sm:$0xff] }
  0x1d   :  { %271 = vmatpush.msra.mxu0 %v146_v7  ;;  %2742 = vmatpush.msra.mxu3 %v146_v7  ;;  %v3093_v19 = vld [vmem:[%s5429_s0 + $0xd8] sm:$0xff]  ;;  %v3111_v21 = vld [vmem:[%s5429_s0 + $0xe0] sm:$0xff]  ;;  %v3124_v22 = vld [vmem:[%s5429_s0 + $0x28] sm:$0xff] }
  0x1e   :  { %505 = vmatpush.msra.mxu2 %v482_v8  ;;  %2579 = vmatmul.msk.f32.vlgmr.msra.gmra.mxu0 %vm159_vm0, %v3029_v9  ;;  %v3129_v23 = vld [vmem:[%s5429_s0 + $0xe8] sm:$0xff]  ;;  %v3142_v24 = vld [vmem:[%s5429_s0 + $0x30] sm:$0xff]  ;;  %v3160_v26 = vld [vmem:[%s5429_s0 + $0x38] sm:$0xff] }
  0x1f   :  { %2603 = vmatmul.msk.f32.vlgmr.msra.gmra.mxu3 %vm159_vm0, %v3037_v11  ;;  %2643 = vmatmul.msk.f32.vlgmr.msra.gmra.mxu2 %vm159_vm0, %v3029_v9  ;;  %v3147_v25 = vld [vmem:[%s5429_s0 + $0xf0] sm:$0xff]  ;;  %v3165_v27 = vld [vmem:[%s5429_s0 + $0xf8] sm:$0xff]  ;;  %v3178_v28 = vld [vmem:[%s5429_s0 + $0x40] sm:$0xff] }
  0x20   :  { %2743 = vmatpush.msrb.mxu3 %v153_v6  ;;  %384 = vmatpush.msra.mxu1 %v147_v17  ;;  %v3191_v29 = vld [vmem:[%s5429_s0 + $0x48] sm:$0xff]  ;;  %v3204_v30 = vld [vmem:[%s5429_s0 + $0x50] sm:$0xff]  ;;  %v3217_v31 = vld [vmem:[%s5429_s0 + $0x58] sm:$0xff] }
  0x21   :  { %2611 = vmatmul.msk.f32.vlgmr.msra.gmra.mxu1 %vm159_vm0, %v3029_v9  ;;  %v3230_v32 = vld [vmem:[%s5429_s0 + $0x60] sm:$0xff]  ;;  %v489_v33 = vld [vmem:[#allocation2 + $0x38] sm:$0xff]  ;;  %v3243_v34 = vld [vmem:[%s5429_s0 + $0x68] sm:$0xff] }
  0x22   :  { %2744 = vmatpush.msrb.mxu3 %v151_v10  ;;  %v875_v35 = vld [vmem:[%s5433_s4 + $0xf0] sm:$0xff]  ;;  %v487_v38 = vld [vmem:[#allocation2 + $0x28] sm:$0xff]  ;;  %v3275_v39 = vld [vmem:[%s5429_s0 + $0x78] sm:$0xff] }
  0x23   :  { %v907_v36 = vld [vmem:[%s5433_s4 + $0x1f0] sm:$0xff]  ;;  %914 = vmatpush.msrb.mxu0 %v875_v35  ;;  %v873_v40 = vld [vmem:[%s5433_s4 + $0xe0] sm:$0xff]  ;;  %v485_v44 = vld [vmem:[#allocation2 + $0x18] sm:$0xff] }
  0x24   :  { %2745 = vmatpush.msrb.mxu3 %v149_v12  ;;  %1027 = vmatpush.msrb.mxu1 %v907_v36  ;;  %v3262_v37 = vld [vmem:[%s5429_s0 + $0x70] sm:$0xff]  ;;  %v905_v41 = vld [vmem:[%s5433_s4 + $0x1e0] sm:$0xff]  ;;  %v876_v46 = vld [vmem:[%s5433_s4 + $0xf8] sm:$0xff] }
  0x25   :  { %915 = vmatpush.msrb.mxu0 %v873_v40  ;;  %v3296_v43 = vld [vmem:[%s5429_s0 + $0x80] sm:$0xff]  ;;  %v871_v45 = vld [vmem:[%s5433_s4 + $0xd0] sm:$0xff]  ;;  %1140 = vmatpush.msrb.mxu2 %v876_v46  ;;  %v874_v48 = vld [vmem:[%s5433_s4 + $0xe8] sm:$0xff] }
  0x26   :  { %2580 = vmatmul.msk.f32.gmra.mxu0 %vm159_vm0, %v3051_v13  ;;  %2746 = vmatpush.msrb.mxu3 %v147_v17  ;;  %v903_v47 = vld [vmem:[%s5433_s4 + $0x1d0] sm:$0xff]  ;;  %v3327_v52 = vld [vmem:[%s5429_s0 + $0x88] sm:$0xff]  ;;  %v872_v53 = vld [vmem:[%s5433_s4 + $0xd8] sm:$0xff] }
  0x27   :  { %2604 = vmatmul.msk.f32.gmra.mxu3 %vm159_vm0, %v3056_v14  ;;  %2644 = vmatmul.msk.f32.gmra.mxu2 %vm159_vm0, %v3051_v13  ;;  %v869_v54 = vld [vmem:[%s5433_s4 + $0xc0] sm:$0xff]  ;;  %v870_v55 = vld [vmem:[%s5433_s4 + $0xc8] sm:$0xff]  ;;  %v867_v56 = vld [vmem:[%s5433_s4 + $0xb0] sm:$0xff] }
  0x28   :  { %2747 = vmatpush.msra.mxu3 %v488_v1  ;;  %1028 = vmatpush.msrb.mxu1 %v905_v41  ;;  %v868_v57 = vld [vmem:[%s5433_s4 + $0xb8] sm:$0xff]  ;;  %v865_v58 = vld [vmem:[%s5433_s4 + $0xa0] sm:$0xff]  ;;  %v866_v59 = vld [vmem:[%s5433_s4 + $0xa8] sm:$0xff] }
  0x29   :  { %2612 = vmatmul.msk.f32.gmra.mxu1 %vm159_vm0, %v3051_v13  ;;  %916 = vmatpush.msrb.mxu0 %v871_v45  ;;  %v3365_v63 = vld [vmem:[%s5429_s0 + $0x90] sm:$0xff]  ;;  %v864_v0 = vld [vmem:[%s5433_s4 + $0x98] sm:$0xff]  ;;  %v862_v2 = vld [vmem:[%s5433_s4 + $0x88] sm:$0xff] }
  0x2a   :  { %2748 = vmatpush.msra.mxu3 %v486_v3  ;;  %1029 = vmatpush.msrb.mxu1 %v903_v47  ;;  %v863_v1 = vld [vmem:[%s5433_s4 + $0x90] sm:$0xff]  ;;  %v901_v3 = vld [vmem:[%s5433_s4 + $0x1c0] sm:$0xff]  ;;  %v860_v6 = vld [vmem:[%s5433_s4 + $0x78] sm:$0xff] }
  0x2b   :  { %1141 = vmatpush.msrb.mxu2 %v874_v48  ;;  %917 = vmatpush.msrb.mxu0 %v869_v54  ;;  %v861_v4 = vld [vmem:[%s5433_s4 + $0x80] sm:$0xff]  ;;  %v859_v7 = vld [vmem:[%s5433_s4 + $0x70] sm:$0xff]  ;;  %v856_v17 = vld [vmem:[%s5433_s4 + $0x58] sm:$0xff] }
  0x2c   :  { %2749 = vmatpush.msra.mxu3 %v484_v5  ;;  %v483_v5 = vld [vmem:[#allocation2 + $0x8] sm:$0xff]  ;;  %1030 = vmatpush.msrb.mxu1 %v901_v3  ;;  %v899_v36 = vld [vmem:[%s5433_s4 + $0x1b0] sm:$0xff]  ;;  %v3448_v45 = vld [vmem:[%s5429_s0 + $0xa0] sm:$0xff] }
  0x2d   :  { %1142 = vmatpush.msrb.mxu2 %v872_v53  ;;  %918 = vmatpush.msrb.mxu0 %v867_v56  ;;  %v854_v35 = vld [vmem:[%s5433_s4 + $0x48] sm:$0xff]  ;;  %v851_v47 = vld [vmem:[%s5433_s4 + $0x30] sm:$0xff]  ;;  %v848_v48 = vld [vmem:[%s5433_s4 + $0x18] sm:$0xff] }
  0x2e   :  { %2581 = vmatmul.msk.f32.gmra.mxu0 %vm159_vm0, %v3067_v15  ;;  %2750 = vmatpush.msra.mxu3 %v482_v8  ;;  %v850_v46 = vld [vmem:[%s5433_s4 + $0x28] sm:$0xff]  ;;  %v849_v53 = vld [vmem:[%s5433_s4 + $0x20] sm:$0xff]  ;;  %v847_v56 = vld [vmem:[%s5433_s4 + $0x10] sm:$0xff] }
  0x2f   :  { %2605 = vmatmul.msk.f32.gmra.mxu3 %vm159_vm0, %v3072_v16  ;;  %2645 = vmatmul.msk.f32.gmra.mxu2 %vm159_vm0, %v3067_v15  ;;  %v846_v54 = vld [vmem:[%s5433_s4 + $0x8] sm:$0xff] }
  0x30   :  { %1143 = vmatpush.msrb.mxu2 %v870_v55  ;;  %919 = vmatpush.msrb.mxu0 %v865_v58  ;;  %v908_v55 = vld [vmem:[%s5433_s4 + $0x1f8] sm:$0xff] }
  0x31   :  { %2613 = vmatmul.msk.f32.gmra.mxu1 %vm159_vm0, %v3067_v15 }
  0x32   :  { %1144 = vmatpush.msrb.mxu2 %v868_v57  ;;  %920 = vmatpush.msrb.mxu0 %v863_v1  ;;  %v897_v1 = vld [vmem:[%s5433_s4 + $0x1a0] sm:$0xff] }
  0x33   :  { %1031 = vmatpush.msrb.mxu1 %v899_v36  ;;  %v3547_v36 = vld [vmem:[%s5429_s0 + $0xb8] sm:$0xff] }
  0x34   :  { %1145 = vmatpush.msrb.mxu2 %v866_v59  ;;  %921 = vmatpush.msrb.mxu0 %v861_v4  ;;  %v3488_v59 = vld [vmem:[%s5429_s0 + $0xa8] sm:$0xff] }
  0x35   :  { %1032 = vmatpush.msrb.mxu1 %v897_v1 }
  0x36   :  { %2582 = vmatmul.msk.f32.gmra.mxu0 %vm159_vm0, %v3088_v18  ;;  %1146 = vmatpush.msrb.mxu2 %v864_v0  ;;  %v845_v0 = vld [vmem:[%s5433_s4] sm:$0xff] }
  0x37   :  { %2606 = vmatmul.msk.f32.gmra.mxu3 %vm159_vm0, %v3093_v19  ;;  %2646 = vmatmul.msk.f32.gmra.mxu2 %vm159_vm0, %v3088_v18 }
  0x38   :  { %1147 = vmatpush.msrb.mxu2 %v862_v2  ;;  %922 = vmatpush.msrb.mxu0 %v859_v7  ;;  %v895_v7 = vld [vmem:[%s5433_s4 + $0x190] sm:$0xff] }
  0x39   :  { %2614 = vmatmul.msk.f32.gmra.mxu1 %vm159_vm0, %v3088_v18 }
  0x3a   :  { %1148 = vmatpush.msrb.mxu2 %v860_v6  ;;  %v906_v6 = vld [vmem:[%s5433_s4 + $0x1e8] sm:$0xff]  ;;  %1033 = vmatpush.msrb.mxu1 %v895_v7 }
  0x3e   :  { %2583 = vmatmul.msk.f32.gmra.mxu0 %vm159_vm0, %v3106_v20 }
  0x3f   :  { %2607 = vmatmul.msk.f32.gmra.mxu3 %vm159_vm0, %v3111_v21  ;;  %2647 = vmatmul.msk.f32.gmra.mxu2 %vm159_vm0, %v3106_v20 }
  0x41   :  { %2615 = vmatmul.msk.f32.gmra.mxu1 %vm159_vm0, %v3106_v20 }
  0x46   :  { %2584 = vmatmul.msk.f32.gmra.mxu0 %vm159_vm0, %v3124_v22 }
  0x47   :  { %2608 = vmatmul.msk.f32.gmra.mxu3 %vm159_vm0, %v3129_v23  ;;  %2648 = vmatmul.msk.f32.gmra.mxu2 %vm159_vm0, %v3124_v22 }
  0x49   :  { %2616 = vmatmul.msk.f32.gmra.mxu1 %vm159_vm0, %v3124_v22 }
  0x4e   :  { %2585 = vmatmul.msk.f32.gmra.mxu0 %vm159_vm0, %v3142_v24 }
  0x4f   :  { %2609 = vmatmul.msk.f32.gmra.mxu3 %vm159_vm0, %v3147_v25  ;;  %2649 = vmatmul.msk.f32.gmra.mxu2 %vm159_vm0, %v3142_v24 }
  0x51   :  { %2617 = vmatmul.msk.f32.gmra.mxu1 %vm159_vm0, %v3142_v24 }
  0x56   :  { %2586 = vmatmul.msk.f32.gmra.mxu0 %vm159_vm0, %v3160_v26 }
  0x57   :  { %2610 = vmatmul.msk.f32.gmra.mxu3 %vm159_vm0, %v3165_v27  ;;  %2650 = vmatmul.msk.f32.gmra.mxu2 %vm159_vm0, %v3160_v26 }
  0x59   :  { %2618 = vmatmul.msk.f32.gmra.mxu1 %vm159_vm0, %v3160_v26 }
  0x5e   :  { %2587 = vmatmul.msk.f32.gmra.mxu0 %vm159_vm0, %v3178_v28 }
  0x5f   :  { %2635 = vmatmul.msk.f32.vlgmr.msrb.gmra.mxu3 %vm159_vm0, %v3037_v11  ;;  %2651 = vmatmul.msk.f32.gmra.mxu2 %vm159_vm0, %v3178_v28 }
  0x60   :  { %615 = vmatpush.msrb.mxu3 %v489_v33  ;;  %v855_v33 = vld [vmem:[%s5433_s4 + $0x50] sm:$0xff] }
  0x61   :  { %2619 = vmatmul.msk.f32.gmra.mxu1 %vm159_vm0, %v3178_v28 }
  0x62   :  { %616 = vmatpush.msrb.mxu3 %v487_v38  ;;  %v853_v38 = vld [vmem:[%s5433_s4 + $0x40] sm:$0xff] }
  0x64   :  { %617 = vmatpush.msrb.mxu3 %v485_v44 }
  0x66   :  { %2588 = vmatmul.msk.f32.gmra.mxu0 %vm159_vm0, %v3191_v29  ;;  %618 = vmatpush.msrb.mxu3 %v483_v5  ;;  %v3513_v5 = vld [vmem:[%s5429_s0 + $0xb0] sm:$0xff] }
  0x67   :  { %2636 = vmatmul.msk.f32.gmra.mxu3 %vm159_vm0, %v3056_v14  ;;  %2652 = vmatmul.msk.f32.gmra.mxu2 %vm159_vm0, %v3191_v29 }
  0x69   :  { %2620 = vmatmul.msk.f32.gmra.mxu1 %vm159_vm0, %v3191_v29 }
  0x6e   :  { %2589 = vmatmul.msk.f32.gmra.mxu0 %vm159_vm0, %v3204_v30 }
  0x6f   :  { %2637 = vmatmul.msk.f32.gmra.mxu3 %vm159_vm0, %v3072_v16  ;;  %2653 = vmatmul.msk.f32.gmra.mxu2 %vm159_vm0, %v3204_v30 }
  0x71   :  { %2621 = vmatmul.msk.f32.gmra.mxu1 %vm159_vm0, %v3204_v30 }
  0x76   :  { %2590 = vmatmul.msk.f32.gmra.mxu0 %vm159_vm0, %v3217_v31 }
  0x77   :  { %2638 = vmatmul.msk.f32.gmra.mxu3 %vm159_vm0, %v3093_v19  ;;  %2654 = vmatmul.msk.f32.gmra.mxu2 %vm159_vm0, %v3217_v31 }
  0x79   :  { %2622 = vmatmul.msk.f32.gmra.mxu1 %vm159_vm0, %v3217_v31 }
  0x7e   :  { %2591 = vmatmul.msk.f32.gmra.mxu0 %vm159_vm0, %v3230_v32 }
  0x7f   :  { %2639 = vmatmul.msk.f32.gmra.mxu3 %vm159_vm0, %v3111_v21  ;;  %2655 = vmatmul.msk.f32.gmra.mxu2 %vm159_vm0, %v3230_v32 }
  0x81   :  { %2623 = vmatmul.msk.f32.gmra.mxu1 %vm159_vm0, %v3230_v32 }
  0x86   :  { %2592 = vmatmul.msk.f32.gmra.mxu0 %vm159_vm0, %v3243_v34 }
  0x87   :  { %2640 = vmatmul.msk.f32.gmra.mxu3 %vm159_vm0, %v3129_v23  ;;  %2656 = vmatmul.msk.f32.gmra.mxu2 %vm159_vm0, %v3243_v34 }
  0x89   :  { %2624 = vmatmul.msk.f32.gmra.mxu1 %vm159_vm0, %v3243_v34 }
  0x8e   :  { %2593 = vmatmul.msk.f32.gmra.mxu0 %vm159_vm0, %v3262_v37 }
  0x8f   :  { %2641 = vmatmul.msk.f32.gmra.mxu3 %vm159_vm0, %v3147_v25  ;;  %2657 = vmatmul.msk.f32.gmra.mxu2 %vm159_vm0, %v3262_v37 }
  0x91   :  { %2625 = vmatmul.msk.f32.gmra.mxu1 %vm159_vm0, %v3262_v37 }
  0x96   :  { %2594 = vmatmul.msk.f32.gmra.mxu0 %vm159_vm0, %v3275_v39 }
  0x97   :  { %2642 = vmatmul.msk.f32.gmra.mxu3 %vm159_vm0, %v3165_v27  ;;  %2658 = vmatmul.msk.f32.gmra.mxu2 %vm159_vm0, %v3275_v39 }
  0x99   :  { %2626 = vmatmul.msk.f32.gmra.mxu1 %vm159_vm0, %v3275_v39 }
  0x9b   :  { %v3291_v42 = vpop.f32.mrf.mxu0 }
  0x9e   :  { %2595 = vmatmul.msk.f32.gmra.mxu0 %vm159_vm0, %v3296_v43 }
  0x9f   :  { %2659 = vmatmul.msk.f32.gmra.mxu2 %vm159_vm0, %v3296_v43  ;;  %2667 = vmatmul.msk.f32.vlgmr.msra.gmra.mxu3 %vm159_vm0, %v3037_v11  ;;  %v858_v11 = vld [vmem:[%s5433_s4 + $0x68] sm:$0xff] }
  0xa0   :  { %1149 = vmatpush.msrb.mxu2 %v858_v11  ;;  %1253 = vmatpush.msra.mxu3 %v908_v55 }
  0xa1   :  { %2627 = vmatmul.msk.f32.gmra.mxu1 %vm159_vm0, %v3296_v43 }
  0xa2   :  { %v3316_v49 = vpop.f32.mrf.mxu3  ;;  %v3318_v50 = vpop.f32.mrf.mxu2  ;;  %1150 = vmatpush.msrb.mxu2 %v856_v17  ;;  %1254 = vmatpush.msra.mxu3 %v906_v6 }
  0xa3   :  { %v3322_v51 = vpop.f32.mrf.mxu0 }
  0xa4   :  { %1151 = vmatpush.msrb.mxu2 %v854_v35 }
  0xa6   :  { %2596 = vmatmul.msk.f32.gmra.mxu0 %vm159_vm0, %v3327_v52 }
  0xa7   :  { %2660 = vmatmul.msk.f32.gmra.mxu2 %vm159_vm0, %v3327_v52  ;;  %2668 = vmatmul.msk.f32.gmra.mxu3 %vm159_vm0, %v3056_v14  ;;  %v3408_v14 = vld [vmem:[%s5429_s0 + $0x98] sm:$0xff] }
  0xa9   :  { %2628 = vmatmul.msk.f32.gmra.mxu1 %vm159_vm0, %v3327_v52 }
  0xaa   :  { %v3356_v60 = vpop.f32.mrf.mxu3  ;;  %v3358_v61 = vpop.f32.mrf.mxu2 }
  0xab   :  { %v3360_v62 = vpop.f32.mrf.mxu0 }
  0xae   :  { %2597 = vmatmul.msk.f32.gmra.mxu0 %vm159_vm0, %v3365_v63 }
  0xaf   :  { %2661 = vmatmul.msk.f32.gmra.mxu2 %vm159_vm0, %v3365_v63  ;;  %2669 = vmatmul.msk.f32.gmra.mxu3 %vm159_vm0, %v3072_v16  ;;  %v857_v16 = vld [vmem:[%s5433_s4 + $0x60] sm:$0xff] }
  0xb0   :  { %923 = vmatpush.msrb.mxu0 %v857_v16 }
  0xb1   :  { %2629 = vmatmul.msk.f32.gmra.mxu1 %vm159_vm0, %v3365_v63 }
  0xb2   :  { %v3396_v8 = vpop.f32.mrf.mxu3  ;;  %v3398_v10 = vpop.f32.mrf.mxu2  ;;  %924 = vmatpush.msrb.mxu0 %v855_v33 }
  0xb3   :  { %v3403_v12 = vpop.f32.mrf.mxu0 }
  0xb4   :  { %925 = vmatpush.msrb.mxu0 %v853_v38 }
  0xb6   :  { %2598 = vmatmul.msk.f32.gmra.mxu0 %vm159_vm0, %v3408_v14 }
  0xb7   :  { %2662 = vmatmul.msk.f32.gmra.mxu2 %vm159_vm0, %v3408_v14  ;;  %2670 = vmatmul.msk.f32.gmra.mxu3 %vm159_vm0, %v3093_v19  ;;  %v852_v19 = vld [vmem:[%s5433_s4 + $0x38] sm:$0xff] }
  0xb8   :  { %1152 = vmatpush.msrb.mxu2 %v852_v19  ;;  %926 = vmatpush.msrb.mxu0 %v851_v47 }
  0xb9   :  { %2630 = vmatmul.msk.f32.gmra.mxu1 %vm159_vm0, %v3408_v14 }
  0xba   :  { %v3439_v40 = vpop.f32.mrf.mxu3  ;;  %v3441_v41 = vpop.f32.mrf.mxu2  ;;  %1153 = vmatpush.msrb.mxu2 %v850_v46  ;;  %927 = vmatpush.msrb.mxu0 %v849_v53 }
  0xbb   :  { %v3443_v44 = vpop.f32.mrf.mxu0 }
  0xbc   :  { %1154 = vmatpush.msrb.mxu2 %v848_v48  ;;  %928 = vmatpush.msrb.mxu0 %v847_v56 }
  0xbe   :  { %2599 = vmatmul.msk.f32.gmra.mxu0 %vm159_vm0, %v3448_v45  ;;  %1155 = vmatpush.msrb.mxu2 %v846_v54 }
  0xbf   :  { %2663 = vmatmul.msk.f32.gmra.mxu2 %vm159_vm0, %v3448_v45  ;;  %2671 = vmatmul.msk.f32.gmra.mxu3 %vm159_vm0, %v3111_v21 }
  0xc0   :  { %929 = vmatpush.msrb.mxu0 %v845_v0 }
  0xc1   :  { %2631 = vmatmul.msk.f32.gmra.mxu1 %vm159_vm0, %v3448_v45 }
  0xc2   :  { %v3479_v21 = vpop.f32.mrf.mxu3  ;;  %v3481_v57 = vpop.f32.mrf.mxu2 }
  0xc3   :  { %v3483_v58 = vpop.f32.mrf.mxu0 }
  0xc6   :  { %2600 = vmatmul.msk.f32.gmra.mxu0 %vm159_vm0, %v3488_v59 }
  0xc7   :  { %2664 = vmatmul.msk.f32.gmra.mxu2 %vm159_vm0, %v3488_v59  ;;  %2672 = vmatmul.msk.f32.gmra.mxu3 %vm159_vm0, %v3129_v23  ;;  %v3517_v23 = vld [vmem:[#allocation5] sm:$0x3] }
  0xc8   :  { %v3532_v11 = vperm.slane %v3517_v23, 0 }
  0xc9   :  { %2632 = vmatmul.msk.f32.gmra.mxu1 %vm159_vm0, %v3488_v59 }
  0xca   :  { %v3504_v2 = vpop.f32.mrf.mxu3  ;;  %v3506_v3 = vpop.f32.mrf.mxu2  ;;  %v274_v16 = vadd.f32 %v3291_v42, %v3532_v11  ;;  %v508_v17 = vadd.f32 %v3318_v50, %v3532_v11  ;;  %v277_v50 = vadd.f32 %v3322_v51, %v3532_v11  ;;  %v511_v19 = vadd.f32 %v3358_v61, %v3532_v11  ;;  %v904_v51 = vld [vmem:[%s5433_s4 + $0x1d8] sm:$0xff] }
  0xcb   :  { %v3508_v4 = vpop.f32.mrf.mxu0  ;;  %1255 = vmatpush.msra.mxu3 %v904_v51  ;;  %v280_v54 = vadd.f32 %v3360_v62, %v3532_v11  ;;  %v891_v62 = vld [vmem:[%s5433_s4 + $0x170] sm:$0xff]  ;;  %v283_v6 = vadd.f32 %v3403_v12, %v3532_v11  ;;  %v517_v7 = vadd.f32 %v3441_v41, %v3532_v11  ;;  %v902_v12 = vld [vmem:[%s5433_s4 + $0x1c8] sm:$0xff] }
  0xcc   :  { %v716_v38 = vmax.f32 %v274_v16, %v508_v17  ;;  %v718_v53 = vmax.f32 %v277_v50, %v511_v19  ;;  %v286_v50 = vadd.f32 %v3443_v44, %v3532_v11  ;;  %v520_v19 = vadd.f32 %v3481_v57, %v3532_v11  ;;  %v889_v44 = vld [vmem:[%s5433_s4 + $0x160] sm:$0xff] }
  0xcd   :  { %1256 = vmatpush.msra.mxu3 %v902_v12 }
  0xce   :  { %2601 = vmatmul.msk.f32.gmra.mxu0 %vm159_vm0, %v3513_v5  ;;  %v3557_v42 = vmax.f32 %v716_v38, 0.0  ;;  %v3581_v61 = vmax.f32 %v718_v53, 0.0  ;;  %v722_v38 = vmax.f32 %v283_v6, %v517_v7  ;;  %v724_v51 = vmax.f32 %v286_v50, %v520_v19 }
  0xcf   :  { %2665 = vmatmul.msk.f32.gmra.mxu2 %vm159_vm0, %v3513_v5  ;;  %2673 = vmatmul.msk.f32.gmra.mxu3 %vm159_vm0, %v3147_v25 }
  0xd0   :  { %v3623_v41 = vmax.f32 %v722_v38, 0.0  ;;  %v3642_v57 = vmax.f32 %v724_v51, 0.0  ;;  %v292_v38 = vadd.f32 %v3508_v4, %v3532_v11 }
  0xd1   :  { %2633 = vmatmul.msk.f32.gmra.mxu1 %vm159_vm0, %v3513_v5 }
  0xd2   :  { %v3538_v25 = vpop.f32.mrf.mxu3  ;;  %v3540_v33 = vpop.f32.mrf.mxu2 }
  0xd3   :  { %v3542_v35 = vpop.f32.mrf.mxu0 }
  0xd6   :  { %2602 = vmatmul.msk.f32.gmra.mxu0 %vm159_vm0, %v3547_v36 }
  0xd7   :  { %2666 = vmatmul.msk.f32.gmra.mxu2 %vm159_vm0, %v3547_v36  ;;  %2674 = vmatmul.msk.f32.gmra.mxu3 %vm159_vm0, %v3165_v27  ;;  %v893_v27 = vld [vmem:[%s5433_s4 + $0x180] sm:$0xff] }
  0xd8   :  { %1034 = vmatpush.msrb.mxu1 %v893_v27 }
  0xd9   :  { %2634 = vmatmul.msk.f32.gmra.mxu1 %vm159_vm0, %v3547_v36 }
  0xda   :  { %v3563_v46 = vpop.f32.mrf.mxu3  ;;  %v3565_v47 = vpop.f32.mrf.mxu2  ;;  %1035 = vmatpush.msrb.mxu1 %v891_v62 }
  0xdb   :  { %v3567_v48 = vpop.f32.mrf.mxu0 }
  0xdc   :  { %1036 = vmatpush.msrb.mxu1 %v889_v44  ;;  %v3677_v44 = vpop.f32.mrf.mxu1 }
  0xde   :  { %930 = vmatmul.f32.vlgmr.msrb.gmra.mxu0 %v3557_v42 }
  0xdf   :  { %2675 = vmatmul.msk.f32.vlgmr.msrb.gmra.mxu3 %vm159_vm0, %v3029_v9  ;;  %1156 = vmatmul.f32.vlgmr.msrb.gmra.mxu2 %v3557_v42  ;;  %v514_v9 = vadd.f32 %v3398_v10, %v3532_v11 }
  0xe1   :  { %v720_v1 = vmax.f32 %v280_v54, %v514_v9  ;;  %v289_v54 = vadd.f32 %v3483_v58, %v3532_v11  ;;  %v523_v9 = vadd.f32 %v3506_v3, %v3532_v11  ;;  %v900_v58 = vld [vmem:[%s5433_s4 + $0x1b8] sm:$0xff]  ;;  %v887_v3 = vld [vmem:[%s5433_s4 + $0x150] sm:$0xff] }
  0xe2   :  { %v3587_v55 = vpop.f32.mrf.mxu3  ;;  %v3589_v56 = vpop.f32.mrf.mxu2  ;;  %1257 = vmatpush.msra.mxu3 %v900_v58  ;;  %1037 = vmatpush.msrb.mxu1 %v887_v3 }
  0xe3   :  { %5483 = vst [vmem:[#allocation16_spill] sm:$0xff] %v3587_v55  ;;  %v3591_v0 = vpop.f32.mrf.mxu0  ;;  %v3602_v10 = vmax.f32 %v720_v1, 0.0  ;;  %v726_v6 = vmax.f32 %v289_v54, %v523_v9  ;;  %v529_v54 = vadd.f32 %v3565_v47, %v3532_v11  ;;  %v898_v47 = vld [vmem:[%s5433_s4 + $0x1a8] sm:$0xff] }
  0xe4   :  { %1258 = vmatpush.msra.mxu3 %v898_v47 }
  0xe5   :  { %v3664_v7 = vmax.f32 %v726_v6, 0.0 }
  0xe6   :  { %933 = vmatmul.f32.gmra.mxu0 %v3581_v61 }
  0xe7   :  { %2676 = vmatmul.msk.f32.gmra.mxu3 %vm159_vm0, %v3051_v13  ;;  %1159 = vmatmul.f32.gmra.mxu2 %v3581_v61  ;;  %5487 = vst [vmem:[#allocation20_spill] sm:$0xff] %v3664_v7 }
  0xea   :  { %v3608_v16 = vpop.f32.mrf.mxu3  ;;  %v3610_v17 = vpop.f32.mrf.mxu2 }
  0xeb   :  { %5484 = vst [vmem:[#allocation17_spill] sm:$0xff] %v3608_v16  ;;  %v3612_v13 = vpop.f32.mrf.mxu0 }
  0xee   :  { %936 = vmatmul.f32.gmra.mxu0 %v3602_v10 }
  0xef   :  { %2677 = vmatmul.msk.f32.gmra.mxu3 %vm159_vm0, %v3067_v15  ;;  %1162 = vmatmul.f32.gmra.mxu2 %v3602_v10 }
  0xf2   :  { %v3629_v53 = vpop.f32.mrf.mxu3  ;;  %v3631_v27 = vpop.f32.mrf.mxu2 }
  0xf3   :  { %5485 = vst [vmem:[#allocation18_spill] sm:$0xff] %v3629_v53  ;;  %v3633_v15 = vpop.f32.mrf.mxu0 }
  0xf6   :  { %939 = vmatmul.f32.gmra.mxu0 %v3623_v41 }
  0xf7   :  { %2678 = vmatmul.msk.f32.gmra.mxu3 %vm159_vm0, %v3088_v18  ;;  %1165 = vmatmul.f32.gmra.mxu2 %v3623_v41 }
  0xfa   :  { %v3648_v1 = vpop.f32.mrf.mxu3  ;;  %v3650_v62 = vpop.f32.mrf.mxu2 }
  0xfb   :  { %5486 = vst [vmem:[#allocation19_spill] sm:$0xff] %v3648_v1  ;;  %v3652_v18 = vpop.f32.mrf.mxu0 }
  0xfe   :  { %942 = vmatmul.f32.gmra.mxu0 %v3642_v57 }
  0xff   :  { %2679 = vmatmul.msk.f32.gmra.mxu3 %vm159_vm0, %v3106_v20  ;;  %1168 = vmatmul.f32.gmra.mxu2 %v3642_v57  ;;  %v526_v20 = vadd.f32 %v3540_v33, %v3532_v11  ;;  %v295_v33 = vadd.f32 %v3542_v35, %v3532_v11  ;;  %v885_v35 = vld [vmem:[%s5433_s4 + $0x140] sm:$0xff] }
 0x100   :  { %1038 = vmatpush.msrb.mxu1 %v885_v35  ;;  %v535_v35 = vadd.f32 %v3610_v17, %v3532_v11 }
 0x101   :  { %v728_v51 = vmax.f32 %v292_v38, %v526_v20  ;;  %v730_v3 = vmax.f32 %v295_v33, %v529_v54  ;;  %v298_v20 = vadd.f32 %v3567_v48, %v3532_v11  ;;  %v883_v48 = vld [vmem:[%s5433_s4 + $0x130] sm:$0xff] }
 0x102   :  { %v3670_v12 = vpop.f32.mrf.mxu3  ;;  %v3672_v50 = vpop.f32.mrf.mxu2  ;;  %1039 = vmatpush.msrb.mxu1 %v883_v48  ;;  %v538_v48 = vadd.f32 %v3631_v27, %v3532_v11 }
 0x103   :  { %5488 = vst [vmem:[#allocation21_spill] sm:$0xff] %v3670_v12  ;;  %v3674_v19 = vpop.f32.mrf.mxu0  ;;  %v3682_v4 = vmax.f32 %v728_v51, 0.0  ;;  %v3706_v38 = vmax.f32 %v730_v3, 0.0  ;;  %v301_v3 = vadd.f32 %v3591_v0, %v3532_v11  ;;  %v896_v0 = vld [vmem:[%s5433_s4 + $0x198] sm:$0xff] }
 0x104   :  { %1259 = vmatpush.msra.mxu3 %v896_v0 }
 0x105   :  { %5489 = vst [vmem:[#allocation22_spill] sm:$0xff] %v3682_v4 }
 0x106   :  { %945 = vmatmul.f32.gmra.mxu0 %v3664_v7  ;;  %5491 = vst [vmem:[#allocation24_spill] sm:$0xff] %v3706_v38 }
 0x107   :  { %2680 = vmatmul.msk.f32.gmra.mxu3 %vm159_vm0, %v3124_v22  ;;  %1171 = vmatmul.f32.gmra.mxu2 %v3664_v7  ;;  %v3695_v22 = vpop.f32.mrf.mxu1 }
 0x10a   :  { %v3688_v9 = vpop.f32.mrf.mxu3  ;;  %v3690_v6 = vpop.f32.mrf.mxu2 }
 0x10b   :  { %5490 = vst [vmem:[#allocation23_spill] sm:$0xff] %v3688_v9  ;;  %v3692_v58 = vpop.f32.mrf.mxu0 }
 0x10e   :  { %948 = vmatmul.f32.gmra.mxu0 %v3682_v4 }
 0x10f   :  { %2681 = vmatmul.msk.f32.gmra.mxu3 %vm159_vm0, %v3142_v24  ;;  %1174 = vmatmul.f32.gmra.mxu2 %v3682_v4  ;;  %v532_v24 = vadd.f32 %v3589_v56, %v3532_v11  ;;  %v3719_v12 = vpop.f32.mrf.mxu1 }
 0x111   :  { %v732_v9 = vmax.f32 %v298_v20, %v532_v24  ;;  %v734_v24 = vmax.f32 %v301_v3, %v535_v35 }
 0x112   :  { %v3712_v51 = vpop.f32.mrf.mxu3  ;;  %v3714_v33 = vpop.f32.mrf.mxu2 }
 0x113   :  { %5492 = vst [vmem:[#allocation25_spill] sm:$0xff] %v3712_v51  ;;  %v3716_v54 = vpop.f32.mrf.mxu0  ;;  %v3727_v56 = vmax.f32 %v732_v9, 0.0  ;;  %v3748_v17 = vmax.f32 %v734_v24, 0.0  ;;  %v304_v9 = vadd.f32 %v3612_v13, %v3532_v11 }
 0x115   :  { %5493 = vst [vmem:[#allocation26_spill] sm:$0xff] %v3727_v56  ;;  %v736_v0 = vmax.f32 %v304_v9, %v538_v48  ;;  %v541_v9 = vadd.f32 %v3650_v62, %v3532_v11  ;;  %v879_v62 = vld [vmem:[%s5433_s4 + $0x110] sm:$0xff] }
 0x116   :  { %951 = vmatmul.f32.gmra.mxu0 %v3706_v38  ;;  %5495 = vst [vmem:[#allocation28_spill] sm:$0xff] %v3748_v17 }
 0x117   :  { %2682 = vmatmul.msk.f32.gmra.mxu3 %vm159_vm0, %v3160_v26  ;;  %1177 = vmatmul.f32.gmra.mxu2 %v3706_v38  ;;  %v3740_v51 = vpop.f32.mrf.mxu1  ;;  %v3776_v27 = vmax.f32 %v736_v0, 0.0  ;;  %v319_v38 = vadd.f32 %v3716_v54, %v3532_v11 }
 0x119   :  { %5496 = vst [vmem:[#allocation29_spill] sm:$0xff] %v3776_v27 }
 0x11a   :  { %v3733_v47 = vpop.f32.mrf.mxu3  ;;  %v3735_v20 = vpop.f32.mrf.mxu2 }
 0x11b   :  { %5494 = vst [vmem:[#allocation27_spill] sm:$0xff] %v3733_v47  ;;  %v3737_v26 = vpop.f32.mrf.mxu0 }
 0x11e   :  { %954 = vmatmul.f32.gmra.mxu0 %v3727_v56 }
 0x11f   :  { %2683 = vmatmul.msk.f32.gmra.mxu3 %vm159_vm0, %v3178_v28  ;;  %1180 = vmatmul.f32.gmra.mxu2 %v3727_v56  ;;  %v3758_v28 = vadd.f32 %v3316_v49, %v3532_v11  ;;  %v3768_v13 = vpop.f32.mrf.mxu1  ;;  %v881_v49 = vld [vmem:[%s5433_s4 + $0x120] sm:$0xff] }
 0x120   :  { %1040 = vmatpush.msrb.mxu1 %v881_v49 }
 0x122   :  { %v3754_v3 = vpop.f32.mrf.mxu2  ;;  %v579_v35 = vpop.f32.mrf.mxu3  ;;  %1041 = vmatpush.msrb.mxu1 %v879_v62 }
 0x123   :  { %v3761_v47 = vadd.f32 %v579_v35, %v3532_v11  ;;  %v3763_v1 = vpop.f32.mrf.mxu0  ;;  %v307_v35 = vadd.f32 %v3633_v15, %v3532_v11 }
 0x124   :  { %v325_v7 = vadd.f32 %v3763_v1, %v3532_v11 }
 0x125   :  { %v738_v49 = vmax.f32 %v307_v35, %v541_v9  ;;  %v310_v35 = vadd.f32 %v3652_v18, %v3532_v11 }
 0x126   :  { %957 = vmatmul.f32.gmra.mxu0 %v3748_v17 }
 0x127   :  { %2684 = vmatmul.msk.f32.gmra.mxu3 %vm159_vm0, %v3191_v29  ;;  %1183 = vmatmul.f32.gmra.mxu2 %v3748_v17  ;;  %v3786_v29 = vadd.f32 %v3356_v60, %v3532_v11  ;;  %v3796_v15 = vpop.f32.mrf.mxu1  ;;  %v894_v60 = vld [vmem:[%s5433_s4 + $0x188] sm:$0xff] }
 0x128   :  { %1260 = vmatpush.msra.mxu3 %v894_v60 }
 0x12a   :  { %v3782_v48 = vpop.f32.mrf.mxu2  ;;  %v582_v24 = vpop.f32.mrf.mxu3 }
 0x12b   :  { %v3789_v53 = vadd.f32 %v582_v24, %v3532_v11  ;;  %v3791_v16 = vpop.f32.mrf.mxu0  ;;  %v3807_v24 = vmax.f32 %v738_v49, 0.0 }
 0x12d   :  { %5497 = vst [vmem:[#allocation30_spill] sm:$0xff] %v3807_v24 }
 0x12e   :  { %960 = vmatmul.f32.gmra.mxu0 %v3776_v27 }
 0x12f   :  { %2685 = vmatmul.msk.f32.gmra.mxu3 %vm159_vm0, %v3204_v30  ;;  %1186 = vmatmul.f32.gmra.mxu2 %v3776_v27  ;;  %v544_v30 = vadd.f32 %v3672_v50, %v3532_v11  ;;  %v3817_v27 = vadd.f32 %v3396_v8, %v3532_v11  ;;  %v3827_v18 = vpop.f32.mrf.mxu1  ;;  %v313_v50 = vadd.f32 %v3674_v19, %v3532_v11 }
 0x131   :  { %v740_v62 = vmax.f32 %v310_v35, %v544_v30  ;;  %v3842_v30 = vadd.f32 %v3439_v40, %v3532_v11  ;;  %v877_v40 = vld [vmem:[%s5433_s4 + $0x100] sm:$0xff] }
 0x132   :  { %v3813_v9 = vpop.f32.mrf.mxu2  ;;  %v585_v0 = vpop.f32.mrf.mxu3  ;;  %1042 = vmatpush.msrb.mxu1 %v877_v40 }
 0x133   :  { %v3820_v17 = vadd.f32 %v585_v0, %v3532_v11  ;;  %v3822_v60 = vpop.f32.mrf.mxu0  ;;  %v3832_v8 = vmax.f32 %v740_v62, 0.0  ;;  %v547_v0 = vadd.f32 %v3690_v6, %v3532_v11  ;;  %v892_v6 = vld [vmem:[%s5433_s4 + $0x178] sm:$0xff] }
 0x134   :  { %1261 = vmatpush.msra.mxu3 %v892_v6 }
 0x135   :  { %5498 = vst [vmem:[#allocation31_spill] sm:$0xff] %v3832_v8 }
 0x136   :  { %963 = vmatmul.f32.gmra.mxu0 %v3807_v24 }
 0x137   :  { %2686 = vmatmul.msk.f32.gmra.mxu3 %vm159_vm0, %v3217_v31  ;;  %1189 = vmatmul.f32.gmra.mxu2 %v3807_v24  ;;  %v742_v24 = vmax.f32 %v313_v50, %v547_v0  ;;  %v3852_v19 = vpop.f32.mrf.mxu1  ;;  %v316_v0 = vadd.f32 %v3692_v58, %v3532_v11 }
 0x139   :  { %v3863_v50 = vmax.f32 %v742_v24, 0.0 }
 0x13a   :  { %v3838_v55 = vpop.f32.mrf.mxu2  ;;  %v588_v35 = vpop.f32.mrf.mxu3 }
 0x13b   :  { %v3845_v49 = vadd.f32 %v588_v35, %v3532_v11  ;;  %v3847_v31 = vpop.f32.mrf.mxu0  ;;  %5499 = vst [vmem:[#allocation32_spill] sm:$0xff] %v3863_v50 }
 0x13e   :  { %966 = vmatmul.f32.gmra.mxu0 %v3832_v8 }
 0x13f   :  { %2687 = vmatmul.msk.f32.gmra.mxu3 %vm159_vm0, %v3230_v32  ;;  %1192 = vmatmul.f32.gmra.mxu2 %v3832_v8  ;;  %v550_v32 = vadd.f32 %v3714_v33, %v3532_v11  ;;  %v3873_v8 = vadd.f32 %v3479_v21, %v3532_v11  ;;  %v3883_v58 = vpop.f32.mrf.mxu1  ;;  %v1396_v21 = vld [vmem:[#allocation7 + $0xf0] sm:$0xff] }
 0x140   :  { %1430 = vmatpush.msra.mxu0 %v1396_v21  ;;  %v1428_v33 = vld [vmem:[#allocation7 + $0x1f0] sm:$0xff] }
 0x141   :  { %v744_v6 = vmax.f32 %v316_v0, %v550_v32  ;;  %v553_v0 = vadd.f32 %v3735_v20, %v3532_v11  ;;  %1543 = vmatpush.msra.mxu1 %v1428_v33  ;;  %v322_v33 = vadd.f32 %v3737_v26, %v3532_v11  ;;  %v1394_v26 = vld [vmem:[#allocation7 + $0xe0] sm:$0xff] }
 0x142   :  { %v3869_v35 = vpop.f32.mrf.mxu2  ;;  %v591_v62 = vpop.f32.mrf.mxu3  ;;  %1431 = vmatpush.msra.mxu0 %v1394_v26 }
 0x143   :  { %v3876_v56 = vadd.f32 %v591_v62, %v3532_v11  ;;  %v3878_v40 = vpop.f32.mrf.mxu0  ;;  %v3888_v62 = vmax.f32 %v744_v6, 0.0  ;;  %v746_v54 = vmax.f32 %v319_v38, %v553_v0  ;;  %v556_v38 = vadd.f32 %v3754_v3, %v3532_v11  ;;  %v1426_v3 = vld [vmem:[#allocation7 + $0x1e0] sm:$0xff] }
 0x144   :  { %v3926_v6 = vadd.f32 %v3538_v25, %v3532_v11  ;;  %1544 = vmatpush.msra.mxu1 %v1426_v3  ;;  %v562_v3 = vadd.f32 %v3813_v9, %v3532_v11  ;;  %v1392_v9 = vld [vmem:[#allocation7 + $0xd0] sm:$0xff] }
 0x145   :  { %5500 = vst [vmem:[#allocation33_spill] sm:$0xff] %v3888_v62  ;;  %1432 = vmatpush.msra.mxu0 %v1392_v9 }
 0x146   :  { %969 = vmatmul.f32.gmra.mxu0 %v3863_v50 }
 0x147   :  { %2688 = vmatmul.msk.f32.gmra.mxu3 %vm159_vm0, %v3243_v34  ;;  %1195 = vmatmul.f32.gmra.mxu2 %v3863_v50  ;;  %v3898_v34 = vadd.f32 %v3504_v2, %v3532_v11  ;;  %v3911_v20 = vpop.f32.mrf.mxu1  ;;  %v890_v2 = vld [vmem:[%s5433_s4 + $0x168] sm:$0xff] }
 0x148   :  { %1262 = vmatpush.msra.mxu3 %v890_v2  ;;  %v748_v2 = vmax.f32 %v322_v33, %v556_v38  ;;  %v559_v33 = vadd.f32 %v3782_v48, %v3532_v11  ;;  %v3968_v48 = vperm.slane %v3517_v23, 1 }
 0x14a   :  { %v3894_v32 = vpop.f32.mrf.mxu2  ;;  %v594_v24 = vpop.f32.mrf.mxu3  ;;  %v750_v1 = vmax.f32 %v325_v7, %v559_v33  ;;  %v328_v7 = vadd.f32 %v3791_v16, %v3532_v11 }
 0x14b   :  { %v3901_v50 = vadd.f32 %v594_v24, %v3532_v11  ;;  %v3903_v21 = vpop.f32.mrf.mxu0  ;;  %v3916_v24 = vmax.f32 %v746_v54, 0.0 }
 0x14d   :  { %5501 = vst [vmem:[#allocation34_spill] sm:$0xff] %v3916_v24 }
 0x14e   :  { %972 = vmatmul.f32.gmra.mxu0 %v3888_v62 }
 0x14f   :  { %2689 = vmatmul.msk.f32.gmra.mxu3 %vm159_vm0, %v3262_v37  ;;  %1198 = vmatmul.f32.gmra.mxu2 %v3888_v62  ;;  %v3939_v25 = vpop.f32.mrf.mxu1 }
 0x152   :  { %v3922_v0 = vpop.f32.mrf.mxu2  ;;  %v597_v37 = vpop.f32.mrf.mxu3 }
 0x153   :  { %v3929_v62 = vadd.f32 %v597_v37, %v3532_v11  ;;  %v3931_v4 = vpop.f32.mrf.mxu0  ;;  %v3941_v37 = vmax.f32 %v748_v2, 0.0  ;;  %v387_v2 = vadd.f32 %v3677_v44, %v3968_v48  ;;  %v1424_v44 = vld [vmem:[#allocation7 + $0x1d0] sm:$0xff] }
 0x154   :  { %1545 = vmatpush.msra.mxu1 %v1424_v44  ;;  %v334_v44 = vadd.f32 %v3847_v31, %v3532_v11 }
 0x155   :  { %5502 = vst [vmem:[#allocation35_spill] sm:$0xff] %v3941_v37 }
 0x156   :  { %975 = vmatmul.f32.gmra.mxu0 %v3916_v24 }
 0x157   :  { %2690 = vmatmul.msk.f32.gmra.mxu3 %vm159_vm0, %v3275_v39  ;;  %1201 = vmatmul.f32.gmra.mxu2 %v3916_v24  ;;  %v3951_v39 = vadd.f32 %v3563_v46, %v3532_v11  ;;  %v888_v46 = vld [vmem:[%s5433_s4 + $0x158] sm:$0xff]  ;;  %v3983_v23 = vpop.f32.mrf.mxu1 }
 0x158   :  { %1263 = vmatpush.msra.mxu3 %v888_v46 }
 0x15a   :  { %v3947_v38 = vpop.f32.mrf.mxu2  ;;  %v600_v54 = vpop.f32.mrf.mxu3 }
 0x15b   :  { %v3954_v26 = vadd.f32 %v600_v54, %v3532_v11  ;;  %v3956_v24 = vpop.f32.mrf.mxu0  ;;  %v3970_v54 = vmax.f32 %v750_v1, 0.0 }
 0x15c   :  { %5503 = vst [vmem:[#allocation36_spill] sm:$0xff] %v3956_v24 }
 0x15d   :  { %5504 = vst [vmem:[#allocation37_spill] sm:$0xff] %v3970_v54 }
 0x15e   :  { %978 = vmatmul.f32.gmra.mxu0 %v3941_v37 }
 0x15f   :  { %2691 = vmatmul.msk.f32.gmra.mxu3 %vm159_vm0, %v3296_v43  ;;  %1204 = vmatmul.f32.gmra.mxu2 %v3941_v37  ;;  %v752_v37 = vmax.f32 %v328_v7, %v562_v3 }
 0x162   :  { %v620_v33 = vpop.f32.mrf.mxu3  ;;  %v3976_v43 = vpop.f32.mrf.mxu2 }
 0x163   :  { %v621_v24 = vadd.f32 %v620_v33, %v3968_v48  ;;  %v3981_v46 = vpop.f32.mrf.mxu0  ;;  %v3992_v33 = vmax.f32 %v752_v37, 0.0  ;;  %v4005_v37 = vpop.f32.mrf.mxu1 }
 0x164   :  { %5505 = vst [vmem:[#allocation38_spill] sm:$0xff] %v3981_v46 }
 0x165   :  { %v717_v1 = vmax.f32 %v387_v2, %v621_v24  ;;  %v331_v24 = vadd.f32 %v3822_v60, %v3532_v11  ;;  %v565_v2 = vadd.f32 %v3838_v55, %v3532_v11  ;;  %v886_v55 = vld [vmem:[%s5433_s4 + $0x148] sm:$0xff] }
 0x166   :  { %981 = vmatmul.f32.gmra.mxu0 %v3970_v54  ;;  %1264 = vmatpush.msra.mxu3 %v886_v55 }
 0x167   :  { %v3986_v16 = vmax.f32 %v717_v1, 0.0  ;;  %2692 = vmatmul.msk.f32.gmra.mxu3 %vm159_vm0, %v3327_v52  ;;  %1207 = vmatmul.f32.gmra.mxu2 %v3970_v54  ;;  %v390_v52 = vadd.f32 %v3695_v22, %v3968_v48  ;;  %v754_v54 = vmax.f32 %v331_v24, %v565_v2 }
 0x169   :  { %1043 = vmatmul.f32.vlgmr.msrb.gmra.mxu1 %v3986_v16  ;;  %v4017_v22 = vmax.f32 %v754_v54, 0.0 }
 0x16a   :  { %v623_v7 = vpop.f32.mrf.mxu3  ;;  %v3998_v3 = vpop.f32.mrf.mxu2 }
 0x16b   :  { %v624_v1 = vadd.f32 %v623_v7, %v3968_v48  ;;  %v4003_v9 = vpop.f32.mrf.mxu0  ;;  %v4036_v31 = vpop.f32.mrf.mxu1 }
 0x16c   :  { %5506 = vst [vmem:[#allocation39_spill] sm:$0xff] %v4003_v9 }
 0x16d   :  { %v719_v46 = vmax.f32 %v390_v52, %v624_v1 }
 0x16e   :  { %984 = vmatmul.f32.gmra.mxu0 %v3992_v33 }
 0x16f   :  { %v4008_v60 = vmax.f32 %v719_v46, 0.0  ;;  %2693 = vmatmul.msk.f32.gmra.mxu3 %vm159_vm0, %v3365_v63  ;;  %1210 = vmatmul.f32.gmra.mxu2 %v3992_v33  ;;  %v568_v46 = vadd.f32 %v3869_v35, %v3532_v11  ;;  %v393_v63 = vadd.f32 %v3719_v12, %v3968_v48  ;;  %v1390_v35 = vld [vmem:[#allocation7 + $0xc0] sm:$0xff] }
 0x170   :  { %1433 = vmatpush.msra.mxu0 %v1390_v35  ;;  %v1422_v12 = vld [vmem:[#allocation7 + $0x1c0] sm:$0xff] }
 0x171   :  { %1046 = vmatmul.f32.gmra.mxu1 %v4008_v60  ;;  %v756_v55 = vmax.f32 %v334_v44, %v568_v46  ;;  %v337_v44 = vadd.f32 %v3878_v40, %v3532_v11  ;;  %v571_v46 = vadd.f32 %v3894_v32, %v3532_v11  ;;  %v884_v40 = vld [vmem:[%s5433_s4 + $0x138] sm:$0xff] }
 0x172   :  { %v626_v24 = vpop.f32.mrf.mxu3  ;;  %v4023_v2 = vpop.f32.mrf.mxu2  ;;  %1546 = vmatpush.msra.mxu1 %v1422_v12  ;;  %1265 = vmatpush.msra.mxu3 %v884_v40  ;;  %v574_v12 = vadd.f32 %v3922_v0, %v3532_v11 }
 0x173   :  { %v627_v7 = vadd.f32 %v626_v24, %v3968_v48  ;;  %v4028_v52 = vpop.f32.mrf.mxu0  ;;  %v4039_v24 = vmax.f32 %v756_v55, 0.0  ;;  %v758_v55 = vmax.f32 %v337_v44, %v571_v46  ;;  %v399_v46 = vadd.f32 %v3768_v13, %v3968_v48  ;;  %v1420_v13 = vld [vmem:[#allocation7 + $0x1b0] sm:$0xff] }
 0x174   :  { %5507 = vst [vmem:[#allocation40_spill] sm:$0xff] %v4028_v52  ;;  %1547 = vmatpush.msra.mxu1 %v1420_v13 }
 0x175   :  { %v721_v1 = vmax.f32 %v393_v63, %v627_v7  ;;  %v4064_v32 = vmax.f32 %v758_v55, 0.0 }
 0x176   :  { %987 = vmatmul.f32.gmra.mxu0 %v4017_v22 }
 0x177   :  { %v4031_v54 = vmax.f32 %v721_v1, 0.0  ;;  %2694 = vmatmul.msk.f32.gmra.mxu3 %vm159_vm0, %v3408_v14  ;;  %1213 = vmatmul.f32.gmra.mxu2 %v4017_v22  ;;  %v396_v14 = vadd.f32 %v3740_v51, %v3968_v48  ;;  %v4062_v51 = vpop.f32.mrf.mxu1 }
 0x179   :  { %1049 = vmatmul.f32.gmra.mxu1 %v4031_v54 }
 0x17a   :  { %v629_v63 = vpop.f32.mrf.mxu3  ;;  %v4045_v7 = vpop.f32.mrf.mxu2 }
 0x17b   :  { %v630_v1 = vadd.f32 %v629_v63, %v3968_v48  ;;  %v4050_v35 = vpop.f32.mrf.mxu0 }
 0x17c   :  { %5508 = vst [vmem:[#allocation41_spill] sm:$0xff] %v4050_v35  ;;  %v1391_v35 = vld [vmem:[#allocation7 + $0xc8] sm:$0xff] }
 0x17d   :  { %v723_v52 = vmax.f32 %v396_v14, %v630_v1 }
 0x17e   :  { %990 = vmatmul.f32.gmra.mxu0 %v4039_v24 }
 0x17f   :  { %v4053_v9 = vmax.f32 %v723_v52, 0.0  ;;  %2695 = vmatmul.msk.f32.gmra.mxu3 %vm159_vm0, %v3448_v45  ;;  %1216 = vmatmul.f32.gmra.mxu2 %v4039_v24  ;;  %v340_v52 = vadd.f32 %v3903_v21, %v3532_v11  ;;  %v1388_v21 = vld [vmem:[#allocation7 + $0xb0] sm:$0xff] }
 0x180   :  { %1434 = vmatpush.msra.mxu0 %v1388_v21  ;;  %v4097_v21 = vpop.f32.mrf.mxu1 }
 0x181   :  { %1052 = vmatmul.f32.gmra.mxu1 %v4053_v9  ;;  %v760_v40 = vmax.f32 %v340_v52, %v574_v12  ;;  %v577_v52 = vadd.f32 %v3947_v38, %v3532_v11 }
 0x182   :  { %v632_v45 = vpop.f32.mrf.mxu3  ;;  %v4070_v44 = vpop.f32.mrf.mxu2 }
 0x183   :  { %v633_v63 = vadd.f32 %v632_v45, %v3968_v48  ;;  %v4075_v14 = vpop.f32.mrf.mxu0  ;;  %v4084_v0 = vmax.f32 %v760_v40, 0.0  ;;  %v343_v45 = vadd.f32 %v3931_v4, %v3532_v11  ;;  %v882_v11 = vld [vmem:[%s5433_s4 + $0x128] sm:$0xff] }
 0x184   :  { %5509 = vst [vmem:[#allocation42_spill] sm:$0xff] %v4075_v14  ;;  %1266 = vmatpush.msra.mxu3 %v882_v11 }
 0x185   :  { %v725_v1 = vmax.f32 %v399_v46, %v633_v63  ;;  %v762_v14 = vmax.f32 %v343_v45, %v577_v52  ;;  %v405_v45 = vadd.f32 %v3827_v18, %v3968_v48  ;;  %v1418_v18 = vld [vmem:[#allocation7 + $0x1a0] sm:$0xff] }
 0x186   :  { %993 = vmatmul.f32.gmra.mxu0 %v4064_v32  ;;  %1548 = vmatpush.msra.mxu1 %v1418_v18  ;;  %v2763_v18 = vld [vmem:[%s5429_s0 + $0xc0] sm:$0xff] }
 0x187   :  { %v4078_v55 = vmax.f32 %v725_v1, 0.0  ;;  %2696 = vmatmul.msk.f32.gmra.mxu3 %vm159_vm0, %v3488_v59  ;;  %1219 = vmatmul.f32.gmra.mxu2 %v4064_v32  ;;  %v402_v59 = vadd.f32 %v3796_v15, %v3968_v48  ;;  %v4109_v15 = vmax.f32 %v762_v14, 0.0  ;;  %v1386_v14 = vld [vmem:[#allocation7 + $0xa0] sm:$0xff] }
 0x188   :  { %1435 = vmatpush.msra.mxu0 %v1386_v14 }
 0x189   :  { %1055 = vmatmul.f32.gmra.mxu1 %v4078_v55 }
 0x18a   :  { %v635_v12 = vpop.f32.mrf.mxu3  ;;  %v4090_v46 = vpop.f32.mrf.mxu2 }
 0x18b   :  { %v636_v63 = vadd.f32 %v635_v12, %v3968_v48  ;;  %v4095_v1 = vpop.f32.mrf.mxu0 }
 0x18c   :  { %5510 = vst [vmem:[#allocation43_spill] sm:$0xff] %v4095_v1  ;;  %v5516_v1 = vmax.f32 %v3786_v29, %v3789_v53  ;;  %v1389_v53 = vld [vmem:[#allocation7 + $0xb8] sm:$0xff]  ;;  %v1416_v29 = vld [vmem:[#allocation7 + $0x190] sm:$0xff] }
 0x18d   :  { %v727_v40 = vmax.f32 %v402_v59, %v636_v63  ;;  %v4119_v59 = vpop.f32.mrf.mxu1  ;;  %1549 = vmatpush.msra.mxu1 %v1416_v29  ;;  %v1383_v29 = vld [vmem:[#allocation7 + $0x88] sm:$0xff] }
 0x18e   :  { %996 = vmatmul.f32.gmra.mxu0 %v4084_v0 }
 0x18f   :  { %v4100_v4 = vmax.f32 %v727_v40, 0.0  ;;  %2697 = vmatmul.msk.f32.gmra.mxu3 %vm159_vm0, %v3513_v5  ;;  %1222 = vmatmul.f32.gmra.mxu2 %v4084_v0 }
 0x191   :  { %1058 = vmatmul.f32.gmra.mxu1 %v4100_v4 }
 0x192   :  { %v638_v38 = vpop.f32.mrf.mxu3  ;;  %v4111_v13 = vpop.f32.mrf.mxu2 }
 0x193   :  { %v639_v52 = vadd.f32 %v638_v38, %v3968_v48  ;;  %v4116_v5 = vpop.f32.mrf.mxu0  ;;  %v408_v38 = vadd.f32 %v3852_v19, %v3968_v48  ;;  %v880_v19 = vld [vmem:[%s5433_s4 + $0x118] sm:$0xff] }
 0x194   :  { %5511 = vst [vmem:[#allocation44_spill] sm:$0xff] %v4116_v5  ;;  %1267 = vmatpush.msra.mxu3 %v880_v19  ;;  %v4163_v19 = vmax.f32 %v5516_v1, 0.0  ;;  %v1387_v1 = vld [vmem:[#allocation7 + $0xa8] sm:$0xff] }
 0x195   :  { %v729_v12 = vmax.f32 %v405_v45, %v639_v52 }
 0x196   :  { %999 = vmatmul.f32.gmra.mxu0 %v4109_v15  ;;  %5517 = vst [vmem:[#allocation48_spill] sm:$0xff] %v4163_v19 }
 0x197   :  { %v4121_v63 = vmax.f32 %v729_v12, 0.0  ;;  %2698 = vmatmul.msk.f32.gmra.mxu3 %vm159_vm0, %v3547_v36  ;;  %1225 = vmatmul.f32.gmra.mxu2 %v4109_v15  ;;  %v5513_v36 = vmax.f32 %v3758_v28, %v3761_v47  ;;  %v1397_v47 = vld [vmem:[#allocation7 + $0xf8] sm:$0xff]  ;;  %v4150_v28 = vpop.f32.mrf.mxu1 }
 0x198   :  { %1656 = vmatpush.msra.mxu2 %v1397_v47 }
 0x199   :  { %1061 = vmatmul.f32.gmra.mxu1 %v4121_v63  ;;  %v4137_v12 = vmax.f32 %v5513_v36, 0.0  ;;  %v411_v36 = vadd.f32 %v3883_v58, %v3968_v48  ;;  %v2764_v58 = vld [vmem:[%s5429_s0 + $0xc8] sm:$0xff] }
 0x19a   :  { %v641_v40 = vpop.f32.mrf.mxu3  ;;  %v4127_v11 = vpop.f32.mrf.mxu2 }
 0x19b   :  { %v642_v45 = vadd.f32 %v641_v40, %v3968_v48  ;;  %v4132_v52 = vpop.f32.mrf.mxu0  ;;  %v1395_v40 = vld [vmem:[#allocation7 + $0xe8] sm:$0xff] }
 0x19c   :  { %5512 = vst [vmem:[#allocation45_spill] sm:$0xff] %v4132_v52  ;;  %1657 = vmatpush.msra.mxu2 %v1395_v40  ;;  %v1393_v52 = vld [vmem:[#allocation7 + $0xd8] sm:$0xff] }
 0x19d   :  { %v731_v14 = vmax.f32 %v408_v38, %v642_v45 }
 0x19e   :  { %1002 = vmatmul.f32.gmra.mxu0 %v4137_v12  ;;  %1658 = vmatpush.msra.mxu2 %v1393_v52 }
 0x19f   :  { %v4140_v5 = vmax.f32 %v731_v14, 0.0  ;;  %2699 = vmatmul.msk.f32.gmra.mxu3 %vm159_vm0, %v2763_v18  ;;  %1228 = vmatmul.f32.gmra.mxu2 %v4137_v12 }
 0x1a0   :  { %1659 = vmatpush.msra.mxu2 %v1391_v35  ;;  %v4174_v35 = vpop.f32.mrf.mxu1 }
 0x1a1   :  { %1064 = vmatmul.f32.gmra.mxu1 %v4140_v5 }
 0x1a2   :  { %v644_v38 = vpop.f32.mrf.mxu3  ;;  %v4153_v45 = vpop.f32.mrf.mxu2  ;;  %1660 = vmatpush.msra.mxu2 %v1389_v53  ;;  %v5519_v53 = vmax.f32 %v3817_v27, %v3820_v17  ;;  %v878_v17 = vld [vmem:[%s5433_s4 + $0x108] sm:$0xff]  ;;  %v1380_v27 = vld [vmem:[#allocation7 + $0x70] sm:$0xff] }
 0x1a3   :  { %5514 = vst [vmem:[#allocation46_spill] sm:$0xff] %v4153_v45  ;;  %v645_v14 = vadd.f32 %v644_v38, %v3968_v48  ;;  %v4158_v18 = vpop.f32.mrf.mxu0  ;;  %v1384_v38 = vld [vmem:[#allocation7 + $0x90] sm:$0xff]  ;;  %v1382_v45 = vld [vmem:[#allocation7 + $0x80] sm:$0xff]  ;;  %1268 = vmatpush.msra.mxu3 %v878_v17 }
 0x1a4   :  { %5515 = vst [vmem:[#allocation47_spill] sm:$0xff] %v4158_v18  ;;  %1436 = vmatpush.msra.mxu0 %v1384_v38  ;;  %1661 = vmatpush.msra.mxu2 %v1387_v1  ;;  %v1385_v38 = vld [vmem:[#allocation7 + $0x98] sm:$0xff]  ;;  %v4186_v18 = vmax.f32 %v5519_v53, 0.0  ;;  %v2765_v1 = vld [vmem:[%s5429_s0 + $0xd0] sm:$0xff] }
 0x1a5   :  { %v733_v47 = vmax.f32 %v411_v36, %v645_v14  ;;  %v414_v36 = vadd.f32 %v3911_v20, %v3968_v48 }
 0x1a6   :  { %1005 = vmatmul.f32.gmra.mxu0 %v4163_v19  ;;  %5520 = vst [vmem:[#allocation50_spill] sm:$0xff] %v4186_v18  ;;  %1662 = vmatpush.msra.mxu2 %v1385_v38  ;;  %v417_v38 = vadd.f32 %v3939_v25, %v3968_v48  ;;  %v1375_v25 = vld [vmem:[#allocation7 + $0x48] sm:$0xff] }
 0x1a7   :  { %v4166_v40 = vmax.f32 %v733_v47, 0.0  ;;  %2700 = vmatmul.msk.f32.gmra.mxu3 %vm159_vm0, %v2764_v58  ;;  %1231 = vmatmul.f32.gmra.mxu2 %v4163_v19 }
 0x1a8   :  { %1663 = vmatpush.msra.mxu2 %v1383_v29  ;;  %1437 = vmatpush.msra.mxu0 %v1382_v45  ;;  %v5522_v45 = vmax.f32 %v3842_v30, %v3845_v49  ;;  %v1374_v49 = vld [vmem:[#allocation7 + $0x40] sm:$0xff]  ;;  %v1373_v30 = vld [vmem:[#allocation7 + $0x38] sm:$0xff] }
 0x1a9   :  { %1067 = vmatmul.f32.gmra.mxu1 %v4166_v40 }
 0x1aa   :  { %v647_v52 = vpop.f32.mrf.mxu3  ;;  %v4179_v47 = vpop.f32.mrf.mxu2  ;;  %1438 = vmatpush.msra.mxu0 %v1380_v27  ;;  %v4208_v17 = vmax.f32 %v5522_v45, 0.0  ;;  %v1376_v27 = vld [vmem:[#allocation7 + $0x50] sm:$0xff]  ;;  %v420_v45 = vadd.f32 %v3983_v23, %v3968_v48 }
 0x1ab   :  { %v648_v14 = vadd.f32 %v647_v52, %v3968_v48  ;;  %v4181_v58 = vpop.f32.mrf.mxu0  ;;  %v1381_v52 = vld [vmem:[#allocation7 + $0x78] sm:$0xff] }
 0x1ac   :  { %5518 = vst [vmem:[#allocation49_spill] sm:$0xff] %v4181_v58  ;;  %1664 = vmatpush.msra.mxu2 %v1381_v52  ;;  %v4210_v58 = vpop.f32.mrf.mxu1 }
 0x1ad   :  { %v735_v19 = vmax.f32 %v414_v36, %v648_v14  ;;  %v1379_v36 = vld [vmem:[#allocation7 + $0x68] sm:$0xff]  ;;  %5523 = vst [vmem:[#allocation52_spill] sm:$0xff] %v4208_v17 }
 0x1ae   :  { %1008 = vmatmul.f32.gmra.mxu0 %v4186_v18  ;;  %1665 = vmatpush.msra.mxu2 %v1379_v36  ;;  %v2766_v36 = vld [vmem:[%s5429_s0 + $0xd8] sm:$0xff] }
 0x1af   :  { %v4189_v20 = vmax.f32 %v735_v19, 0.0  ;;  %2701 = vmatmul.msk.f32.gmra.mxu3 %vm159_vm0, %v2765_v1  ;;  %1234 = vmatmul.f32.gmra.mxu2 %v4186_v18  ;;  %v1378_v19 = vld [vmem:[#allocation7 + $0x60] sm:$0xff]  ;;  %v1377_v1 = vld [vmem:[#allocation7 + $0x58] sm:$0xff] }
 0x1b0   :  { %1439 = vmatpush.msra.mxu0 %v1378_v19  ;;  %1666 = vmatpush.msra.mxu2 %v1377_v1  ;;  %v1372_v19 = vld [vmem:[#allocation7 + $0x30] sm:$0xff] }
 0x1b1   :  { %1070 = vmatmul.f32.gmra.mxu1 %v4189_v20 }
 0x1b2   :  { %v650_v14 = vpop.f32.mrf.mxu3  ;;  %v4212_v18 = vpop.f32.mrf.mxu2  ;;  %1440 = vmatpush.msra.mxu0 %v1376_v27  ;;  %1667 = vmatpush.msra.mxu2 %v1375_v25  ;;  %v5526_v27 = vmax.f32 %v3873_v8, %v3876_v56  ;;  %v2767_v56 = vld [vmem:[%s5429_s0 + $0xe0] sm:$0xff]  ;;  %v1368_v8 = vld [vmem:[#allocation7 + $0x10] sm:$0xff] }
 0x1b3   :  { %v651_v53 = vadd.f32 %v650_v14, %v3968_v48  ;;  %v4203_v29 = vpop.f32.mrf.mxu0  ;;  %5524 = vst [vmem:[#allocation53_spill] sm:$0xff] %v4212_v18  ;;  %v1370_v18 = vld [vmem:[#allocation7 + $0x20] sm:$0xff] }
 0x1b4   :  { %5521 = vst [vmem:[#allocation51_spill] sm:$0xff] %v4203_v29  ;;  %1441 = vmatpush.msra.mxu0 %v1374_v49  ;;  %1668 = vmatpush.msra.mxu2 %v1373_v30  ;;  %v1369_v29 = vld [vmem:[#allocation7 + $0x18] sm:$0xff]  ;;  %v4231_v25 = vmax.f32 %v5526_v27, 0.0  ;;  %v1367_v49 = vld [vmem:[#allocation7 + $0x8] sm:$0xff]  ;;  %v4234_v30 = vpop.f32.mrf.mxu1 }
 0x1b5   :  { %v737_v52 = vmax.f32 %v417_v38, %v651_v53  ;;  %v1414_v38 = vld [vmem:[#allocation7 + $0x180] sm:$0xff]  ;;  %v1371_v53 = vld [vmem:[#allocation7 + $0x28] sm:$0xff] }
 0x1b6   :  { %1011 = vmatmul.f32.gmra.mxu0 %v4208_v17  ;;  %1550 = vmatpush.msra.mxu1 %v1414_v38  ;;  %v1366_v38 = vld [vmem:[#allocation7] sm:$0xff] }
 0x1b7   :  { %v4215_v14 = vmax.f32 %v737_v52, 0.0  ;;  %2702 = vmatmul.msk.f32.gmra.mxu3 %vm159_vm0, %v2766_v36  ;;  %1237 = vmatmul.f32.gmra.mxu2 %v4208_v17 }
 0x1b8   :  { %1442 = vmatpush.msra.mxu0 %v1372_v19  ;;  %1669 = vmatpush.msra.mxu2 %v1371_v53  ;;  %v1429_v19 = vld [vmem:[#allocation7 + $0x1f8] sm:$0xff] }
 0x1b9   :  { %1073 = vmatmul.f32.gmra.mxu1 %v4215_v14  ;;  %1769 = vmatpush.msrb.mxu3 %v1429_v19  ;;  %v426_v19 = vadd.f32 %v4036_v31, %v3968_v48  ;;  %v1427_v31 = vld [vmem:[#allocation7 + $0x1e8] sm:$0xff] }
 0x1ba   :  { %v653_v1 = vpop.f32.mrf.mxu3  ;;  %1670 = vmatpush.msra.mxu2 %v1369_v29  ;;  %1443 = vmatpush.msra.mxu0 %v1370_v18 }
 0x1bb   :  { %v654_v52 = vadd.f32 %v653_v1, %v3968_v48  ;;  %v4226_v36 = vpop.f32.mrf.mxu0  ;;  %v4238_v1 = vpop.f32.mrf.mxu2  ;;  %1770 = vmatpush.msrb.mxu3 %v1427_v31 }
 0x1bc   :  { %5525 = vst [vmem:[#allocation54_spill] sm:$0xff] %v4226_v36  ;;  %1671 = vmatpush.msra.mxu2 %v1367_v49  ;;  %1444 = vmatpush.msra.mxu0 %v1368_v8 }
 0x1bd   :  { %v739_v17 = vmax.f32 %v420_v45, %v654_v52  ;;  %v5528_v52 = vmax.f32 %v3898_v34, %v3901_v50  ;;  %v1412_v50 = vld [vmem:[#allocation7 + $0x170] sm:$0xff] }
 0x1be   :  { %1014 = vmatmul.f32.gmra.mxu0 %v4231_v25  ;;  %1551 = vmatpush.msra.mxu1 %v1412_v50  ;;  %v429_v50 = vadd.f32 %v4062_v51, %v3968_v48  ;;  %v2770_v51 = vld [vmem:[%s5429_s0 + $0xf8] sm:$0xff] }
 0x1bf   :  { %v4236_v23 = vmax.f32 %v739_v17, 0.0  ;;  %2703 = vmatmul.msk.f32.gmra.mxu3 %vm159_vm0, %v2767_v56  ;;  %1240 = vmatmul.f32.gmra.mxu2 %v4231_v25  ;;  %v423_v17 = vadd.f32 %v4005_v37, %v3968_v48  ;;  %v4254_v27 = vmax.f32 %v5528_v52, 0.0  ;;  %v2768_v56 = vld [vmem:[%s5429_s0 + $0xe8] sm:$0xff]  ;;  %v4264_v37 = vpop.f32.mrf.mxu1 }
 0x1c0   :  { %1445 = vmatpush.msra.mxu0 %v1366_v38 }
 0x1c1   :  { %1076 = vmatmul.f32.gmra.mxu1 %v4236_v23 }
 0x1c2   :  { %v656_v29 = vpop.f32.mrf.mxu3 }
 0x1c3   :  { %v657_v53 = vadd.f32 %v656_v29, %v3968_v48  ;;  %v4249_v45 = vpop.f32.mrf.mxu0  ;;  %v4266_v8 = vpop.f32.mrf.mxu2 }
 0x1c4   :  { %5527 = vst [vmem:[#allocation55_spill] sm:$0xff] %v4249_v45 }
 0x1c5   :  { %v741_v18 = vmax.f32 %v423_v17, %v657_v53  ;;  %v5530_v17 = vmax.f32 %v3926_v6, %v3929_v62 }
 0x1c6   :  { %1017 = vmatmul.f32.gmra.mxu0 %v4254_v27 }
 0x1c7   :  { %v4257_v49 = vmax.f32 %v741_v18, 0.0  ;;  %2704 = vmatmul.msk.f32.gmra.mxu3 %vm159_vm0, %v2768_v56  ;;  %1243 = vmatmul.f32.gmra.mxu2 %v4254_v27  ;;  %v4277_v53 = vmax.f32 %v5530_v17, 0.0  ;;  %v2769_v56 = vld [vmem:[%s5429_s0 + $0xf0] sm:$0xff]  ;;  %v4288_v6 = vpop.f32.mrf.mxu1  ;;  %v5533_v17 = vmax.f32 %v3951_v39, %v3954_v26  ;;  %v432_v39 = vadd.f32 %v4097_v21, %v3968_v48 }
 0x1c9   :  { %1079 = vmatmul.f32.gmra.mxu1 %v4257_v49 }
 0x1ca   :  { %v659_v34 = vpop.f32.mrf.mxu3 }
 0x1cb   :  { %v660_v38 = vadd.f32 %v659_v34, %v3968_v48  ;;  %v4272_v29 = vpop.f32.mrf.mxu0  ;;  %v4292_v34 = vpop.f32.mrf.mxu2 }
 0x1cc   :  { %5529 = vst [vmem:[#allocation56_spill] sm:$0xff] %v4272_v29 }
 0x1cd   :  { %v743_v52 = vmax.f32 %v426_v19, %v660_v38 }
 0x1ce   :  { %1020 = vmatmul.f32.gmra.mxu0 %v4277_v53 }
 0x1cf   :  { %v4280_v18 = vmax.f32 %v743_v52, 0.0  ;;  %2705 = vmatmul.msk.f32.gmra.mxu3 %vm159_vm0, %v2769_v56  ;;  %1246 = vmatmul.f32.gmra.mxu2 %v4277_v53  ;;  %v4300_v52 = vmax.f32 %v5533_v17, 0.0 }
 0x1d1   :  { %5531 = vst [vmem:[#allocation57_spill] sm:$0xff] %v4280_v18  ;;  %1082 = vmatmul.f32.gmra.mxu1 %v4280_v18 }
 0x1d2   :  { %v662_v62 = vpop.f32.mrf.mxu3  ;;  %5534 = vst [vmem:[#allocation59_spill] sm:$0xff] %v4300_v52 }
 0x1d3   :  { %v663_v19 = vadd.f32 %v662_v62, %v3968_v48  ;;  %v4295_v38 = vpop.f32.mrf.mxu0  ;;  %v1410_v62 = vld [vmem:[#allocation7 + $0x160] sm:$0xff]  ;;  %v4318_v17 = vpop.f32.mrf.mxu2 }
 0x1d4   :  { %5532 = vst [vmem:[#allocation58_spill] sm:$0xff] %v4295_v38  ;;  %1552 = vmatpush.msra.mxu1 %v1410_v62  ;;  %v1425_v62 = vld [vmem:[#allocation7 + $0x1d8] sm:$0xff] }
 0x1d5   :  { %v745_v56 = vmax.f32 %v429_v50, %v663_v19  ;;  %v4316_v19 = vpop.f32.mrf.mxu1  ;;  %1771 = vmatpush.msrb.mxu3 %v1425_v62 }
 0x1d6   :  { %1023 = vmatmul.f32.gmra.mxu0 %v4300_v52 }
 0x1d7   :  { %v4303_v31 = vmax.f32 %v745_v56, 0.0  ;;  %2706 = vmatmul.msk.f32.gmra.mxu3 %vm159_vm0, %v2770_v51  ;;  %1249 = vmatmul.f32.gmra.mxu2 %v4300_v52 }
 0x1d9   :  { %5535 = vst [vmem:[#allocation60_spill] sm:$0xff] %v4303_v31  ;;  %1085 = vmatmul.f32.gmra.mxu1 %v4303_v31 }
 0x1da   :  { %v665_v38 = vpop.f32.mrf.mxu3 }
 0x1db   :  { %v666_v26 = vadd.f32 %v665_v38, %v3968_v48  ;;  %v4314_v50 = vpop.f32.mrf.mxu0  ;;  %v435_v38 = vadd.f32 %v4119_v59, %v3968_v48  ;;  %v1408_v59 = vld [vmem:[#allocation7 + $0x150] sm:$0xff] }
 0x1dc   :  { %5536 = vst [vmem:[#allocation61_spill] sm:$0xff] %v4314_v50  ;;  %1553 = vmatpush.msra.mxu1 %v1408_v59 }
 0x1dd   :  { %v747_v56 = vmax.f32 %v432_v39, %v666_v26 }
 0x1de   :  { %1446 = vmatmul.f32.vlgmr.msra.gmra.mxu0 %v3557_v42 }
 0x1df   :  { %v4321_v51 = vmax.f32 %v747_v56, 0.0  ;;  %1269 = vmatmul.f32.vlgmr.msra.gmra.mxu3 %v3986_v16  ;;  %1672 = vmatmul.f32.vlgmr.msra.gmra.mxu2 %v3557_v42  ;;  %v4334_v56 = vpop.f32.mrf.mxu2 }
 0x1e0   :  { %5540 = vst [vmem:[#allocation65_spill] sm:$0xff] %v4334_v56  ;;  %v5587_v56 = vld [vmem:[#allocation32_spill] sm:$0xff] }
 0x1e1   :  { %5537 = vst [vmem:[#allocation62_spill] sm:$0xff] %v4321_v51  ;;  %1088 = vmatmul.f32.gmra.mxu1 %v4321_v51 }
 0x1e2   :  { %v668_v21 = vpop.f32.mrf.mxu3 }
 0x1e3   :  { %v669_v50 = vadd.f32 %v668_v21, %v3968_v48  ;;  %v4329_v29 = vpop.f32.mrf.mxu0 }
 0x1e4   :  { %5538 = vst [vmem:[#allocation63_spill] sm:$0xff] %v4329_v29 }
 0x1e5   :  { %v749_v39 = vmax.f32 %v435_v38, %v669_v50  ;;  %v438_v50 = vadd.f32 %v4150_v28, %v3968_v48 }
 0x1e6   :  { %v4331_v26 = vpop.f32.mrf.mxu1  ;;  %1449 = vmatmul.f32.gmra.mxu0 %v3581_v61 }
 0x1e7   :  { %5539 = vst [vmem:[#allocation64_spill] sm:$0xff] %v4331_v26  ;;  %v4336_v42 = vmax.f32 %v749_v39, 0.0  ;;  %1272 = vmatmul.f32.gmra.mxu3 %v4008_v60  ;;  %1675 = vmatmul.f32.gmra.mxu2 %v3581_v61  ;;  %v1423_v61 = vld [vmem:[#allocation7 + $0x1c8] sm:$0xff]  ;;  %v4353_v59 = vpop.f32.mrf.mxu2 }
 0x1e8   :  { %1772 = vmatpush.msrb.mxu3 %v1423_v61  ;;  %5543 = vst [vmem:[#allocation68_spill] sm:$0xff] %v4353_v59  ;;  %v1406_v61 = vld [vmem:[#allocation7 + $0x140] sm:$0xff] }
 0x1e9   :  { %1091 = vmatmul.f32.gmra.mxu1 %v4336_v42 }
 0x1ea   :  { %v671_v62 = vpop.f32.mrf.mxu3  ;;  %1554 = vmatpush.msra.mxu1 %v1406_v61  ;;  %v1421_v61 = vld [vmem:[#allocation7 + $0x1b8] sm:$0xff] }
 0x1eb   :  { %v672_v21 = vadd.f32 %v671_v62, %v3968_v48  ;;  %v4344_v38 = vpop.f32.mrf.mxu0  ;;  %v441_v62 = vadd.f32 %v4174_v35, %v3968_v48  ;;  %v444_v35 = vadd.f32 %v4210_v58, %v3968_v48  ;;  %1773 = vmatpush.msrb.mxu3 %v1421_v61 }
 0x1ec   :  { %5541 = vst [vmem:[#allocation66_spill] sm:$0xff] %v4344_v38 }
 0x1ed   :  { %v751_v29 = vmax.f32 %v438_v50, %v672_v21 }
 0x1ee   :  { %v4346_v45 = vpop.f32.mrf.mxu1  ;;  %1452 = vmatmul.f32.gmra.mxu0 %v3602_v10 }
 0x1ef   :  { %5542 = vst [vmem:[#allocation67_spill] sm:$0xff] %v4346_v45  ;;  %v4349_v39 = vmax.f32 %v751_v29, 0.0  ;;  %1275 = vmatmul.f32.gmra.mxu3 %v4031_v54  ;;  %1678 = vmatmul.f32.gmra.mxu2 %v3602_v10  ;;  %v5568_v45 = vld [vmem:[#allocation28_spill] sm:$0xff] }
 0x1f1   :  { %1094 = vmatmul.f32.gmra.mxu1 %v4349_v39 }
 0x1f2   :  { %v674_v28 = vpop.f32.mrf.mxu3 }
 0x1f3   :  { %v675_v50 = vadd.f32 %v674_v28, %v3968_v48  ;;  %v4359_v21 = vpop.f32.mrf.mxu0  ;;  %v4371_v28 = vpop.f32.mrf.mxu2 }
 0x1f4   :  { %5544 = vst [vmem:[#allocation69_spill] sm:$0xff] %v4359_v21 }
 0x1f5   :  { %v753_v29 = vmax.f32 %v441_v62, %v675_v50  ;;  %5546 = vst [vmem:[#allocation71_spill] sm:$0xff] %v4371_v28  ;;  %v5573_v28 = vld [vmem:[#allocation29_spill] sm:$0xff] }
 0x1f6   :  { %v4361_v38 = vpop.f32.mrf.mxu1  ;;  %1455 = vmatmul.f32.gmra.mxu0 %v3623_v41 }
 0x1f7   :  { %5545 = vst [vmem:[#allocation70_spill] sm:$0xff] %v4361_v38  ;;  %v4364_v10 = vmax.f32 %v753_v29, 0.0  ;;  %1278 = vmatmul.f32.gmra.mxu3 %v4053_v9  ;;  %1681 = vmatmul.f32.gmra.mxu2 %v3623_v41  ;;  %v5552_v38 = vld [vmem:[#allocation20_spill] sm:$0xff] }
 0x1f9   :  { %1097 = vmatmul.f32.gmra.mxu1 %v4364_v10 }
 0x1fa   :  { %v677_v36 = vpop.f32.mrf.mxu3 }
 0x1fb   :  { %v678_v62 = vadd.f32 %v677_v36, %v3968_v48  ;;  %v4374_v50 = vpop.f32.mrf.mxu0  ;;  %v447_v36 = vadd.f32 %v4234_v30, %v3968_v48  ;;  %v1404_v30 = vld [vmem:[#allocation7 + $0x130] sm:$0xff] }
 0x1fc   :  { %5547 = vst [vmem:[#allocation72_spill] sm:$0xff] %v4374_v50  ;;  %v4389_v50 = vpop.f32.mrf.mxu2  ;;  %1555 = vmatpush.msra.mxu1 %v1404_v30  ;;  %v1419_v30 = vld [vmem:[#allocation7 + $0x1a8] sm:$0xff] }
 0x1fd   :  { %v755_v29 = vmax.f32 %v444_v35, %v678_v62  ;;  %5550 = vst [vmem:[#allocation75_spill] sm:$0xff] %v4389_v50  ;;  %1774 = vmatpush.msrb.mxu3 %v1419_v30 }
 0x1fe   :  { %v4376_v21 = vpop.f32.mrf.mxu1  ;;  %1458 = vmatmul.f32.gmra.mxu0 %v3642_v57 }
 0x1ff   :  { %5548 = vst [vmem:[#allocation73_spill] sm:$0xff] %v4376_v21  ;;  %v4379_v41 = vmax.f32 %v755_v29, 0.0  ;;  %1281 = vmatmul.f32.gmra.mxu3 %v4078_v55  ;;  %1684 = vmatmul.f32.gmra.mxu2 %v3642_v57 }
 0x201   :  { %1100 = vmatmul.f32.gmra.mxu1 %v4379_v41 }
 0x202   :  { %v680_v58 = vpop.f32.mrf.mxu3 }
 0x203   :  { %v681_v35 = vadd.f32 %v680_v58, %v3968_v48  ;;  %v4387_v62 = vpop.f32.mrf.mxu0  ;;  %v450_v58 = vadd.f32 %v4264_v37, %v3968_v48 }
 0x204   :  { %5549 = vst [vmem:[#allocation74_spill] sm:$0xff] %v4387_v62  ;;  %v4407_v50 = vpop.f32.mrf.mxu2 }
 0x205   :  { %v757_v29 = vmax.f32 %v447_v36, %v681_v35 }
 0x206   :  { %v4391_v21 = vpop.f32.mrf.mxu1  ;;  %1461 = vmatmul.f32.gmra.mxu0 %v5552_v38 }
 0x207   :  { %5551 = vst [vmem:[#allocation76_spill] sm:$0xff] %v4391_v21  ;;  %v4394_v57 = vmax.f32 %v757_v29, 0.0  ;;  %1284 = vmatmul.f32.gmra.mxu3 %v4100_v4  ;;  %1687 = vmatmul.f32.gmra.mxu2 %v5552_v38  ;;  %v5555_v29 = vld [vmem:[#allocation22_spill] sm:$0xff] }
 0x208   :  { %5556 = vst [vmem:[#allocation22_spill] sm:$0xff] %v4407_v50 }
 0x209   :  { %1103 = vmatmul.f32.gmra.mxu1 %v4394_v57 }
 0x20a   :  { %v683_v61 = vpop.f32.mrf.mxu3 }
 0x20b   :  { %v684_v36 = vadd.f32 %v683_v61, %v3968_v48  ;;  %v4402_v35 = vpop.f32.mrf.mxu0  ;;  %v453_v61 = vadd.f32 %v4288_v6, %v3968_v48  ;;  %v1402_v6 = vld [vmem:[#allocation7 + $0x120] sm:$0xff] }
 0x20c   :  { %5553 = vst [vmem:[#allocation20_spill] sm:$0xff] %v4402_v35  ;;  %1556 = vmatpush.msra.mxu1 %v1402_v6  ;;  %v5564_v6 = vld [vmem:[#allocation16_spill] sm:$0xff] }
 0x20d   :  { %v759_v62 = vmax.f32 %v450_v58, %v684_v36 }
 0x20e   :  { %v4404_v21 = vpop.f32.mrf.mxu1  ;;  %1464 = vmatmul.f32.gmra.mxu0 %v5555_v29 }
 0x20f   :  { %5554 = vst [vmem:[#allocation77_spill] sm:$0xff] %v4404_v21  ;;  %v4409_v38 = vmax.f32 %v759_v62, 0.0  ;;  %1287 = vmatmul.f32.gmra.mxu3 %v4121_v63  ;;  %1690 = vmatmul.f32.gmra.mxu2 %v5555_v29  ;;  %v5559_v62 = vld [vmem:[#allocation24_spill] sm:$0xff]  ;;  %v4426_v29 = vpop.f32.mrf.mxu2 }
 0x210   :  { %5560 = vst [vmem:[#allocation24_spill] sm:$0xff] %v4426_v29  ;;  %v1417_v29 = vld [vmem:[#allocation7 + $0x198] sm:$0xff] }
 0x211   :  { %1106 = vmatmul.f32.gmra.mxu1 %v4409_v38  ;;  %1775 = vmatpush.msrb.mxu3 %v1417_v29  ;;  %v1400_v29 = vld [vmem:[#allocation7 + $0x110] sm:$0xff] }
 0x212   :  { %v686_v37 = vpop.f32.mrf.mxu3  ;;  %1557 = vmatpush.msra.mxu1 %v1400_v29  ;;  %v1415_v29 = vld [vmem:[#allocation7 + $0x188] sm:$0xff] }
 0x213   :  { %v687_v58 = vadd.f32 %v686_v37, %v3968_v48  ;;  %v4417_v36 = vpop.f32.mrf.mxu0  ;;  %v456_v37 = vadd.f32 %v4316_v19, %v3968_v48  ;;  %1776 = vmatpush.msrb.mxu3 %v1415_v29  ;;  %v1398_v29 = vld [vmem:[#allocation7 + $0x100] sm:$0xff] }
 0x214   :  { %5557 = vst [vmem:[#allocation78_spill] sm:$0xff] %v4417_v36  ;;  %1558 = vmatpush.msra.mxu1 %v1398_v29 }
 0x215   :  { %v761_v35 = vmax.f32 %v453_v61, %v687_v58 }
 0x216   :  { %v4419_v21 = vpop.f32.mrf.mxu1  ;;  %1467 = vmatmul.f32.gmra.mxu0 %v5559_v62 }
 0x217   :  { %5558 = vst [vmem:[#allocation79_spill] sm:$0xff] %v4419_v21  ;;  %v4422_v50 = vmax.f32 %v761_v35, 0.0  ;;  %1290 = vmatmul.f32.gmra.mxu3 %v4140_v5  ;;  %1693 = vmatmul.f32.gmra.mxu2 %v5559_v62  ;;  %v5563_v21 = vld [vmem:[#allocation26_spill] sm:$0xff] }
 0x219   :  { %1109 = vmatmul.f32.gmra.mxu1 %v4422_v50 }
 0x21a   :  { %v689_v30 = vpop.f32.mrf.mxu3 }
 0x21b   :  { %v690_v61 = vadd.f32 %v689_v30, %v3968_v48  ;;  %v4432_v58 = vpop.f32.mrf.mxu0  ;;  %v459_v30 = vadd.f32 %v5564_v6, %v3968_v48 }
 0x21c   :  { %5561 = vst [vmem:[#allocation80_spill] sm:$0xff] %v4432_v58  ;;  %v4444_v58 = vpop.f32.mrf.mxu2 }
 0x21d   :  { %v763_v35 = vmax.f32 %v456_v37, %v690_v61  ;;  %5565 = vst [vmem:[#allocation26_spill] sm:$0xff] %v4444_v58 }
 0x21e   :  { %v4434_v36 = vpop.f32.mrf.mxu1  ;;  %1470 = vmatmul.f32.gmra.mxu0 %v5563_v21 }
 0x21f   :  { %5562 = vst [vmem:[#allocation81_spill] sm:$0xff] %v4434_v36  ;;  %v4437_v62 = vmax.f32 %v763_v35, 0.0  ;;  %1293 = vmatmul.f32.gmra.mxu3 %v4166_v40  ;;  %1696 = vmatmul.f32.gmra.mxu2 %v5563_v21 }
 0x221   :  { %1112 = vmatmul.f32.gmra.mxu1 %v4437_v62 }
 0x222   :  { %v692_v19 = vpop.f32.mrf.mxu3 }
 0x223   :  { %v693_v37 = vadd.f32 %v692_v19, %v3968_v48  ;;  %v4447_v61 = vpop.f32.mrf.mxu0  ;;  %v5569_v19 = vld [vmem:[#allocation17_spill] sm:$0xff] }
 0x224   :  { %5566 = vst [vmem:[#allocation16_spill] sm:$0xff] %v4447_v61  ;;  %v462_v58 = vadd.f32 %v5569_v19, %v3968_v48  ;;  %v4462_v61 = vpop.f32.mrf.mxu2  ;;  %v5574_v19 = vld [vmem:[#allocation18_spill] sm:$0xff] }
 0x225   :  { %v765_v35 = vmax.f32 %v459_v30, %v693_v37  ;;  %5571 = vst [vmem:[#allocation17_spill] sm:$0xff] %v4462_v61 }
 0x226   :  { %v4449_v36 = vpop.f32.mrf.mxu1  ;;  %1473 = vmatmul.f32.gmra.mxu0 %v5568_v45 }
 0x227   :  { %5567 = vst [vmem:[#allocation82_spill] sm:$0xff] %v4449_v36  ;;  %v4452_v21 = vmax.f32 %v765_v35, 0.0  ;;  %1296 = vmatmul.f32.gmra.mxu3 %v4189_v20  ;;  %1699 = vmatmul.f32.gmra.mxu2 %v5568_v45 }
 0x229   :  { %1115 = vmatmul.f32.gmra.mxu1 %v4452_v21 }
 0x22a   :  { %v695_v6 = vpop.f32.mrf.mxu3 }
 0x22b   :  { %v696_v30 = vadd.f32 %v695_v6, %v3968_v48  ;;  %v4460_v37 = vpop.f32.mrf.mxu0 }
 0x22c   :  { %5570 = vst [vmem:[#allocation28_spill] sm:$0xff] %v4460_v37  ;;  %v465_v37 = vadd.f32 %v5574_v19, %v3968_v48  ;;  %v4480_v26 = vpop.f32.mrf.mxu2 }
 0x22d   :  { %v767_v35 = vmax.f32 %v462_v58, %v696_v30 }
 0x22e   :  { %v4464_v36 = vpop.f32.mrf.mxu1  ;;  %1476 = vmatmul.f32.gmra.mxu0 %v5573_v28 }
 0x22f   :  { %5572 = vst [vmem:[#allocation83_spill] sm:$0xff] %v4464_v36  ;;  %v4467_v45 = vmax.f32 %v767_v35, 0.0  ;;  %1299 = vmatmul.f32.gmra.mxu3 %v4215_v14  ;;  %1702 = vmatmul.f32.gmra.mxu2 %v5573_v28  ;;  %v5577_v35 = vld [vmem:[#allocation30_spill] sm:$0xff] }
 0x230   :  { %5578 = vst [vmem:[#allocation30_spill] sm:$0xff] %v4480_v26 }
 0x231   :  { %1118 = vmatmul.f32.gmra.mxu1 %v4467_v45 }
 0x232   :  { %v698_v6 = vpop.f32.mrf.mxu3 }
 0x233   :  { %v699_v58 = vadd.f32 %v698_v6, %v3968_v48  ;;  %v4475_v30 = vpop.f32.mrf.mxu0  ;;  %v5579_v6 = vld [vmem:[#allocation19_spill] sm:$0xff] }
 0x234   :  { %5575 = vst [vmem:[#allocation29_spill] sm:$0xff] %v4475_v30  ;;  %v4499_v29 = vpop.f32.mrf.mxu2 }
 0x235   :  { %v769_v36 = vmax.f32 %v465_v37, %v699_v58  ;;  %v468_v37 = vadd.f32 %v5579_v6, %v3968_v48  ;;  %v5584_v6 = vld [vmem:[#allocation21_spill] sm:$0xff] }
 0x236   :  { %v4477_v61 = vpop.f32.mrf.mxu1  ;;  %1479 = vmatmul.f32.gmra.mxu0 %v5577_v35 }
 0x237   :  { %5576 = vst [vmem:[#allocation18_spill] sm:$0xff] %v4477_v61  ;;  %v4482_v28 = vmax.f32 %v769_v36, 0.0  ;;  %1302 = vmatmul.f32.gmra.mxu3 %v4236_v23  ;;  %1705 = vmatmul.f32.gmra.mxu2 %v5577_v35  ;;  %v5582_v36 = vld [vmem:[#allocation31_spill] sm:$0xff] }
 0x238   :  { %v1413_v35 = vld [vmem:[#allocation7 + $0x178] sm:$0xff]  ;;  %5583 = vst [vmem:[#allocation31_spill] sm:$0xff] %v4499_v29 }
 0x239   :  { %1121 = vmatmul.f32.gmra.mxu1 %v4482_v28  ;;  %1777 = vmatpush.msrb.mxu3 %v1413_v35  ;;  %v2025_v35 = vld [vmem:[%s5436_s7 + $0x78] sm:$0xff] }
 0x23a   :  { %v701_v19 = vpop.f32.mrf.mxu3  ;;  %2046 = vmatpush.msrb.mxu0 %v2025_v35  ;;  %v5592_v35 = vld [vmem:[#allocation33_spill] sm:$0xff] }
 0x23b   :  { %v702_v58 = vadd.f32 %v701_v19, %v3968_v48  ;;  %v4490_v30 = vpop.f32.mrf.mxu0 }
 0x23c   :  { %5580 = vst [vmem:[#allocation19_spill] sm:$0xff] %v4490_v30 }
 0x23d   :  { %v771_v61 = vmax.f32 %v468_v37, %v702_v58  ;;  %v471_v37 = vadd.f32 %v5584_v6, %v3968_v48 }
 0x23e   :  { %v4492_v26 = vpop.f32.mrf.mxu1  ;;  %1482 = vmatmul.f32.gmra.mxu0 %v5582_v36 }
 0x23f   :  { %5581 = vst [vmem:[#allocation84_spill] sm:$0xff] %v4492_v26  ;;  %v4495_v59 = vmax.f32 %v771_v61, 0.0  ;;  %1305 = vmatmul.f32.gmra.mxu3 %v4257_v49  ;;  %1708 = vmatmul.f32.gmra.mxu2 %v5582_v36 }
 0x241   :  { %1124 = vmatmul.f32.gmra.mxu1 %v4495_v59 }
 0x242   :  { %v704_v19 = vpop.f32.mrf.mxu3 }
 0x243   :  { %v705_v58 = vadd.f32 %v704_v19, %v3968_v48  ;;  %v4505_v30 = vpop.f32.mrf.mxu0  ;;  %v2041_v19 = vld [vmem:[%s5436_s7 + $0xf8] sm:$0xff] }
 0x244   :  { %5585 = vst [vmem:[#allocation21_spill] sm:$0xff] %v4505_v30  ;;  %2159 = vmatpush.msrb.mxu1 %v2041_v19  ;;  %v1411_v19 = vld [vmem:[#allocation7 + $0x168] sm:$0xff] }
 0x245   :  { %v773_v61 = vmax.f32 %v471_v37, %v705_v58  ;;  %v5588_v37 = vld [vmem:[#allocation23_spill] sm:$0xff]  ;;  %1778 = vmatpush.msrb.mxu3 %v1411_v19  ;;  %v2024_v19 = vld [vmem:[%s5436_s7 + $0x70] sm:$0xff] }
 0x246   :  { %v4507_v26 = vpop.f32.mrf.mxu1  ;;  %1485 = vmatmul.f32.gmra.mxu0 %v5587_v56  ;;  %v474_v58 = vadd.f32 %v5588_v37, %v3968_v48 }
 0x247   :  { %5586 = vst [vmem:[#allocation85_spill] sm:$0xff] %v4507_v26  ;;  %v4510_v36 = vmax.f32 %v773_v61, 0.0  ;;  %1308 = vmatmul.f32.gmra.mxu3 %v4280_v18  ;;  %1711 = vmatmul.f32.gmra.mxu2 %v5587_v56  ;;  %v4523_v61 = vpop.f32.mrf.mxu2 }
 0x248   :  { %5589 = vst [vmem:[#allocation32_spill] sm:$0xff] %v4523_v61  ;;  %2047 = vmatpush.msrb.mxu0 %v2024_v19 }
 0x249   :  { %1127 = vmatmul.f32.gmra.mxu1 %v4510_v36 }
 0x24a   :  { %v707_v6 = vpop.f32.mrf.mxu3 }
 0x24b   :  { %v708_v56 = vadd.f32 %v707_v6, %v3968_v48  ;;  %v4526_v26 = vpop.f32.mrf.mxu0  ;;  %v5593_v6 = vld [vmem:[#allocation25_spill] sm:$0xff] }
 0x24c   :  { %5590 = vst [vmem:[#allocation23_spill] sm:$0xff] %v4526_v26 }
 0x24d   :  { %v775_v30 = vmax.f32 %v474_v58, %v708_v56  ;;  %v477_v58 = vadd.f32 %v5593_v6, %v3968_v48 }
 0x24e   :  { %v4528_v29 = vpop.f32.mrf.mxu1  ;;  %1488 = vmatmul.f32.gmra.mxu0 %v5592_v35 }
 0x24f   :  { %5591 = vst [vmem:[#allocation86_spill] sm:$0xff] %v4528_v29  ;;  %v4531_v52 = vmax.f32 %v775_v30, 0.0  ;;  %1311 = vmatmul.f32.gmra.mxu3 %v4303_v31  ;;  %1714 = vmatmul.f32.gmra.mxu2 %v5592_v35  ;;  %v4539_v26 = vpop.f32.mrf.mxu2  ;;  %v5596_v30 = vld [vmem:[#allocation34_spill] sm:$0xff] }
 0x250   :  { %5594 = vst [vmem:[#allocation33_spill] sm:$0xff] %v4539_v26  ;;  %v5600_v26 = vld [vmem:[#allocation35_spill] sm:$0xff] }
 0x251   :  { %1130 = vmatmul.f32.gmra.mxu1 %v4531_v52 }
 0x252   :  { %v710_v37 = vpop.f32.mrf.mxu3 }
 0x253   :  { %v711_v56 = vadd.f32 %v710_v37, %v3968_v48  ;;  %v4546_v35 = vpop.f32.mrf.mxu0  ;;  %v2040_v37 = vld [vmem:[%s5436_s7 + $0xf0] sm:$0xff] }
 0x254   :  { %5597 = vst [vmem:[#allocation34_spill] sm:$0xff] %v4546_v35  ;;  %2160 = vmatpush.msrb.mxu1 %v2040_v37  ;;  %v4560_v35 = vld [vmem:[#allocation8] sm:$0x3]  ;;  %v1409_v37 = vld [vmem:[#allocation7 + $0x158] sm:$0xff] }
 0x255   :  { %v777_v29 = vmax.f32 %v477_v58, %v711_v56  ;;  %1779 = vmatpush.msrb.mxu3 %v1409_v37 }
 0x256   :  { %v4541_v61 = vpop.f32.mrf.mxu1  ;;  %1491 = vmatmul.f32.gmra.mxu0 %v5596_v30 }
 0x257   :  { %5595 = vst [vmem:[#allocation25_spill] sm:$0xff] %v4541_v61  ;;  %v4544_v31 = vmax.f32 %v777_v29, 0.0  ;;  %1314 = vmatmul.f32.gmra.mxu3 %v4321_v51  ;;  %1717 = vmatmul.f32.gmra.mxu2 %v5596_v30  ;;  %v5598_v29 = vld [vmem:[#allocation27_spill] sm:$0xff]  ;;  %v4563_v30 = vperm.slane %v4560_v35, 1  ;;  %v4568_v51 = vpop.f32.mrf.mxu2 }
 0x258   :  { %v480_v58 = vadd.f32 %v5598_v29, %v3968_v48 }
 0x259   :  { %1133 = vmatmul.f32.gmra.mxu1 %v4544_v31 }
 0x25a   :  { %v713_v6 = vpop.f32.mrf.mxu3 }
 0x25b   :  { %v714_v56 = vadd.f32 %v713_v6, %v3968_v48  ;;  %v1158_v48 = vadd.f32 %v3976_v43, %v4563_v30  ;;  %v4576_v6 = vpop.f32.mrf.mxu0  ;;  %v1161_v43 = vadd.f32 %v3998_v3, %v4563_v30  ;;  %v1407_v3 = vld [vmem:[#allocation7 + $0x148] sm:$0xff] }
 0x25c   :  { %1780 = vmatpush.msrb.mxu3 %v1407_v3  ;;  %v2038_v3 = vld [vmem:[%s5436_s7 + $0xe0] sm:$0xff] }
 0x25d   :  { %v779_v61 = vmax.f32 %v480_v58, %v714_v56 }
 0x25e   :  { %v4565_v19 = vpop.f32.mrf.mxu1  ;;  %1494 = vmatmul.f32.gmra.mxu0 %v5600_v26 }
 0x25f   :  { %5599 = vst [vmem:[#allocation27_spill] sm:$0xff] %v4565_v19  ;;  %v4570_v18 = vmax.f32 %v779_v61, 0.0  ;;  %1317 = vmatmul.f32.gmra.mxu3 %v4336_v42  ;;  %1720 = vmatmul.f32.gmra.mxu2 %v5600_v26  ;;  %v5604_v61 = vld [vmem:[#allocation37_spill] sm:$0xff]  ;;  %v4591_v37 = vpop.f32.mrf.mxu2 }
 0x260   :  { %v2023_v26 = vld [vmem:[%s5436_s7 + $0x68] sm:$0xff] }
 0x261   :  { %5601 = vst [vmem:[#allocation35_spill] sm:$0xff] %v4570_v18  ;;  %1136 = vmatmul.f32.gmra.mxu1 %v4570_v18  ;;  %2048 = vmatpush.msrb.mxu0 %v2023_v26  ;;  %v1164_v26 = vadd.f32 %v4023_v2, %v4563_v30  ;;  %v1167_v2 = vadd.f32 %v4045_v7, %v4563_v30  ;;  %v1405_v7 = vld [vmem:[#allocation7 + $0x138] sm:$0xff] }
 0x262   :  { %v1270_v29 = vpop.f32.mrf.mxu3  ;;  %1781 = vmatpush.msrb.mxu3 %v1405_v7  ;;  %v2037_v7 = vld [vmem:[%s5436_s7 + $0xd8] sm:$0xff] }
 0x263   :  { %v4579_v58 = vadd.f32 %v1270_v29, %v1158_v48  ;;  %v2039_v48 = vld [vmem:[%s5436_s7 + $0xe8] sm:$0xff] }
 0x264   :  { %2161 = vmatpush.msrb.mxu1 %v2039_v48 }
 0x265   :  { %5602 = vst [vmem:[#allocation87_spill] sm:$0xff] %v4579_v58 }
 0x266   :  { %v4581_v56 = vpop.f32.mrf.mxu1  ;;  %1497 = vmatmul.f32.gmra.mxu0 %v5604_v61  ;;  %2162 = vmatpush.msrb.mxu1 %v2038_v3 }
 0x267   :  { %5603 = vst [vmem:[#allocation88_spill] sm:$0xff] %v4581_v56  ;;  %1320 = vmatmul.f32.gmra.mxu3 %v4349_v39  ;;  %1723 = vmatmul.f32.gmra.mxu2 %v5604_v61  ;;  %v4597_v56 = vpop.f32.mrf.mxu0  ;;  %v4609_v19 = vpop.f32.mrf.mxu2 }
 0x268   :  { %2163 = vmatpush.msrb.mxu1 %v2037_v7 }
 0x269   :  { %1559 = vmatmul.f32.vlgmr.msra.gmra.mxu1 %v3986_v16 }
 0x26a   :  { %v1273_v29 = vpop.f32.mrf.mxu3 }
 0x26b   :  { %v4599_v61 = vadd.f32 %v1273_v29, %v1161_v43 }
 0x26d   :  { %5605 = vst [vmem:[#allocation37_spill] sm:$0xff] %v4599_v61 }
 0x26e   :  { %v4601_v58 = vpop.f32.mrf.mxu1  ;;  %1500 = vmatmul.f32.gmra.mxu0 %v3992_v33 }
 0x26f   :  { %5606 = vst [vmem:[#allocation89_spill] sm:$0xff] %v4601_v58  ;;  %1323 = vmatmul.f32.gmra.mxu3 %v4364_v10  ;;  %1726 = vmatmul.f32.gmra.mxu2 %v3992_v33  ;;  %v4613_v29 = vpop.f32.mrf.mxu0  ;;  %v2022_v33 = vld [vmem:[%s5436_s7 + $0x60] sm:$0xff] }
 0x270   :  { %2049 = vmatpush.msrb.mxu0 %v2022_v33 }
 0x271   :  { %1562 = vmatmul.f32.gmra.mxu1 %v4008_v60 }
 0x272   :  { %v1276_v48 = vpop.f32.mrf.mxu3 }
 0x273   :  { %v4611_v43 = vadd.f32 %v1276_v48, %v1164_v26 }
 0x275   :  { %5607 = vst [vmem:[#allocation90_spill] sm:$0xff] %v4611_v43  ;;  %v1170_v43 = vadd.f32 %v4070_v44, %v4563_v30  ;;  %v1173_v44 = vadd.f32 %v4090_v46, %v4563_v30  ;;  %v1403_v46 = vld [vmem:[#allocation7 + $0x128] sm:$0xff] }
 0x276   :  { %v4615_v58 = vpop.f32.mrf.mxu1  ;;  %1503 = vmatmul.f32.gmra.mxu0 %v4017_v22  ;;  %1782 = vmatpush.msrb.mxu3 %v1403_v46  ;;  %v2036_v46 = vld [vmem:[%s5436_s7 + $0xd0] sm:$0xff] }
 0x277   :  { %5608 = vst [vmem:[#allocation91_spill] sm:$0xff] %v4615_v58  ;;  %1326 = vmatmul.f32.gmra.mxu3 %v4379_v41  ;;  %1729 = vmatmul.f32.gmra.mxu2 %v4017_v22  ;;  %v4631_v58 = vpop.f32.mrf.mxu2  ;;  %v4636_v33 = vpop.f32.mrf.mxu0 }
 0x278   :  { %2164 = vmatpush.msrb.mxu1 %v2036_v46 }
 0x279   :  { %1565 = vmatmul.f32.gmra.mxu1 %v4031_v54 }
 0x27a   :  { %v1279_v26 = vpop.f32.mrf.mxu3 }
 0x27b   :  { %v4629_v48 = vadd.f32 %v1279_v26, %v1167_v2 }
 0x27d   :  { %5609 = vst [vmem:[#allocation92_spill] sm:$0xff] %v4629_v48 }
 0x27e   :  { %v4633_v22 = vpop.f32.mrf.mxu1  ;;  %1506 = vmatmul.f32.gmra.mxu0 %v4039_v24 }
 0x27f   :  { %5610 = vst [vmem:[#allocation93_spill] sm:$0xff] %v4633_v22  ;;  %1329 = vmatmul.f32.gmra.mxu3 %v4394_v57  ;;  %1732 = vmatmul.f32.gmra.mxu2 %v4039_v24  ;;  %v4648_v22 = vpop.f32.mrf.mxu2  ;;  %v2021_v24 = vld [vmem:[%s5436_s7 + $0x58] sm:$0xff] }
 0x280   :  { %2050 = vmatpush.msrb.mxu0 %v2021_v24  ;;  %v1176_v24 = vadd.f32 %v4111_v13, %v4563_v30  ;;  %v1179_v13 = vadd.f32 %v4127_v11, %v4563_v30  ;;  %v1401_v11 = vld [vmem:[#allocation7 + $0x118] sm:$0xff] }
 0x281   :  { %1568 = vmatmul.f32.gmra.mxu1 %v4053_v9  ;;  %1783 = vmatpush.msrb.mxu3 %v1401_v11  ;;  %v2035_v11 = vld [vmem:[%s5436_s7 + $0xc8] sm:$0xff] }
 0x282   :  { %v1282_v2 = vpop.f32.mrf.mxu3  ;;  %2165 = vmatpush.msrb.mxu1 %v2035_v11 }
 0x283   :  { %v4643_v3 = vadd.f32 %v1282_v2, %v1170_v43  ;;  %v4657_v43 = vpop.f32.mrf.mxu0 }
 0x285   :  { %5611 = vst [vmem:[#allocation94_spill] sm:$0xff] %v4643_v3 }
 0x286   :  { %v4645_v26 = vpop.f32.mrf.mxu1  ;;  %1509 = vmatmul.f32.gmra.mxu0 %v4064_v32 }
 0x287   :  { %5612 = vst [vmem:[#allocation95_spill] sm:$0xff] %v4645_v26  ;;  %1332 = vmatmul.f32.gmra.mxu3 %v4409_v38  ;;  %1735 = vmatmul.f32.gmra.mxu2 %v4064_v32  ;;  %v4672_v3 = vpop.f32.mrf.mxu2 }
 0x288   :  { %5615 = vst [vmem:[#allocation98_spill] sm:$0xff] %v4672_v3 }
 0x289   :  { %1571 = vmatmul.f32.gmra.mxu1 %v4078_v55 }
 0x28a   :  { %v1285_v2 = vpop.f32.mrf.mxu3 }
 0x28b   :  { %v4663_v26 = vadd.f32 %v1285_v2, %v1173_v44  ;;  %v4675_v44 = vpop.f32.mrf.mxu0 }
 0x28d   :  { %5613 = vst [vmem:[#allocation96_spill] sm:$0xff] %v4663_v26 }
 0x28e   :  { %v4665_v32 = vpop.f32.mrf.mxu1  ;;  %1512 = vmatmul.f32.gmra.mxu0 %v4084_v0 }
 0x28f   :  { %5614 = vst [vmem:[#allocation97_spill] sm:$0xff] %v4665_v32  ;;  %1335 = vmatmul.f32.gmra.mxu3 %v4422_v50  ;;  %1738 = vmatmul.f32.gmra.mxu2 %v4084_v0  ;;  %v2020_v0 = vld [vmem:[%s5436_s7 + $0x50] sm:$0xff] }
 0x290   :  { %2051 = vmatpush.msrb.mxu0 %v2020_v0  ;;  %v5621_v0 = vld [vmem:[#allocation46_spill] sm:$0xff] }
 0x291   :  { %1574 = vmatmul.f32.gmra.mxu1 %v4100_v4  ;;  %v1182_v26 = vadd.f32 %v5621_v0, %v4563_v30 }
 0x292   :  { %v1288_v7 = vpop.f32.mrf.mxu3 }
 0x293   :  { %v4677_v2 = vadd.f32 %v1288_v7, %v1176_v24  ;;  %v4693_v7 = vpop.f32.mrf.mxu2 }
 0x294   :  { %5618 = vst [vmem:[#allocation101_spill] sm:$0xff] %v4693_v7 }
 0x295   :  { %5616 = vst [vmem:[#allocation99_spill] sm:$0xff] %v4677_v2 }
 0x296   :  { %v4679_v32 = vpop.f32.mrf.mxu1  ;;  %1515 = vmatmul.f32.gmra.mxu0 %v4109_v15 }
 0x297   :  { %5617 = vst [vmem:[#allocation100_spill] sm:$0xff] %v4679_v32  ;;  %1338 = vmatmul.f32.gmra.mxu3 %v4437_v62  ;;  %1741 = vmatmul.f32.gmra.mxu2 %v4109_v15  ;;  %v4697_v15 = vpop.f32.mrf.mxu0 }
 0x299   :  { %1577 = vmatmul.f32.gmra.mxu1 %v4121_v63 }
 0x29a   :  { %v1291_v24 = vpop.f32.mrf.mxu3 }
 0x29b   :  { %v4695_v32 = vadd.f32 %v1291_v24, %v1179_v13  ;;  %v4709_v24 = vpop.f32.mrf.mxu2 }
 0x29c   :  { %5623 = vst [vmem:[#allocation104_spill] sm:$0xff] %v4709_v24 }
 0x29d   :  { %5619 = vst [vmem:[#allocation102_spill] sm:$0xff] %v4695_v32 }
 0x29e   :  { %v4699_v2 = vpop.f32.mrf.mxu1  ;;  %1518 = vmatmul.f32.gmra.mxu0 %v4137_v12 }
 0x29f   :  { %5620 = vst [vmem:[#allocation103_spill] sm:$0xff] %v4699_v2  ;;  %1341 = vmatmul.f32.gmra.mxu3 %v4452_v21  ;;  %1744 = vmatmul.f32.gmra.mxu2 %v4137_v12  ;;  %v5625_v2 = vld [vmem:[#allocation48_spill] sm:$0xff]  ;;  %v4714_v48 = vpop.f32.mrf.mxu0 }
 0x2a0   :  { %v2019_v12 = vld [vmem:[%s5436_s7 + $0x48] sm:$0xff] }
 0x2a1   :  { %1580 = vmatmul.f32.gmra.mxu1 %v4140_v5  ;;  %2052 = vmatpush.msrb.mxu0 %v2019_v12  ;;  %v5630_v12 = vld [vmem:[#allocation53_spill] sm:$0xff] }
 0x2a2   :  { %v1294_v46 = vpop.f32.mrf.mxu3  ;;  %v1188_v24 = vadd.f32 %v5630_v12, %v4563_v30 }
 0x2a3   :  { %v4707_v13 = vadd.f32 %v1294_v46, %v1182_v26  ;;  %v1185_v26 = vadd.f32 %v4179_v47, %v4563_v30  ;;  %v1399_v47 = vld [vmem:[#allocation7 + $0x108] sm:$0xff] }
 0x2a4   :  { %1784 = vmatpush.msrb.mxu3 %v1399_v47  ;;  %v1191_v47 = vadd.f32 %v4238_v1, %v4563_v30  ;;  %v2016_v1 = vld [vmem:[%s5436_s7 + $0x30] sm:$0xff] }
 0x2a5   :  { %5622 = vst [vmem:[#allocation46_spill] sm:$0xff] %v4707_v13  ;;  %v4732_v13 = vpop.f32.mrf.mxu2 }
 0x2a6   :  { %v4711_v32 = vpop.f32.mrf.mxu1  ;;  %1521 = vmatmul.f32.gmra.mxu0 %v5625_v2 }
 0x2a7   :  { %5624 = vst [vmem:[#allocation105_spill] sm:$0xff] %v4711_v32  ;;  %1344 = vmatmul.f32.gmra.mxu3 %v4467_v45  ;;  %1747 = vmatmul.f32.gmra.mxu2 %v5625_v2  ;;  %v5628_v2 = vld [vmem:[#allocation50_spill] sm:$0xff]  ;;  %v4738_v61 = vpop.f32.mrf.mxu0 }
 0x2a8   :  { %5629 = vst [vmem:[#allocation50_spill] sm:$0xff] %v4732_v13 }
 0x2a9   :  { %1583 = vmatmul.f32.gmra.mxu1 %v4166_v40 }
 0x2aa   :  { %v1297_v0 = vpop.f32.mrf.mxu3 }
 0x2ab   :  { %v4727_v46 = vadd.f32 %v1297_v0, %v1185_v26 }
 0x2ad   :  { %5626 = vst [vmem:[#allocation48_spill] sm:$0xff] %v4727_v46  ;;  %v4753_v12 = vpop.f32.mrf.mxu2 }
 0x2ae   :  { %v4729_v32 = vpop.f32.mrf.mxu1  ;;  %1524 = vmatmul.f32.gmra.mxu0 %v5628_v2 }
 0x2af   :  { %5627 = vst [vmem:[#allocation106_spill] sm:$0xff] %v4729_v32  ;;  %1347 = vmatmul.f32.gmra.mxu3 %v4482_v28  ;;  %1750 = vmatmul.f32.gmra.mxu2 %v5628_v2  ;;  %v5633_v32 = vld [vmem:[#allocation52_spill] sm:$0xff] }
 0x2b0   :  { %v2018_v2 = vld [vmem:[%s5436_s7 + $0x40] sm:$0xff]  ;;  %5634 = vst [vmem:[#allocation52_spill] sm:$0xff] %v4753_v12 }
 0x2b1   :  { %1586 = vmatmul.f32.gmra.mxu1 %v4189_v20  ;;  %2053 = vmatpush.msrb.mxu0 %v2018_v2  ;;  %v2017_v2 = vld [vmem:[%s5436_s7 + $0x38] sm:$0xff] }
 0x2b2   :  { %v1300_v26 = vpop.f32.mrf.mxu3 }
 0x2b3   :  { %v4741_v11 = vadd.f32 %v1300_v26, %v1188_v24  ;;  %v2034_v24 = vld [vmem:[%s5436_s7 + $0xc0] sm:$0xff]  ;;  %2054 = vmatpush.msrb.mxu0 %v2017_v2 }
 0x2b4   :  { %2166 = vmatpush.msrb.mxu1 %v2034_v24  ;;  %v2015_v24 = vld [vmem:[%s5436_s7 + $0x28] sm:$0xff]  ;;  %v2014_v2 = vld [vmem:[%s5436_s7 + $0x20] sm:$0xff] }
 0x2b5   :  { %5631 = vst [vmem:[#allocation53_spill] sm:$0xff] %v4741_v11  ;;  %2055 = vmatpush.msrb.mxu0 %v2016_v1  ;;  %v2013_v1 = vld [vmem:[%s5436_s7 + $0x18] sm:$0xff] }
 0x2b6   :  { %v4743_v0 = vpop.f32.mrf.mxu1  ;;  %1527 = vmatmul.f32.gmra.mxu0 %v5633_v32 }
 0x2b7   :  { %5632 = vst [vmem:[#allocation107_spill] sm:$0xff] %v4743_v0  ;;  %1350 = vmatmul.f32.gmra.mxu3 %v4495_v59  ;;  %1753 = vmatmul.f32.gmra.mxu2 %v5633_v32  ;;  %v4759_v0 = vpop.f32.mrf.mxu0 }
 0x2b8   :  { %2056 = vmatpush.msrb.mxu0 %v2015_v24  ;;  %v2012_v24 = vld [vmem:[%s5436_s7 + $0x10] sm:$0xff] }
 0x2b9   :  { %1589 = vmatmul.f32.gmra.mxu1 %v4215_v14 }
 0x2ba   :  { %v1303_v26 = vpop.f32.mrf.mxu3  ;;  %2057 = vmatpush.msrb.mxu0 %v2014_v2 }
 0x2bb   :  { %v4761_v32 = vadd.f32 %v1303_v26, %v1191_v47  ;;  %v1194_v47 = vadd.f32 %v4266_v8, %v4563_v30 }
 0x2bc   :  { %2058 = vmatpush.msrb.mxu0 %v2013_v1 }
 0x2bd   :  { %5635 = vst [vmem:[#allocation108_spill] sm:$0xff] %v4761_v32 }
 0x2be   :  { %v4766_v11 = vpop.f32.mrf.mxu1  ;;  %1530 = vmatmul.f32.gmra.mxu0 %v4231_v25 }
 0x2bf   :  { %5636 = vst [vmem:[#allocation109_spill] sm:$0xff] %v4766_v11  ;;  %1353 = vmatmul.f32.gmra.mxu3 %v4510_v36  ;;  %1756 = vmatmul.f32.gmra.mxu2 %v4231_v25  ;;  %v4780_v11 = vpop.f32.mrf.mxu2  ;;  %v4784_v25 = vpop.f32.mrf.mxu0 }
 0x2c0   :  { %5637 = vst [vmem:[#allocation110_spill] sm:$0xff] %v4780_v11  ;;  %2059 = vmatpush.msrb.mxu0 %v2012_v24  ;;  %v1200_v24 = vadd.f32 %v4318_v17, %v4563_v30  ;;  %v5649_v11 = vld [vmem:[#allocation60_spill] sm:$0xff] }
 0x2c1   :  { %1592 = vmatmul.f32.gmra.mxu1 %v4236_v23 }
 0x2c2   :  { %v1306_v26 = vpop.f32.mrf.mxu3 }
 0x2c3   :  { %v4782_v32 = vadd.f32 %v1306_v26, %v1194_v47  ;;  %v1197_v47 = vadd.f32 %v4292_v34, %v4563_v30  ;;  %v2011_v34 = vld [vmem:[%s5436_s7 + $0x8] sm:$0xff] }
 0x2c4   :  { %2060 = vmatpush.msrb.mxu0 %v2011_v34 }
 0x2c5   :  { %5638 = vst [vmem:[#allocation111_spill] sm:$0xff] %v4782_v32  ;;  %v2311_v32 = vld [vmem:[#allocation10 + $0x38] sm:$0xff] }
 0x2c6   :  { %v4789_v8 = vpop.f32.mrf.mxu1  ;;  %1533 = vmatmul.f32.gmra.mxu0 %v4254_v27  ;;  %2421 = vmatpush.msrb.mxu2 %v2311_v32 }
 0x2c7   :  { %5639 = vst [vmem:[#allocation112_spill] sm:$0xff] %v4789_v8  ;;  %1356 = vmatmul.f32.gmra.mxu3 %v4531_v52  ;;  %1759 = vmatmul.f32.gmra.mxu2 %v4254_v27  ;;  %v2033_v27 = vld [vmem:[%s5436_s7 + $0xb8] sm:$0xff]  ;;  %v4808_v2 = vpop.f32.mrf.mxu2  ;;  %v4816_v1 = vpop.f32.mrf.mxu0 }
 0x2c8   :  { %2167 = vmatpush.msrb.mxu1 %v2033_v27  ;;  %5641 = vst [vmem:[#allocation114_spill] sm:$0xff] %v4808_v2 }
 0x2c9   :  { %1595 = vmatmul.f32.gmra.mxu1 %v4257_v49 }
 0x2ca   :  { %v1309_v26 = vpop.f32.mrf.mxu3 }
 0x2cb   :  { %v4803_v8 = vadd.f32 %v1309_v26, %v1197_v47  ;;  %v2010_v47 = vld [vmem:[%s5436_s7] sm:$0xff]  ;;  %v5643_v26 = vld [vmem:[#allocation57_spill] sm:$0xff] }
 0x2cc   :  { %2061 = vmatpush.msrb.mxu0 %v2010_v47  ;;  %v2032_v47 = vld [vmem:[%s5436_s7 + $0xb0] sm:$0xff] }
 0x2cd   :  { %5640 = vst [vmem:[#allocation113_spill] sm:$0xff] %v4803_v8  ;;  %v5646_v8 = vld [vmem:[#allocation59_spill] sm:$0xff]  ;;  %2168 = vmatpush.msrb.mxu1 %v2032_v47 }
 0x2ce   :  { %v4813_v46 = vpop.f32.mrf.mxu1  ;;  %1536 = vmatmul.f32.gmra.mxu0 %v4277_v53 }
 0x2cf   :  { %5642 = vst [vmem:[#allocation115_spill] sm:$0xff] %v4813_v46  ;;  %1359 = vmatmul.f32.gmra.mxu3 %v4544_v31  ;;  %1762 = vmatmul.f32.gmra.mxu2 %v4277_v53  ;;  %v4831_v2 = vpop.f32.mrf.mxu2  ;;  %v5648_v53 = vld [vmem:[#allocation65_spill] sm:$0xff]  ;;  %v4837_v17 = vpop.f32.mrf.mxu0 }
 0x2d0   :  { %5647 = vst [vmem:[#allocation59_spill] sm:$0xff] %v4831_v2  ;;  %v1203_v34 = vadd.f32 %v5648_v53, %v4563_v30  ;;  %v5652_v53 = vld [vmem:[#allocation68_spill] sm:$0xff]  ;;  %v5653_v2 = vld [vmem:[#allocation62_spill] sm:$0xff] }
 0x2d1   :  { %1598 = vmatmul.f32.gmra.mxu1 %v5643_v26 }
 0x2d2   :  { %v1312_v32 = vpop.f32.mrf.mxu3 }
 0x2d3   :  { %v4826_v27 = vadd.f32 %v1312_v32, %v1200_v24 }
 0x2d5   :  { %5644 = vst [vmem:[#allocation57_spill] sm:$0xff] %v4826_v27  ;;  %v1206_v27 = vadd.f32 %v5652_v53, %v4563_v30  ;;  %v5657_v53 = vld [vmem:[#allocation71_spill] sm:$0xff] }
 0x2d6   :  { %v4828_v46 = vpop.f32.mrf.mxu1  ;;  %1539 = vmatmul.f32.gmra.mxu0 %v5646_v8 }
 0x2d7   :  { %5645 = vst [vmem:[#allocation116_spill] sm:$0xff] %v4828_v46  ;;  %1362 = vmatmul.f32.gmra.mxu3 %v4570_v18  ;;  %1765 = vmatmul.f32.gmra.mxu2 %v5646_v8  ;;  %v4849_v8 = vperm.slane %v4560_v35, 0  ;;  %v4854_v13 = vpop.f32.mrf.mxu0  ;;  %v1209_v18 = vadd.f32 %v5657_v53, %v4563_v30 }
 0x2d9   :  { %1601 = vmatmul.f32.gmra.mxu1 %v5649_v11 }
 0x2da   :  { %v1315_v24 = vpop.f32.mrf.mxu3 }
 0x2db   :  { %v4843_v32 = vadd.f32 %v1315_v24, %v1203_v34  ;;  %v5655_v34 = vld [vmem:[#allocation36_spill] sm:$0xff]  ;;  %v1448_v24 = vadd.f32 %v4576_v6, %v4849_v8 }
 0x2dc   :  { %v932_v47 = vadd.f32 %v5655_v34, %v4849_v8 }
 0x2dd   :  { %5650 = vst [vmem:[#allocation65_spill] sm:$0xff] %v4843_v32 }
 0x2de   :  { %v4845_v46 = vpop.f32.mrf.mxu1 }
 0x2df   :  { %5651 = vst [vmem:[#allocation60_spill] sm:$0xff] %v4845_v46  ;;  %1785 = vmatmul.f32.vlgmr.msrb.gmra.mxu3 %v3986_v16  ;;  %v5656_v46 = vld [vmem:[#allocation64_spill] sm:$0xff] }
 0x2e0   :  { %v1045_v35 = vadd.f32 %v5656_v46, %v932_v47  ;;  %v5659_v46 = vld [vmem:[#allocation38_spill] sm:$0xff]  ;;  %v1451_v47 = vadd.f32 %v4597_v56, %v4849_v8  ;;  %v5662_v56 = vld [vmem:[#allocation39_spill] sm:$0xff] }
 0x2e1   :  { %1604 = vmatmul.f32.gmra.mxu1 %v5653_v2 }
 0x2e2   :  { %v1318_v12 = vpop.f32.mrf.mxu3 }
 0x2e3   :  { %v4856_v7 = vadd.f32 %v1318_v12, %v1206_v27  ;;  %v2031_v12 = vld [vmem:[%s5436_s7 + $0xa8] sm:$0xff] }
 0x2e4   :  { %2169 = vmatpush.msrb.mxu1 %v2031_v12 }
 0x2e5   :  { %5654 = vst [vmem:[#allocation68_spill] sm:$0xff] %v4856_v7  ;;  %v2310_v7 = vld [vmem:[#allocation10 + $0x30] sm:$0xff] }
 0x2e6   :  { %v1560_v16 = vpop.f32.mrf.mxu1  ;;  %2422 = vmatpush.msrb.mxu2 %v2310_v7 }
 0x2e7   :  { %v1561_v32 = vadd.f32 %v1560_v16, %v1448_v24  ;;  %1788 = vmatmul.f32.gmra.mxu3 %v4008_v60  ;;  %v935_v60 = vadd.f32 %v5659_v46, %v4849_v8  ;;  %v5660_v16 = vld [vmem:[#allocation67_spill] sm:$0xff] }
 0x2e9   :  { %v1882_v3 = vmax.f32 %v1045_v35, %v1561_v32  ;;  %1607 = vmatmul.f32.gmra.mxu1 %v4336_v42  ;;  %v4876_v32 = vpop.f32.mrf.mxu0  ;;  %v1048_v35 = vadd.f32 %v5660_v16, %v935_v60 }
 0x2ea   :  { %v1321_v27 = vpop.f32.mrf.mxu3 }
 0x2eb   :  { %v1946_v34 = vmax.f32 %v1882_v3, 0.0  ;;  %v4870_v6 = vadd.f32 %v1321_v27, %v1209_v18  ;;  %v5661_v18 = vld [vmem:[#allocation75_spill] sm:$0xff] }
 0x2ec   :  { %v1212_v3 = vadd.f32 %v5661_v18, %v4563_v30 }
 0x2ed   :  { %5658 = vst [vmem:[#allocation62_spill] sm:$0xff] %v4870_v6  ;;  %2062 = vmatmul.f32.vlgmr.msrb.gmra.mxu0 %v1946_v34  ;;  %v938_v6 = vadd.f32 %v5662_v56, %v4849_v8  ;;  %v1454_v34 = vadd.f32 %v4613_v29, %v4849_v8 }
 0x2ee   :  { %v1563_v24 = vpop.f32.mrf.mxu1 }
 0x2ef   :  { %v1564_v53 = vadd.f32 %v1563_v24, %v1451_v47  ;;  %1791 = vmatmul.f32.gmra.mxu3 %v4031_v54  ;;  %v5663_v47 = vld [vmem:[#allocation70_spill] sm:$0xff] }
 0x2f0   :  { %v1051_v54 = vadd.f32 %v5663_v47, %v938_v6 }
 0x2f1   :  { %v1884_v12 = vmax.f32 %v1048_v35, %v1564_v53  ;;  %1610 = vmatmul.f32.gmra.mxu1 %v4349_v39  ;;  %v4890_v24 = vpop.f32.mrf.mxu0  ;;  %v5664_v35 = vld [vmem:[#allocation22_spill] sm:$0xff] }
 0x2f2   :  { %v1324_v7 = vpop.f32.mrf.mxu3  ;;  %v1215_v53 = vadd.f32 %v5664_v35, %v4563_v30 }
 0x2f3   :  { %v4883_v27 = vadd.f32 %v1324_v7, %v1212_v3  ;;  %v1948_v46 = vmax.f32 %v1884_v12, 0.0  ;;  %v2030_v3 = vld [vmem:[%s5436_s7 + $0xa0] sm:$0xff] }
 0x2f4   :  { %2170 = vmatpush.msrb.mxu1 %v2030_v3  ;;  %v5665_v7 = vld [vmem:[#allocation40_spill] sm:$0xff] }
 0x2f5   :  { %2065 = vmatmul.f32.gmra.mxu0 %v1948_v46  ;;  %v941_v46 = vadd.f32 %v5665_v7, %v4849_v8  ;;  %v1460_v7 = vadd.f32 %v4657_v43, %v4849_v8 }
 0x2f6   :  { %v1566_v60 = vpop.f32.mrf.mxu1 }
 0x2f7   :  { %v1567_v16 = vadd.f32 %v1566_v60, %v1454_v34  ;;  %1794 = vmatmul.f32.gmra.mxu3 %v4053_v9  ;;  %v1457_v9 = vadd.f32 %v4636_v33, %v4849_v8  ;;  %v5666_v34 = vld [vmem:[#allocation73_spill] sm:$0xff] }
 0x2f8   :  { %v1054_v60 = vadd.f32 %v5666_v34, %v941_v46  ;;  %v5668_v33 = vld [vmem:[#allocation41_spill] sm:$0xff]  ;;  %v5669_v46 = vld [vmem:[#allocation76_spill] sm:$0xff]  ;;  %v5670_v34 = vld [vmem:[#allocation26_spill] sm:$0xff] }
 0x2f9   :  { %v1886_v18 = vmax.f32 %v1051_v54, %v1567_v16  ;;  %1613 = vmatmul.f32.gmra.mxu1 %v4364_v10  ;;  %v5667_v54 = vld [vmem:[#allocation24_spill] sm:$0xff]  ;;  %v4909_v35 = vpop.f32.mrf.mxu0 }
 0x2fa   :  { %v1327_v29 = vpop.f32.mrf.mxu3  ;;  %v1218_v16 = vadd.f32 %v5667_v54, %v4563_v30  ;;  %v2029_v54 = vld [vmem:[%s5436_s7 + $0x98] sm:$0xff] }
 0x2fb   :  { %v4899_v12 = vadd.f32 %v1327_v29, %v1215_v53  ;;  %v1950_v6 = vmax.f32 %v1886_v18, 0.0  ;;  %2171 = vmatpush.msrb.mxu1 %v2029_v54 }
 0x2fd   :  { %2068 = vmatmul.f32.gmra.mxu0 %v1950_v6  ;;  %v944_v6 = vadd.f32 %v5668_v33, %v4849_v8 }
 0x2fe   :  { %v1569_v56 = vpop.f32.mrf.mxu1 }
 0x2ff   :  { %v1570_v47 = vadd.f32 %v1569_v56, %v1457_v9  ;;  %1797 = vmatmul.f32.gmra.mxu3 %v4078_v55  ;;  %v1057_v9 = vadd.f32 %v5669_v46, %v944_v6  ;;  %v1463_v6 = vadd.f32 %v4675_v44, %v4849_v8 }
 0x301   :  { %v1888_v53 = vmax.f32 %v1054_v60, %v1570_v47  ;;  %1616 = vmatmul.f32.gmra.mxu1 %v4379_v41  ;;  %v1221_v60 = vadd.f32 %v5670_v34, %v4563_v30  ;;  %v4926_v43 = vpop.f32.mrf.mxu0 }
 0x302   :  { %v1330_v18 = vpop.f32.mrf.mxu3 }
 0x303   :  { %v4912_v3 = vadd.f32 %v1330_v18, %v1218_v16  ;;  %v1952_v29 = vmax.f32 %v1888_v53, 0.0 }
 0x305   :  { %2071 = vmatmul.f32.gmra.mxu0 %v1952_v29  ;;  %v2309_v29 = vld [vmem:[#allocation10 + $0x28] sm:$0xff] }
 0x306   :  { %v1572_v55 = vpop.f32.mrf.mxu1  ;;  %2423 = vmatpush.msrb.mxu2 %v2309_v29  ;;  %v5674_v29 = vld [vmem:[#allocation43_spill] sm:$0xff] }
 0x307   :  { %v1573_v56 = vadd.f32 %v1572_v55, %v1460_v7  ;;  %1800 = vmatmul.f32.gmra.mxu3 %v4100_v4  ;;  %v5671_v4 = vld [vmem:[#allocation42_spill] sm:$0xff]  ;;  %v5672_v55 = vld [vmem:[#allocation77_spill] sm:$0xff]  ;;  %v950_v44 = vadd.f32 %v5674_v29, %v4849_v8 }
 0x308   :  { %v947_v33 = vadd.f32 %v5671_v4, %v4849_v8 }
 0x309   :  { %v1890_v47 = vmax.f32 %v1057_v9, %v1573_v56  ;;  %1619 = vmatmul.f32.gmra.mxu1 %v4394_v57  ;;  %v5673_v56 = vld [vmem:[#allocation17_spill] sm:$0xff]  ;;  %v4945_v4 = vpop.f32.mrf.mxu0 }
 0x30a   :  { %v1333_v16 = vpop.f32.mrf.mxu3  ;;  %v1060_v46 = vadd.f32 %v5672_v55, %v947_v33  ;;  %v1224_v34 = vadd.f32 %v5673_v56, %v4563_v30  ;;  %v5675_v33 = vld [vmem:[#allocation79_spill] sm:$0xff]  ;;  %v5676_v55 = vld [vmem:[#allocation30_spill] sm:$0xff] }
 0x30b   :  { %v4928_v53 = vadd.f32 %v1333_v16, %v1221_v60  ;;  %v1954_v18 = vmax.f32 %v1890_v47, 0.0  ;;  %v2028_v56 = vld [vmem:[%s5436_s7 + $0x90] sm:$0xff] }
 0x30c   :  { %2172 = vmatpush.msrb.mxu1 %v2028_v56 }
 0x30d   :  { %2074 = vmatmul.f32.gmra.mxu0 %v1954_v18  ;;  %v1466_v18 = vadd.f32 %v4697_v15, %v4849_v8 }
 0x30e   :  { %v1575_v7 = vpop.f32.mrf.mxu1 }
 0x30f   :  { %v1576_v9 = vadd.f32 %v1575_v7, %v1463_v6  ;;  %1803 = vmatmul.f32.gmra.mxu3 %v4121_v63  ;;  %v1063_v6 = vadd.f32 %v5675_v33, %v950_v44  ;;  %v5678_v44 = vld [vmem:[#allocation81_spill] sm:$0xff] }
 0x311   :  { %v1892_v60 = vmax.f32 %v1060_v46, %v1576_v9  ;;  %1622 = vmatmul.f32.gmra.mxu1 %v4409_v38  ;;  %v1227_v46 = vadd.f32 %v5676_v55, %v4563_v30 }
 0x312   :  { %v1336_v47 = vpop.f32.mrf.mxu3 }
 0x313   :  { %v4939_v54 = vadd.f32 %v1336_v47, %v1224_v34  ;;  %v1956_v16 = vmax.f32 %v1892_v60, 0.0  ;;  %v5677_v47 = vld [vmem:[#allocation44_spill] sm:$0xff] }
 0x315   :  { %2077 = vmatmul.f32.gmra.mxu0 %v1956_v16  ;;  %v953_v16 = vadd.f32 %v5677_v47, %v4849_v8 }
 0x316   :  { %v1578_v63 = vpop.f32.mrf.mxu1 }
 0x317   :  { %v1579_v7 = vadd.f32 %v1578_v63, %v1466_v18  ;;  %1806 = vmatmul.f32.gmra.mxu3 %v4140_v5  ;;  %v1469_v5 = vadd.f32 %v4714_v48, %v4849_v8  ;;  %v1066_v18 = vadd.f32 %v5678_v44, %v953_v16  ;;  %v4962_v63 = vpop.f32.mrf.mxu0  ;;  %v5680_v48 = vld [vmem:[#allocation45_spill] sm:$0xff]  ;;  %v5681_v16 = vld [vmem:[#allocation82_spill] sm:$0xff] }
 0x319   :  { %v1894_v9 = vmax.f32 %v1063_v6, %v1579_v7  ;;  %1625 = vmatmul.f32.gmra.mxu1 %v4422_v50  ;;  %v5679_v6 = vld [vmem:[#allocation31_spill] sm:$0xff] }
 0x31a   :  { %v1339_v15 = vpop.f32.mrf.mxu3  ;;  %v1230_v7 = vadd.f32 %v5679_v6, %v4563_v30  ;;  %v2027_v6 = vld [vmem:[%s5436_s7 + $0x88] sm:$0xff] }
 0x31b   :  { %v4955_v34 = vadd.f32 %v1339_v15, %v1227_v46  ;;  %v1958_v60 = vmax.f32 %v1894_v9, 0.0  ;;  %v956_v15 = vadd.f32 %v5680_v48, %v4849_v8  ;;  %2173 = vmatpush.msrb.mxu1 %v2027_v6  ;;  %v1475_v48 = vadd.f32 %v4759_v0, %v4849_v8  ;;  %v5686_v0 = vld [vmem:[#allocation49_spill] sm:$0xff] }
 0x31d   :  { %2080 = vmatmul.f32.gmra.mxu0 %v1958_v60  ;;  %v1472_v60 = vadd.f32 %v4738_v61, %v4849_v8 }
 0x31e   :  { %v1581_v29 = vpop.f32.mrf.mxu1 }
 0x31f   :  { %v1582_v33 = vadd.f32 %v1581_v29, %v1469_v5  ;;  %1809 = vmatmul.f32.gmra.mxu3 %v4166_v40  ;;  %v1069_v40 = vadd.f32 %v5681_v16, %v956_v15  ;;  %v5682_v29 = vld [vmem:[#allocation32_spill] sm:$0xff] }
 0x320   :  { %v1233_v44 = vadd.f32 %v5682_v29, %v4563_v30 }
 0x321   :  { %v1896_v55 = vmax.f32 %v1066_v18, %v1582_v33  ;;  %1628 = vmatmul.f32.gmra.mxu1 %v4437_v62  ;;  %v4978_v18 = vpop.f32.mrf.mxu0 }
 0x322   :  { %v1342_v46 = vpop.f32.mrf.mxu3 }
 0x323   :  { %v4968_v9 = vadd.f32 %v1342_v46, %v1230_v7  ;;  %v1960_v56 = vmax.f32 %v1896_v55, 0.0  ;;  %v2308_v46 = vld [vmem:[#allocation10 + $0x20] sm:$0xff] }
 0x324   :  { %2424 = vmatpush.msrb.mxu2 %v2308_v46  ;;  %v1478_v46 = vadd.f32 %v4784_v25, %v4849_v8 }
 0x325   :  { %2083 = vmatmul.f32.gmra.mxu0 %v1960_v56 }
 0x326   :  { %v1584_v47 = vpop.f32.mrf.mxu1 }
 0x327   :  { %v1585_v5 = vadd.f32 %v1584_v47, %v1472_v60  ;;  %1812 = vmatmul.f32.gmra.mxu3 %v4189_v20  ;;  %v5683_v20 = vld [vmem:[#allocation47_spill] sm:$0xff] }
 0x328   :  { %v959_v56 = vadd.f32 %v5683_v20, %v4849_v8  ;;  %v5684_v60 = vld [vmem:[#allocation83_spill] sm:$0xff]  ;;  %v5687_v20 = vld [vmem:[#allocation18_spill] sm:$0xff] }
 0x329   :  { %v1898_v33 = vmax.f32 %v1069_v40, %v1585_v5  ;;  %1631 = vmatmul.f32.gmra.mxu1 %v4452_v21  ;;  %v5685_v40 = vld [vmem:[#allocation33_spill] sm:$0xff] }
 0x32a   :  { %v1345_v61 = vpop.f32.mrf.mxu3  ;;  %v1072_v47 = vadd.f32 %v5684_v60, %v959_v56  ;;  %v1236_v5 = vadd.f32 %v5685_v40, %v4563_v30 }
 0x32b   :  { %v4984_v7 = vadd.f32 %v1345_v61, %v1233_v44  ;;  %v1962_v55 = vmax.f32 %v1898_v33, 0.0  ;;  %v4995_v33 = vpop.f32.mrf.mxu0 }
 0x32d   :  { %2086 = vmatmul.f32.gmra.mxu0 %v1962_v55  ;;  %v962_v55 = vadd.f32 %v5686_v0, %v4849_v8 }
 0x32e   :  { %v1587_v15 = vpop.f32.mrf.mxu1 }
 0x32f   :  { %v1588_v16 = vadd.f32 %v1587_v15, %v1475_v48  ;;  %1815 = vmatmul.f32.gmra.mxu3 %v4215_v14  ;;  %v1075_v56 = vadd.f32 %v5687_v20, %v962_v55  ;;  %v1239_v15 = vadd.f32 %v4568_v51, %v4563_v30 }
 0x331   :  { %v1900_v29 = vmax.f32 %v1072_v47, %v1588_v16  ;;  %1634 = vmatmul.f32.gmra.mxu1 %v4467_v45  ;;  %v2026_v47 = vld [vmem:[%s5436_s7 + $0x80] sm:$0xff] }
 0x332   :  { %v1348_v44 = vpop.f32.mrf.mxu3  ;;  %2174 = vmatpush.msrb.mxu1 %v2026_v47 }
 0x333   :  { %v4997_v6 = vadd.f32 %v1348_v44, %v1236_v5  ;;  %v1964_v61 = vmax.f32 %v1900_v29, 0.0  ;;  %v5688_v5 = vld [vmem:[#allocation51_spill] sm:$0xff]  ;;  %v5017_v44 = vpop.f32.mrf.mxu0 }
 0x334   :  { %v965_v29 = vadd.f32 %v5688_v5, %v4849_v8  ;;  %v1245_v5 = vadd.f32 %v4609_v19, %v4563_v30 }
 0x335   :  { %2089 = vmatmul.f32.gmra.mxu0 %v1964_v61  ;;  %v5689_v61 = vld [vmem:[#allocation84_spill] sm:$0xff] }
 0x336   :  { %v1590_v14 = vpop.f32.mrf.mxu1  ;;  %v1078_v0 = vadd.f32 %v5689_v61, %v965_v29 }
 0x337   :  { %v1591_v48 = vadd.f32 %v1590_v14, %v1478_v46  ;;  %1818 = vmatmul.f32.gmra.mxu3 %v4236_v23  ;;  %v1481_v23 = vadd.f32 %v4816_v1, %v4849_v8  ;;  %v1242_v46 = vadd.f32 %v4591_v37, %v4563_v30  ;;  %v5690_v1 = vld [vmem:[#allocation54_spill] sm:$0xff] }
 0x339   :  { %v1902_v60 = vmax.f32 %v1075_v56, %v1591_v48  ;;  %1637 = vmatmul.f32.gmra.mxu1 %v4482_v28 }
 0x33a   :  { %v1351_v16 = vpop.f32.mrf.mxu3 }
 0x33b   :  { %v5011_v25 = vadd.f32 %v1351_v16, %v1239_v15  ;;  %v1966_v40 = vmax.f32 %v1902_v60, 0.0  ;;  %v968_v15 = vadd.f32 %v5690_v1, %v4849_v8  ;;  %v1484_v60 = vadd.f32 %v4837_v17, %v4849_v8  ;;  %v5691_v16 = vld [vmem:[#allocation85_spill] sm:$0xff]  ;;  %v5692_v17 = vld [vmem:[#allocation55_spill] sm:$0xff] }
 0x33d   :  { %2092 = vmatmul.f32.gmra.mxu0 %v1966_v40  ;;  %v5031_v40 = vpop.f32.mrf.mxu0 }
 0x33e   :  { %v1593_v51 = vpop.f32.mrf.mxu1 }
 0x33f   :  { %v1594_v55 = vadd.f32 %v1593_v51, %v1481_v23  ;;  %1821 = vmatmul.f32.gmra.mxu3 %v4257_v49  ;;  %v1081_v49 = vadd.f32 %v5691_v16, %v968_v15  ;;  %v5694_v16 = vld [vmem:[#allocation56_spill] sm:$0xff] }
 0x341   :  { %v1904_v14 = vmax.f32 %v1078_v0, %v1594_v55  ;;  %1640 = vmatmul.f32.gmra.mxu1 %v4495_v59  ;;  %v971_v0 = vadd.f32 %v5692_v17, %v4849_v8  ;;  %v1487_v55 = vadd.f32 %v4854_v13, %v4849_v8 }
 0x342   :  { %v1354_v20 = vpop.f32.mrf.mxu3 }
 0x343   :  { %v5024_v56 = vadd.f32 %v1354_v20, %v1242_v46  ;;  %v1968_v48 = vmax.f32 %v1904_v14, 0.0  ;;  %v2307_v46 = vld [vmem:[#allocation10 + $0x18] sm:$0xff] }
 0x344   :  { %2425 = vmatpush.msrb.mxu2 %v2307_v46 }
 0x345   :  { %2095 = vmatmul.f32.gmra.mxu0 %v1968_v48  ;;  %v1248_v48 = vadd.f32 %v4631_v58, %v4563_v30  ;;  %v5047_v1 = vpop.f32.mrf.mxu0 }
 0x346   :  { %v1596_v47 = vpop.f32.mrf.mxu1 }
 0x347   :  { %v1597_v37 = vadd.f32 %v1596_v47, %v1484_v60  ;;  %1824 = vmatmul.f32.gmra.mxu3 %v5643_v26  ;;  %v5693_v26 = vld [vmem:[#allocation86_spill] sm:$0xff] }
 0x348   :  { %v1084_v20 = vadd.f32 %v5693_v26, %v971_v0  ;;  %v1493_v26 = vadd.f32 %v4890_v24, %v4849_v8  ;;  %v1496_v24 = vadd.f32 %v4909_v35, %v4849_v8 }
 0x349   :  { %v1906_v29 = vmax.f32 %v1081_v49, %v1597_v37  ;;  %1643 = vmatmul.f32.gmra.mxu1 %v4510_v36  ;;  %v974_v49 = vadd.f32 %v5694_v16, %v4849_v8  ;;  %v1490_v37 = vadd.f32 %v4876_v32, %v4849_v8  ;;  %v5696_v32 = vld [vmem:[#allocation58_spill] sm:$0xff] }
 0x34a   :  { %v1357_v23 = vpop.f32.mrf.mxu3 }
 0x34b   :  { %v5037_v51 = vadd.f32 %v1357_v23, %v1245_v5  ;;  %v1970_v61 = vmax.f32 %v1906_v29, 0.0  ;;  %v5695_v5 = vld [vmem:[#allocation25_spill] sm:$0xff]  ;;  %v1251_v23 = vadd.f32 %v4648_v22, %v4563_v30 }
 0x34c   :  { %v1087_v29 = vadd.f32 %v5695_v5, %v974_v49 }
 0x34d   :  { %2098 = vmatmul.f32.gmra.mxu0 %v1970_v61  ;;  %v5061_v0 = vpop.f32.mrf.mxu0 }
 0x34e   :  { %v1599_v14 = vpop.f32.mrf.mxu1 }
 0x34f   :  { %v1600_v19 = vadd.f32 %v1599_v14, %v1487_v55  ;;  %1827 = vmatmul.f32.gmra.mxu3 %v5649_v11  ;;  %v977_v14 = vadd.f32 %v5696_v32, %v4849_v8 }
 0x351   :  { %v1908_v15 = vmax.f32 %v1084_v20, %v1600_v19  ;;  %1646 = vmatmul.f32.gmra.mxu1 %v4531_v52  ;;  %v5697_v20 = vld [vmem:[#allocation27_spill] sm:$0xff] }
 0x352   :  { %v1360_v60 = vpop.f32.mrf.mxu3  ;;  %v1090_v19 = vadd.f32 %v5697_v20, %v977_v14  ;;  %v5703_v14 = vld [vmem:[#allocation101_spill] sm:$0xff] }
 0x353   :  { %v5050_v47 = vadd.f32 %v1360_v60, %v1248_v48  ;;  %v1972_v13 = vmax.f32 %v1908_v15, 0.0  ;;  %v5698_v48 = vld [vmem:[#allocation98_spill] sm:$0xff] }
 0x354   :  { %v1674_v15 = vadd.f32 %v5698_v48, %v4563_v30 }
 0x355   :  { %2101 = vmatmul.f32.gmra.mxu0 %v1972_v13  ;;  %v5699_v13 = vld [vmem:[#allocation35_spill] sm:$0xff] }
 0x356   :  { %v1602_v11 = vpop.f32.mrf.mxu1 }
 0x357   :  { %v1603_v58 = vadd.f32 %v1602_v11, %v1490_v37  ;;  %1830 = vmatmul.f32.gmra.mxu3 %v5653_v2  ;;  %v5700_v11 = vld [vmem:[#allocation61_spill] sm:$0xff] }
 0x358   :  { %v980_v5 = vadd.f32 %v5700_v11, %v4849_v8 }
 0x359   :  { %v1910_v61 = vmax.f32 %v1087_v29, %v1603_v58  ;;  %1649 = vmatmul.f32.gmra.mxu1 %v4544_v31  ;;  %v5078_v29 = vpop.f32.mrf.mxu0  ;;  %v5701_v58 = vld [vmem:[#allocation87_spill] sm:$0xff] }
 0x35a   :  { %v1363_v17 = vpop.f32.mrf.mxu3 }
 0x35b   :  { %v5063_v55 = vadd.f32 %v1363_v17, %v1251_v23  ;;  %v1974_v46 = vmax.f32 %v1910_v61, 0.0  ;;  %v5702_v61 = vld [vmem:[#allocation88_spill] sm:$0xff] }
 0x35c   :  { %v1093_v17 = vadd.f32 %v5702_v61, %v980_v5 }
 0x35d   :  { %2104 = vmatmul.f32.gmra.mxu0 %v1974_v46 }
 0x35e   :  { %v1605_v2 = vpop.f32.mrf.mxu1 }
 0x35f   :  { %v1606_v22 = vadd.f32 %v1605_v2, %v1493_v26  ;;  %1833 = vmatmul.f32.gmra.mxu3 %v4336_v42  ;;  %v1677_v26 = vadd.f32 %v5703_v14, %v4563_v30  ;;  %v5708_v14 = vld [vmem:[#allocation66_spill] sm:$0xff] }
 0x361   :  { %v1912_v60 = vmax.f32 %v1090_v19, %v1606_v22  ;;  %1652 = vmatmul.f32.gmra.mxu1 %v5699_v13  ;;  %v5704_v22 = vld [vmem:[#allocation63_spill] sm:$0xff]  ;;  %v5091_v5 = vpop.f32.mrf.mxu0 }
 0x362   :  { %v1786_v16 = vpop.f32.mrf.mxu3  ;;  %v983_v48 = vadd.f32 %v5704_v22, %v4849_v8 }
 0x363   :  { %v1787_v49 = vadd.f32 %v1786_v16, %v1674_v15  ;;  %v1976_v37 = vmax.f32 %v1912_v60, 0.0  ;;  %v1499_v15 = vadd.f32 %v4926_v43, %v4849_v8  ;;  %v5705_v60 = vld [vmem:[#allocation37_spill] sm:$0xff] }
 0x365   :  { %v1883_v23 = vmax.f32 %v5701_v58, %v1787_v49  ;;  %2107 = vmatmul.f32.gmra.mxu0 %v1976_v37  ;;  %v2306_v49 = vld [vmem:[#allocation10 + $0x10] sm:$0xff] }
 0x366   :  { %v1608_v42 = vpop.f32.mrf.mxu1  ;;  %2426 = vmatpush.msrb.mxu2 %v2306_v49 }
 0x367   :  { %v1947_v46 = vmax.f32 %v1883_v23, 0.0  ;;  %v1609_v32 = vadd.f32 %v1608_v42, %v1496_v24  ;;  %1836 = vmatmul.f32.gmra.mxu3 %v4349_v39  ;;  %v5706_v39 = vld [vmem:[#allocation89_spill] sm:$0xff]  ;;  %v5094_v23 = vpop.f32.mrf.mxu2  ;;  %v5707_v42 = vld [vmem:[#allocation104_spill] sm:$0xff] }
 0x368   :  { %v1096_v11 = vadd.f32 %v5706_v39, %v983_v48  ;;  %v1680_v61 = vadd.f32 %v5707_v42, %v4563_v30 }
 0x369   :  { %v1914_v2 = vmax.f32 %v1093_v17, %v1609_v32  ;;  %2175 = vmatmul.f32.vlgmr.msrb.gmra.mxu1 %v1947_v46  ;;  %v5107_v49 = vpop.f32.mrf.mxu0 }
 0x36a   :  { %v1789_v20 = vpop.f32.mrf.mxu3 }
 0x36b   :  { %v1790_v19 = vadd.f32 %v1789_v20, %v1677_v26  ;;  %v1978_v35 = vmax.f32 %v1914_v2, 0.0  ;;  %v986_v26 = vadd.f32 %v5708_v14, %v4849_v8  ;;  %v1502_v2 = vadd.f32 %v4945_v4, %v4849_v8  ;;  %v5709_v20 = vld [vmem:[#allocation90_spill] sm:$0xff] }
 0x36d   :  { %v1885_v16 = vmax.f32 %v5705_v60, %v1790_v19  ;;  %2110 = vmatmul.f32.gmra.mxu0 %v1978_v35  ;;  %v5710_v35 = vld [vmem:[#allocation91_spill] sm:$0xff]  ;;  %v5711_v60 = vld [vmem:[#allocation50_spill] sm:$0xff] }
 0x36e   :  { %v1611_v37 = vpop.f32.mrf.mxu1  ;;  %v1099_v22 = vadd.f32 %v5710_v35, %v986_v26 }
 0x36f   :  { %v1612_v24 = vadd.f32 %v1611_v37, %v1499_v15  ;;  %1839 = vmatmul.f32.gmra.mxu3 %v4364_v10  ;;  %v1949_v58 = vmax.f32 %v1885_v16, 0.0  ;;  %v1683_v16 = vadd.f32 %v5711_v60, %v4563_v30  ;;  %v5109_v39 = vpop.f32.mrf.mxu2 }
 0x371   :  { %v1916_v43 = vmax.f32 %v1096_v11, %v1612_v24  ;;  %2178 = vmatmul.f32.gmra.mxu1 %v1949_v58  ;;  %v5712_v58 = vld [vmem:[#allocation69_spill] sm:$0xff]  ;;  %v5120_v35 = vpop.f32.mrf.mxu0 }
 0x372   :  { %v1792_v17 = vpop.f32.mrf.mxu3  ;;  %v989_v42 = vadd.f32 %v5712_v58, %v4849_v8 }
 0x373   :  { %v1793_v46 = vadd.f32 %v1792_v17, %v1680_v61  ;;  %v1980_v32 = vmax.f32 %v1916_v43, 0.0  ;;  %v1505_v61 = vadd.f32 %v4962_v63, %v4849_v8 }
 0x375   :  { %v1887_v19 = vmax.f32 %v5709_v20, %v1793_v46  ;;  %2113 = vmatmul.f32.gmra.mxu0 %v1980_v32  ;;  %v5714_v46 = vld [vmem:[#allocation93_spill] sm:$0xff] }
 0x376   :  { %v1614_v10 = vpop.f32.mrf.mxu1  ;;  %v1102_v32 = vadd.f32 %v5714_v46, %v989_v42 }
 0x377   :  { %v1615_v48 = vadd.f32 %v1614_v10, %v1502_v2  ;;  %1842 = vmatmul.f32.gmra.mxu3 %v4379_v41  ;;  %v1951_v15 = vmax.f32 %v1887_v19, 0.0  ;;  %v5713_v41 = vld [vmem:[#allocation92_spill] sm:$0xff] }
 0x378   :  { %v5715_v2 = vld [vmem:[#allocation52_spill] sm:$0xff] }
 0x379   :  { %v1918_v37 = vmax.f32 %v1099_v22, %v1615_v48  ;;  %2181 = vmatmul.f32.gmra.mxu1 %v1951_v15  ;;  %v1686_v20 = vadd.f32 %v5715_v2, %v4563_v30  ;;  %v5122_v48 = vpop.f32.mrf.mxu2  ;;  %v5716_v15 = vld [vmem:[#allocation72_spill] sm:$0xff]  ;;  %v5137_v2 = vpop.f32.mrf.mxu0 }
 0x37a   :  { %v1795_v4 = vpop.f32.mrf.mxu3  ;;  %v992_v60 = vadd.f32 %v5716_v15, %v4849_v8 }
 0x37b   :  { %v1796_v11 = vadd.f32 %v1795_v4, %v1683_v16  ;;  %v1982_v24 = vmax.f32 %v1918_v37, 0.0  ;;  %v1508_v16 = vadd.f32 %v4978_v18, %v4849_v8  ;;  %v5720_v18 = vld [vmem:[#allocation74_spill] sm:$0xff] }
 0x37d   :  { %v1889_v43 = vmax.f32 %v5713_v41, %v1796_v11  ;;  %2116 = vmatmul.f32.gmra.mxu0 %v1982_v24  ;;  %v5718_v11 = vld [vmem:[#allocation95_spill] sm:$0xff] }
 0x37e   :  { %v1617_v17 = vpop.f32.mrf.mxu1  ;;  %v1105_v24 = vadd.f32 %v5718_v11, %v992_v60 }
 0x37f   :  { %v1618_v14 = vadd.f32 %v1617_v17, %v1505_v61  ;;  %1845 = vmatmul.f32.gmra.mxu3 %v4394_v57  ;;  %v1953_v26 = vmax.f32 %v1889_v43, 0.0  ;;  %v5717_v57 = vld [vmem:[#allocation94_spill] sm:$0xff] }
 0x380   :  { %v5719_v61 = vld [vmem:[#allocation110_spill] sm:$0xff] }
 0x381   :  { %v1920_v19 = vmax.f32 %v1102_v32, %v1618_v14  ;;  %2184 = vmatmul.f32.gmra.mxu1 %v1953_v26  ;;  %v1689_v41 = vadd.f32 %v5719_v61, %v4563_v30  ;;  %v995_v14 = vadd.f32 %v5720_v18, %v4849_v8  ;;  %v1511_v26 = vadd.f32 %v4995_v33, %v4849_v8 }
 0x382   :  { %v1798_v10 = vpop.f32.mrf.mxu3  ;;  %v1514_v61 = vadd.f32 %v5017_v44, %v4849_v8 }
 0x383   :  { %v1799_v22 = vadd.f32 %v1798_v10, %v1686_v20  ;;  %v1984_v63 = vmax.f32 %v1920_v19, 0.0  ;;  %v5721_v20 = vld [vmem:[#allocation96_spill] sm:$0xff] }
 0x385   :  { %v1891_v37 = vmax.f32 %v5717_v57, %v1799_v22  ;;  %2119 = vmatmul.f32.gmra.mxu0 %v1984_v63  ;;  %v5722_v22 = vld [vmem:[#allocation97_spill] sm:$0xff]  ;;  %v5723_v57 = vld [vmem:[#allocation114_spill] sm:$0xff] }
 0x386   :  { %v1620_v4 = vpop.f32.mrf.mxu1  ;;  %v1108_v63 = vadd.f32 %v5722_v22, %v995_v14 }
 0x387   :  { %v1621_v58 = vadd.f32 %v1620_v4, %v1508_v16  ;;  %1848 = vmatmul.f32.gmra.mxu3 %v4409_v38  ;;  %v1955_v42 = vmax.f32 %v1891_v37, 0.0  ;;  %v5140_v38 = vpop.f32.mrf.mxu2  ;;  %v2305_v16 = vld [vmem:[#allocation10 + $0x8] sm:$0xff]  ;;  %v1692_v37 = vadd.f32 %v5723_v57, %v4563_v30  ;;  %v5729_v57 = vld [vmem:[#allocation102_spill] sm:$0xff] }
 0x388   :  { %2427 = vmatpush.msrb.mxu2 %v2305_v16  ;;  %v1517_v16 = vadd.f32 %v5031_v40, %v4849_v8 }
 0x389   :  { %v1922_v43 = vmax.f32 %v1105_v24, %v1621_v58  ;;  %2187 = vmatmul.f32.gmra.mxu1 %v1955_v42  ;;  %v5724_v58 = vld [vmem:[#allocation20_spill] sm:$0xff] }
 0x38a   :  { %v1801_v17 = vpop.f32.mrf.mxu3  ;;  %v998_v42 = vadd.f32 %v5724_v58, %v4849_v8 }
 0x38b   :  { %v1802_v46 = vadd.f32 %v1801_v17, %v1689_v41  ;;  %v1986_v32 = vmax.f32 %v1922_v43, 0.0  ;;  %v5725_v41 = vld [vmem:[#allocation99_spill] sm:$0xff]  ;;  %v5726_v17 = vld [vmem:[#allocation100_spill] sm:$0xff] }
 0x38d   :  { %v1893_v19 = vmax.f32 %v5721_v20, %v1802_v46  ;;  %2122 = vmatmul.f32.gmra.mxu0 %v1986_v32  ;;  %v1111_v46 = vadd.f32 %v5726_v17, %v998_v42  ;;  %v5152_v32 = vpop.f32.mrf.mxu0  ;;  %v5727_v20 = vld [vmem:[#allocation59_spill] sm:$0xff]  ;;  %v1698_v42 = vadd.f32 %v5094_v23, %v4563_v30  ;;  %v5731_v17 = vld [vmem:[#allocation80_spill] sm:$0xff] }
 0x38e   :  { %v1623_v10 = vpop.f32.mrf.mxu1 }
 0x38f   :  { %v1624_v15 = vadd.f32 %v1623_v10, %v1511_v26  ;;  %1851 = vmatmul.f32.gmra.mxu3 %v4422_v50  ;;  %v1957_v60 = vmax.f32 %v1893_v19, 0.0  ;;  %v5155_v26 = vpop.f32.mrf.mxu2  ;;  %v1695_v19 = vadd.f32 %v5727_v20, %v4563_v30 }
 0x391   :  { %v1924_v33 = vmax.f32 %v1108_v63, %v1624_v15  ;;  %2190 = vmatmul.f32.gmra.mxu1 %v1957_v60  ;;  %v5728_v15 = vld [vmem:[#allocation78_spill] sm:$0xff] }
 0x392   :  { %v1804_v4 = vpop.f32.mrf.mxu3  ;;  %v1001_v60 = vadd.f32 %v5728_v15, %v4849_v8 }
 0x393   :  { %v1805_v11 = vadd.f32 %v1804_v4, %v1692_v37  ;;  %v1988_v24 = vmax.f32 %v1924_v33, 0.0  ;;  %v5730_v33 = vld [vmem:[#allocation103_spill] sm:$0xff] }
 0x394   :  { %v1114_v4 = vadd.f32 %v5730_v33, %v1001_v60  ;;  %v1523_v33 = vadd.f32 %v5061_v0, %v4849_v8 }
 0x395   :  { %v1895_v43 = vmax.f32 %v5725_v41, %v1805_v11  ;;  %2125 = vmatmul.f32.gmra.mxu0 %v1988_v24  ;;  %v5165_v11 = vpop.f32.mrf.mxu0 }
 0x396   :  { %v1626_v50 = vpop.f32.mrf.mxu1 }
 0x397   :  { %v1627_v18 = vadd.f32 %v1626_v50, %v1514_v61  ;;  %1854 = vmatmul.f32.gmra.mxu3 %v4437_v62  ;;  %v1959_v14 = vmax.f32 %v1895_v43, 0.0  ;;  %v5170_v41 = vpop.f32.mrf.mxu2 }
 0x399   :  { %v1926_v10 = vmax.f32 %v1111_v46, %v1627_v18  ;;  %2193 = vmatmul.f32.gmra.mxu1 %v1959_v14  ;;  %v1004_v46 = vadd.f32 %v5731_v17, %v4849_v8  ;;  %v1520_v18 = vadd.f32 %v5047_v1, %v4849_v8  ;;  %v5732_v14 = vld [vmem:[#allocation46_spill] sm:$0xff] }
 0x39a   :  { %v1807_v44 = vpop.f32.mrf.mxu3 }
 0x39b   :  { %v1808_v22 = vadd.f32 %v1807_v44, %v1695_v19  ;;  %v1990_v63 = vmax.f32 %v1926_v10, 0.0  ;;  %v5733_v19 = vld [vmem:[#allocation105_spill] sm:$0xff] }
 0x39c   :  { %v1117_v10 = vadd.f32 %v5733_v19, %v1004_v46  ;;  %v5738_v19 = vld [vmem:[#allocation53_spill] sm:$0xff] }
 0x39d   :  { %v1897_v37 = vmax.f32 %v5729_v57, %v1808_v22  ;;  %2128 = vmatmul.f32.gmra.mxu0 %v1990_v63  ;;  %v1701_v22 = vadd.f32 %v5109_v39, %v4563_v30  ;;  %v5181_v63 = vpop.f32.mrf.mxu0  ;;  %v5736_v39 = vld [vmem:[#allocation106_spill] sm:$0xff] }
 0x39e   :  { %v1629_v62 = vpop.f32.mrf.mxu1 }
 0x39f   :  { %v1630_v24 = vadd.f32 %v1629_v62, %v1517_v16  ;;  %1857 = vmatmul.f32.gmra.mxu3 %v4452_v21  ;;  %v1961_v58 = vmax.f32 %v1897_v37, 0.0  ;;  %v5183_v57 = vpop.f32.mrf.mxu2  ;;  %v5734_v37 = vld [vmem:[#allocation16_spill] sm:$0xff] }
 0x3a0   :  { %v1007_v62 = vadd.f32 %v5734_v37, %v4849_v8 }
 0x3a1   :  { %v1928_v61 = vmax.f32 %v1114_v4, %v1630_v24  ;;  %2196 = vmatmul.f32.gmra.mxu1 %v1961_v58  ;;  %v5735_v4 = vld [vmem:[#allocation48_spill] sm:$0xff] }
 0x3a2   :  { %v1810_v40 = vpop.f32.mrf.mxu3  ;;  %v1120_v58 = vadd.f32 %v5736_v39, %v1007_v62  ;;  %v5740_v62 = vld [vmem:[#allocation29_spill] sm:$0xff] }
 0x3a3   :  { %v1811_v43 = vadd.f32 %v1810_v40, %v1698_v42  ;;  %v1992_v50 = vmax.f32 %v1928_v61, 0.0  ;;  %v2304_v40 = vld [vmem:[#allocation10] sm:$0xff] }
 0x3a4   :  { %2428 = vmatpush.msrb.mxu2 %v2304_v40 }
 0x3a5   :  { %v1899_v20 = vmax.f32 %v5732_v14, %v1811_v43  ;;  %2131 = vmatmul.f32.gmra.mxu0 %v1992_v50  ;;  %v1704_v43 = vadd.f32 %v5122_v48, %v4563_v30  ;;  %v5194_v46 = vpop.f32.mrf.mxu0  ;;  %v5737_v14 = vld [vmem:[#allocation28_spill] sm:$0xff]  ;;  %v5739_v48 = vld [vmem:[#allocation107_spill] sm:$0xff] }
 0x3a6   :  { %v1632_v21 = vpop.f32.mrf.mxu1 }
 0x3a7   :  { %v1963_v23 = vmax.f32 %v1899_v20, 0.0  ;;  %v1633_v44 = vadd.f32 %v1632_v21, %v1520_v18  ;;  %1860 = vmatmul.f32.gmra.mxu3 %v4467_v45  ;;  %v1010_v20 = vadd.f32 %v5737_v14, %v4849_v8  ;;  %v1526_v21 = vadd.f32 %v5078_v29, %v4849_v8 }
 0x3a9   :  { %v1930_v15 = vmax.f32 %v1117_v10, %v1633_v44  ;;  %2199 = vmatmul.f32.gmra.mxu1 %v1963_v23  ;;  %v5201_v10 = vpop.f32.mrf.mxu2  ;;  %v1123_v44 = vadd.f32 %v5739_v48, %v1010_v20  ;;  %v1532_v20 = vadd.f32 %v5107_v49, %v4849_v8 }
 0x3aa   :  { %v1813_v60 = vpop.f32.mrf.mxu3 }
 0x3ab   :  { %v1814_v16 = vadd.f32 %v1813_v60, %v1701_v22  ;;  %v1994_v1 = vmax.f32 %v1930_v15, 0.0  ;;  %v1707_v60 = vadd.f32 %v5140_v38, %v4563_v30 }
 0x3ad   :  { %v1901_v45 = vmax.f32 %v5735_v4, %v1814_v16  ;;  %2134 = vmatmul.f32.gmra.mxu0 %v1994_v1  ;;  %v1529_v4 = vadd.f32 %v5091_v5, %v4849_v8 }
 0x3ae   :  { %v1635_v24 = vpop.f32.mrf.mxu1 }
 0x3af   :  { %v1965_v42 = vmax.f32 %v1901_v45, 0.0  ;;  %v1636_v61 = vadd.f32 %v1635_v24, %v1523_v33  ;;  %1863 = vmatmul.f32.gmra.mxu3 %v4482_v28  ;;  %v1013_v33 = vadd.f32 %v5740_v62, %v4849_v8  ;;  %v5211_v45 = vpop.f32.mrf.mxu0  ;;  %v5741_v24 = vld [vmem:[#allocation108_spill] sm:$0xff]  ;;  %v1535_v62 = vadd.f32 %v5120_v35, %v4849_v8 }
 0x3b1   :  { %v1932_v50 = vmax.f32 %v1120_v58, %v1636_v61  ;;  %2202 = vmatmul.f32.gmra.mxu1 %v1965_v42  ;;  %v5742_v58 = vld [vmem:[#allocation109_spill] sm:$0xff]  ;;  %v5216_v40 = vpop.f32.mrf.mxu2 }
 0x3b2   :  { %v1816_v17 = vpop.f32.mrf.mxu3  ;;  %v1126_v42 = vadd.f32 %v5742_v58, %v1013_v33  ;;  %v5747_v33 = vld [vmem:[#allocation113_spill] sm:$0xff]  ;;  %v1716_v58 = vadd.f32 %v5183_v57, %v4563_v30 }
 0x3b3   :  { %v1817_v0 = vadd.f32 %v1816_v17, %v1704_v43  ;;  %v1996_v18 = vmax.f32 %v1932_v50, 0.0  ;;  %v1710_v43 = vadd.f32 %v5155_v26, %v4563_v30 }
 0x3b5   :  { %v1903_v28 = vmax.f32 %v5738_v19, %v1817_v0  ;;  %2137 = vmatmul.f32.gmra.mxu0 %v1996_v18  ;;  %v5743_v18 = vld [vmem:[#allocation19_spill] sm:$0xff] }
 0x3b6   :  { %v1638_v23 = vpop.f32.mrf.mxu1  ;;  %v1016_v14 = vadd.f32 %v5743_v18, %v4849_v8  ;;  %v5750_v18 = vld [vmem:[#allocation57_spill] sm:$0xff] }
 0x3b7   :  { %v1967_v22 = vmax.f32 %v1903_v28, 0.0  ;;  %v1639_v15 = vadd.f32 %v1638_v23, %v1526_v21  ;;  %1866 = vmatmul.f32.gmra.mxu3 %v4495_v59  ;;  %v5744_v21 = vld [vmem:[#allocation111_spill] sm:$0xff]  ;;  %v5745_v28 = vld [vmem:[#allocation112_spill] sm:$0xff]  ;;  %v5226_v48 = vpop.f32.mrf.mxu0 }
 0x3b8   :  { %v1129_v23 = vadd.f32 %v5745_v28, %v1016_v14 }
 0x3b9   :  { %v1934_v16 = vmax.f32 %v1123_v44, %v1639_v15  ;;  %2205 = vmatmul.f32.gmra.mxu1 %v1967_v22  ;;  %v1713_v22 = vadd.f32 %v5170_v41, %v4563_v30 }
 0x3ba   :  { %v1819_v1 = vpop.f32.mrf.mxu3 }
 0x3bb   :  { %v1820_v37 = vadd.f32 %v1819_v1, %v1707_v60  ;;  %v1998_v29 = vmax.f32 %v1934_v16, 0.0  ;;  %v1724_v60 = vpop.f32.mrf.mxu2 }
 0x3bd   :  { %v1905_v39 = vmax.f32 %v5741_v24, %v1820_v37  ;;  %2140 = vmatmul.f32.gmra.mxu0 %v1998_v29  ;;  %v5746_v37 = vld [vmem:[#allocation21_spill] sm:$0xff] }
 0x3be   :  { %v1641_v59 = vpop.f32.mrf.mxu1  ;;  %v1019_v29 = vadd.f32 %v5746_v37, %v4849_v8 }
 0x3bf   :  { %v1969_v38 = vmax.f32 %v1905_v39, 0.0  ;;  %v1642_v61 = vadd.f32 %v1641_v59, %v1529_v4  ;;  %1869 = vmatmul.f32.gmra.mxu3 %v4510_v36 }
 0x3c1   :  { %v1936_v50 = vmax.f32 %v1126_v42, %v1642_v61  ;;  %2208 = vmatmul.f32.gmra.mxu1 %v1969_v38  ;;  %v5240_v42 = vpop.f32.mrf.mxu0 }
 0x3c2   :  { %v1822_v5 = vpop.f32.mrf.mxu3 }
 0x3c3   :  { %v1823_v17 = vadd.f32 %v1822_v5, %v1710_v43  ;;  %v2000_v0 = vmax.f32 %v1936_v50, 0.0  ;;  %v1727_v50 = vpop.f32.mrf.mxu2  ;;  %v5749_v5 = vld [vmem:[#allocation23_spill] sm:$0xff] }
 0x3c5   :  { %v1907_v19 = vmax.f32 %v5744_v21, %v1823_v17  ;;  %2143 = vmatmul.f32.gmra.mxu0 %v2000_v0  ;;  %v1022_v17 = vadd.f32 %v5749_v5, %v4849_v8  ;;  %v1538_v0 = vadd.f32 %v5137_v2, %v4849_v8  ;;  %v1725_v5 = vadd.f32 %v1724_v60, %v4563_v30 }
 0x3c6   :  { %v1644_v36 = vpop.f32.mrf.mxu1 }
 0x3c7   :  { %v1971_v26 = vmax.f32 %v1907_v19, 0.0  ;;  %v1645_v44 = vadd.f32 %v1644_v36, %v1532_v20  ;;  %1872 = vmatmul.f32.gmra.mxu3 %v4531_v52  ;;  %v5748_v52 = vld [vmem:[#allocation115_spill] sm:$0xff]  ;;  %v5751_v20 = vld [vmem:[#allocation116_spill] sm:$0xff]  ;;  %v1719_v36 = vadd.f32 %v5201_v10, %v4563_v30 }
 0x3c8   :  { %v1132_v39 = vadd.f32 %v5748_v52, %v1019_v29  ;;  %v1135_v57 = vadd.f32 %v5751_v20, %v1022_v17  ;;  %v5754_v29 = vld [vmem:[#allocation60_spill] sm:$0xff] }
 0x3c9   :  { %v1938_v15 = vmax.f32 %v1129_v23, %v1645_v44  ;;  %2211 = vmatmul.f32.gmra.mxu1 %v1971_v26  ;;  %v5251_v26 = vpop.f32.mrf.mxu0 }
 0x3ca   :  { %v1825_v16 = vpop.f32.mrf.mxu3 }
 0x3cb   :  { %v1826_v49 = vadd.f32 %v1825_v16, %v1713_v22  ;;  %v2002_v1 = vmax.f32 %v1938_v15, 0.0  ;;  %v5752_v22 = vld [vmem:[#allocation34_spill] sm:$0xff]  ;;  %v1541_v16 = vadd.f32 %v5152_v32, %v4849_v8 }
 0x3cc   :  { %v1025_v15 = vadd.f32 %v5752_v22, %v4849_v8 }
 0x3cd   :  { %v1909_v4 = vmax.f32 %v5747_v33, %v1826_v49  ;;  %2146 = vmatmul.f32.gmra.mxu0 %v2002_v1  ;;  %v5753_v49 = vld [vmem:[#allocation65_spill] sm:$0xff] }
 0x3ce   :  { %v1647_v24 = vpop.f32.mrf.mxu1  ;;  %v1138_v10 = vadd.f32 %v5754_v29, %v1025_v15 }
 0x3cf   :  { %v1973_v59 = vmax.f32 %v1909_v4, 0.0  ;;  %v1648_v41 = vadd.f32 %v1647_v24, %v1535_v62  ;;  %1875 = vmatmul.f32.gmra.mxu3 %v4544_v31  ;;  %v1722_v4 = vadd.f32 %v5216_v40, %v4563_v30  ;;  %v5264_v24 = vld [vmem:[%s5437_s8] ss:$0 sm:$0xff] }
 0x3d1   :  { %v1940_v38 = vmax.f32 %v1132_v39, %v1648_v41  ;;  %2214 = vmatmul.f32.gmra.mxu1 %v1973_v59  ;;  %v2064_v59 = vadd.f32 %v5264_v24, %v5165_v11  ;;  %v5268_v41 = vpop.f32.mrf.mxu0  ;;  %v2067_v11 = vadd.f32 %v5264_v24, %v5181_v63 }
 0x3d2   :  { %v1828_v61 = vpop.f32.mrf.mxu3 }
 0x3d3   :  { %v1829_v43 = vadd.f32 %v1828_v61, %v1716_v58  ;;  %v2004_v35 = vmax.f32 %v1940_v38, 0.0  ;;  %v5755_v58 = vld [vmem:[#allocation68_spill] sm:$0xff] }
 0x3d5   :  { %v1911_v14 = vmax.f32 %v5750_v18, %v1829_v43  ;;  %2149 = vmatmul.f32.gmra.mxu0 %v2004_v35 }
 0x3d6   :  { %v1650_v31 = vpop.f32.mrf.mxu1 }
 0x3d7   :  { %v1975_v21 = vmax.f32 %v1911_v14, 0.0  ;;  %v1651_v19 = vadd.f32 %v1650_v31, %v1538_v0  ;;  %1878 = vmatmul.f32.gmra.mxu3 %v5699_v13  ;;  %v1730_v13 = vpop.f32.mrf.mxu2  ;;  %v5756_v14 = vld [vmem:[#allocation62_spill] sm:$0xff] }
 0x3d9   :  { %v1942_v28 = vmax.f32 %v1135_v57, %v1651_v19  ;;  %2217 = vmatmul.f32.gmra.mxu1 %v1975_v21  ;;  %v1728_v19 = vadd.f32 %v1727_v50, %v4563_v30 }
 0x3da   :  { %v1831_v23 = vpop.f32.mrf.mxu3 }
 0x3db   :  { %v1832_v44 = vadd.f32 %v1831_v23, %v1719_v36  ;;  %v2006_v2 = vmax.f32 %v1942_v28, 0.0  ;;  %v5277_v23 = vpop.f32.mrf.mxu0 }
 0x3dd   :  { %v1913_v1 = vmax.f32 %v5753_v49, %v1832_v44  ;;  %2152 = vmatmul.f32.gmra.mxu0 %v2006_v2  ;;  %v2070_v2 = vadd.f32 %v5264_v24, %v5194_v46  ;;  %v1731_v49 = vadd.f32 %v1730_v13, %v4563_v30 }
 0x3de   :  { %v1653_v37 = vpop.f32.mrf.mxu1 }
 0x3df   :  { %v1977_v62 = vmax.f32 %v1913_v1, 0.0  ;;  %v1654_v33 = vadd.f32 %v1653_v37, %v1541_v16  ;;  %v1733_v35 = vpop.f32.mrf.mxu2 }
 0x3e1   :  { %v1944_v52 = vmax.f32 %v1138_v10, %v1654_v33  ;;  %2220 = vmatmul.f32.gmra.mxu1 %v1977_v62  ;;  %v2073_v10 = vadd.f32 %v5264_v24, %v5211_v45 }
 0x3e2   :  { %v1834_v8 = vpop.f32.mrf.mxu3 }
 0x3e3   :  { %v1835_v32 = vadd.f32 %v1834_v8, %v1722_v4  ;;  %v2008_v39 = vmax.f32 %v1944_v52, 0.0  ;;  %v5287_v62 = vpop.f32.mrf.mxu0  ;;  %v1734_v52 = vadd.f32 %v1733_v35, %v4563_v30 }
 0x3e5   :  { %v1915_v38 = vmax.f32 %v5755_v58, %v1835_v32  ;;  %2155 = vmatmul.f32.gmra.mxu0 %v2008_v39  ;;  %v2076_v39 = vadd.f32 %v5264_v24, %v5226_v48 }
 0x3e6   :  { %v2176_v61 = vpop.f32.mrf.mxu1 }
 0x3e7   :  { %v1979_v40 = vmax.f32 %v1915_v38, 0.0  ;;  %v2177_v43 = vadd.f32 %v2176_v61, %v2064_v59  ;;  %v1736_v28 = vpop.f32.mrf.mxu2 }
 0x3e9   :  { %v2272_v17 = vmax.f32 %v2177_v43, 0.0  ;;  %2223 = vmatmul.f32.gmra.mxu1 %v1979_v40  ;;  %v1737_v40 = vadd.f32 %v1736_v28, %v4563_v30 }
 0x3ea   :  { %v1837_v0 = vpop.f32.mrf.mxu3 }
 0x3eb   :  { %v1838_v18 = vadd.f32 %v1837_v0, %v1725_v5  ;;  %2707 = vmatmul.msk.f32.vlgmr.msrb.gmra.mxu2 %vm2316_vm1, %v2272_v17  ;;  %v5295_v38 = vpop.f32.mrf.mxu0  ;;  %v2079_v17 = vadd.f32 %v5264_v24, %v5240_v42 }
 0x3ed   :  { %v1917_v31 = vmax.f32 %v5756_v14, %v1838_v18 }
 0x3ee   :  { %v2179_v20 = vpop.f32.mrf.mxu1 }
 0x3ef   :  { %v1981_v57 = vmax.f32 %v1917_v31, 0.0  ;;  %v2180_v21 = vadd.f32 %v2179_v20, %v2067_v11  ;;  %v1739_v29 = vpop.f32.mrf.mxu2 }
 0x3f0   :  { %v1740_v14 = vadd.f32 %v1739_v29, %v4563_v30 }
 0x3f1   :  { %v2273_v36 = vmax.f32 %v2180_v21, 0.0  ;;  %2226 = vmatmul.f32.gmra.mxu1 %v1981_v57 }
 0x3f2   :  { %v1840_v60 = vpop.f32.mrf.mxu3 }
 0x3f3   :  { %v1841_v44 = vadd.f32 %v1840_v60, %v1728_v19  ;;  %2708 = vmatmul.msk.f32.gmra.mxu2 %vm2316_vm1, %v2273_v36  ;;  %v5303_v31 = vpop.f32.mrf.mxu0  ;;  %v2082_v19 = vadd.f32 %v5264_v24, %v5251_v26 }
 0x3f5   :  { %v1919_v63 = vmax.f32 %v4883_v27, %v1841_v44 }
 0x3f6   :  { %v2182_v22 = vpop.f32.mrf.mxu1 }
 0x3f7   :  { %v1983_v15 = vmax.f32 %v1919_v63, 0.0  ;;  %v2183_v16 = vadd.f32 %v2182_v22, %v2070_v2  ;;  %v1742_v59 = vpop.f32.mrf.mxu2 }
 0x3f8   :  { %v1743_v60 = vadd.f32 %v1742_v59, %v4563_v30 }
 0x3f9   :  { %v2274_v50 = vmax.f32 %v2183_v16, 0.0  ;;  %2229 = vmatmul.f32.gmra.mxu1 %v1983_v15  ;;  %v2085_v16 = vadd.f32 %v5264_v24, %v5268_v41 }
 0x3fa   :  { %v1843_v1 = vpop.f32.mrf.mxu3 }
 0x3fb   :  { %v1844_v37 = vadd.f32 %v1843_v1, %v1731_v49  ;;  %2709 = vmatmul.msk.f32.gmra.mxu2 %vm2316_vm1, %v2274_v50  ;;  %v5310_v22 = vpop.f32.mrf.mxu0 }
 0x3fd   :  { %v1921_v46 = vmax.f32 %v4899_v12, %v1844_v37 }
 0x3fe   :  { %v2185_v27 = vpop.f32.mrf.mxu1 }
 0x3ff   :  { %v1985_v33 = vmax.f32 %v1921_v46, 0.0  ;;  %v2186_v4 = vadd.f32 %v2185_v27, %v2073_v10  ;;  %v1745_v11 = vpop.f32.mrf.mxu2  ;;  %v2088_v27 = vadd.f32 %v5264_v24, %v5277_v23 }
 0x400   :  { %v1746_v1 = vadd.f32 %v1745_v11, %v4563_v30 }
 0x401   :  { %v2275_v13 = vmax.f32 %v2186_v4, 0.0  ;;  %2232 = vmatmul.f32.gmra.mxu1 %v1985_v33 }
 0x402   :  { %v1846_v8 = vpop.f32.mrf.mxu3 }
 0x403   :  { %v1847_v32 = vadd.f32 %v1846_v8, %v1734_v52  ;;  %2710 = vmatmul.msk.f32.gmra.mxu2 %vm2316_vm1, %v2275_v13  ;;  %v2102_v33 = vpop.f32.mrf.mxu0 }
 0x405   :  { %v1923_v45 = vmax.f32 %v4912_v3, %v1847_v32 }
 0x406   :  { %v2188_v58 = vpop.f32.mrf.mxu1 }
 0x407   :  { %v1987_v12 = vmax.f32 %v1923_v45, 0.0  ;;  %v2189_v61 = vadd.f32 %v2188_v58, %v2076_v39  ;;  %v1748_v2 = vpop.f32.mrf.mxu2  ;;  %v2091_v45 = vadd.f32 %v5264_v24, %v5287_v62 }
 0x408   :  { %v1749_v13 = vadd.f32 %v1748_v2, %v4563_v30 }
 0x409   :  { %v2276_v43 = vmax.f32 %v2189_v61, 0.0  ;;  %2235 = vmatmul.f32.gmra.mxu1 %v1987_v12 }
 0x40a   :  { %v1849_v35 = vpop.f32.mrf.mxu3 }
 0x40b   :  { %v1850_v5 = vadd.f32 %v1849_v35, %v1737_v40  ;;  %2711 = vmatmul.msk.f32.gmra.mxu2 %vm2316_vm1, %v2276_v43  ;;  %v2105_v12 = vpop.f32.mrf.mxu0 }
 0x40d   :  { %v1925_v48 = vmax.f32 %v4928_v53, %v1850_v5 }
 0x40e   :  { %v2191_v3 = vpop.f32.mrf.mxu1 }
 0x40f   :  { %v1989_v0 = vmax.f32 %v1925_v48, 0.0  ;;  %v2192_v18 = vadd.f32 %v2191_v3, %v2079_v17  ;;  %v1751_v46 = vpop.f32.mrf.mxu2  ;;  %v2094_v17 = vadd.f32 %v5264_v24, %v5295_v38 }
 0x410   :  { %v1752_v40 = vadd.f32 %v1751_v46, %v4563_v30 }
 0x411   :  { %v2277_v20 = vmax.f32 %v2192_v18, 0.0  ;;  %2238 = vmatmul.f32.gmra.mxu1 %v1989_v0 }
 0x412   :  { %v1852_v57 = vpop.f32.mrf.mxu3 }
 0x413   :  { %v1853_v21 = vadd.f32 %v1852_v57, %v1740_v14  ;;  %2712 = vmatmul.msk.f32.gmra.mxu2 %vm2316_vm1, %v2277_v20  ;;  %v2108_v11 = vpop.f32.mrf.mxu0 }
 0x415   :  { %v1927_v42 = vmax.f32 %v4939_v54, %v1853_v21  ;;  %v2097_v21 = vadd.f32 %v5264_v24, %v5303_v31 }
 0x416   :  { %v2194_v53 = vpop.f32.mrf.mxu1 }
 0x417   :  { %v1991_v36 = vmax.f32 %v1927_v42, 0.0  ;;  %v2195_v28 = vadd.f32 %v2194_v53, %v2082_v19  ;;  %v1754_v23 = vpop.f32.mrf.mxu2 }
 0x418   :  { %v1755_v18 = vadd.f32 %v1754_v23, %v4563_v30 }
 0x419   :  { %v2278_v44 = vmax.f32 %v2195_v28, 0.0  ;;  %2241 = vmatmul.f32.gmra.mxu1 %v1991_v36 }
 0x41a   :  { %v1855_v63 = vpop.f32.mrf.mxu3 }
 0x41b   :  { %v1856_v15 = vadd.f32 %v1855_v63, %v1743_v60  ;;  %2713 = vmatmul.msk.f32.gmra.mxu2 %vm2316_vm1, %v2278_v44  ;;  %v2111_v44 = vpop.f32.mrf.mxu0  ;;  %v2100_v63 = vadd.f32 %v5264_v24, %v5310_v22 }
 0x41d   :  { %v1929_v26 = vmax.f32 %v4955_v34, %v1856_v15 }
 0x41e   :  { %v2197_v54 = vpop.f32.mrf.mxu1 }
 0x41f   :  { %v1993_v49 = vmax.f32 %v1929_v26, 0.0  ;;  %v2198_v50 = vadd.f32 %v2197_v54, %v2085_v16  ;;  %v1757_v0 = vpop.f32.mrf.mxu2 }
 0x420   :  { %v1758_v53 = vadd.f32 %v1757_v0, %v4563_v30 }
 0x421   :  { %v2279_v37 = vmax.f32 %v2198_v50, 0.0  ;;  %2244 = vmatmul.f32.gmra.mxu1 %v1993_v49 }
 0x422   :  { %v1858_v29 = vpop.f32.mrf.mxu3 }
 0x423   :  { %v1859_v10 = vadd.f32 %v1858_v29, %v1746_v1  ;;  %2714 = vmatmul.msk.f32.gmra.mxu2 %vm2316_vm1, %v2279_v37  ;;  %v2103_v37 = vadd.f32 %v5264_v24, %v2102_v33  ;;  %v2114_v29 = vpop.f32.mrf.mxu0 }
 0x425   :  { %v1931_v41 = vmax.f32 %v4968_v9, %v1859_v10 }
 0x426   :  { %v2200_v4 = vpop.f32.mrf.mxu1 }
 0x427   :  { %v1995_v34 = vmax.f32 %v1931_v41, 0.0  ;;  %v2201_v52 = vadd.f32 %v2200_v4, %v2088_v27  ;;  %v1760_v28 = vpop.f32.mrf.mxu2 }
 0x428   :  { %v1761_v26 = vadd.f32 %v1760_v28, %v4563_v30 }
 0x429   :  { %v2280_v8 = vmax.f32 %v2201_v52, 0.0  ;;  %2247 = vmatmul.f32.gmra.mxu1 %v1995_v34  ;;  %v2106_v52 = vadd.f32 %v5264_v24, %v2105_v12 }
 0x42a   :  { %v1861_v32 = vpop.f32.mrf.mxu3 }
 0x42b   :  { %v1862_v39 = vadd.f32 %v1861_v32, %v1749_v13  ;;  %2715 = vmatmul.msk.f32.gmra.mxu2 %vm2316_vm1, %v2280_v8  ;;  %v2117_v32 = vpop.f32.mrf.mxu0 }
 0x42d   :  { %v1933_v59 = vmax.f32 %v4984_v7, %v1862_v39 }
 0x42e   :  { %v2203_v58 = vpop.f32.mrf.mxu1 }
 0x42f   :  { %v1997_v9 = vmax.f32 %v1933_v59, 0.0  ;;  %v2204_v61 = vadd.f32 %v2203_v58, %v2091_v45  ;;  %v1763_v1 = vpop.f32.mrf.mxu2 }
 0x430   :  { %v1764_v27 = vadd.f32 %v1763_v1, %v4563_v30 }
 0x431   :  { %v2281_v43 = vmax.f32 %v2204_v61, 0.0  ;;  %2250 = vmatmul.f32.gmra.mxu1 %v1997_v9  ;;  %v2109_v9 = vadd.f32 %v5264_v24, %v2108_v11 }
 0x432   :  { %v1864_v35 = vpop.f32.mrf.mxu3 }
 0x433   :  { %v1865_v5 = vadd.f32 %v1864_v35, %v1752_v40  ;;  %2716 = vmatmul.msk.f32.gmra.mxu2 %vm2316_vm1, %v2281_v43  ;;  %v2120_v43 = vpop.f32.mrf.mxu0 }
 0x435   :  { %v1935_v62 = vmax.f32 %v4997_v6, %v1865_v5 }
 0x436   :  { %v2206_v48 = vpop.f32.mrf.mxu1 }
 0x437   :  { %v1999_v7 = vmax.f32 %v1935_v62, 0.0  ;;  %v2207_v3 = vadd.f32 %v2206_v48, %v2094_v17  ;;  %v1766_v8 = vpop.f32.mrf.mxu2 }
 0x438   :  { %v1767_v45 = vadd.f32 %v1766_v8, %v4563_v30  ;;  %v2112_v30 = vadd.f32 %v5264_v24, %v2111_v44 }
 0x439   :  { %v2282_v14 = vmax.f32 %v2207_v3, 0.0  ;;  %2253 = vmatmul.f32.gmra.mxu1 %v1999_v7  ;;  %v2115_v7 = vadd.f32 %v5264_v24, %v2114_v29 }
 0x43a   :  { %v1867_v20 = vpop.f32.mrf.mxu3 }
 0x43b   :  { %v1868_v57 = vadd.f32 %v1867_v20, %v1755_v18  ;;  %2717 = vmatmul.msk.f32.gmra.mxu2 %vm2316_vm1, %v2282_v14  ;;  %v2123_v48 = vpop.f32.mrf.mxu0  ;;  %v2118_v20 = vadd.f32 %v5264_v24, %v2117_v32 }
 0x43d   :  { %v1937_v38 = vmax.f32 %v5011_v25, %v1868_v57 }
 0x43e   :  { %v2209_v19 = vpop.f32.mrf.mxu1 }
 0x43f   :  { %v2001_v6 = vmax.f32 %v1937_v38, 0.0  ;;  %v2210_v42 = vadd.f32 %v2209_v19, %v2097_v21 }
 0x441   :  { %v2283_v36 = vmax.f32 %v2210_v42, 0.0  ;;  %2256 = vmatmul.f32.gmra.mxu1 %v2001_v6 }
 0x442   :  { %v1870_v60 = vpop.f32.mrf.mxu3 }
 0x443   :  { %v1871_v2 = vadd.f32 %v1870_v60, %v1758_v53  ;;  %2718 = vmatmul.msk.f32.gmra.mxu2 %vm2316_vm1, %v2283_v36  ;;  %v2126_v57 = vpop.f32.mrf.mxu0  ;;  %v2121_v53 = vadd.f32 %v5264_v24, %v2120_v43 }
 0x445   :  { %v1939_v31 = vmax.f32 %v5024_v56, %v1871_v2 }
 0x446   :  { %v2212_v15 = vpop.f32.mrf.mxu1 }
 0x447   :  { %v2003_v25 = vmax.f32 %v1939_v31, 0.0  ;;  %v2213_v16 = vadd.f32 %v2212_v15, %v2100_v63  ;;  %v2124_v31 = vadd.f32 %v5264_v24, %v2123_v48 }
 0x449   :  { %v2284_v54 = vmax.f32 %v2213_v16, 0.0  ;;  %2259 = vmatmul.f32.gmra.mxu1 %v2003_v25 }
 0x44a   :  { %v1873_v49 = vpop.f32.mrf.mxu3 }
 0x44b   :  { %v1874_v50 = vadd.f32 %v1873_v49, %v1761_v26  ;;  %2719 = vmatmul.msk.f32.gmra.mxu2 %vm2316_vm1, %v2284_v54  ;;  %v2129_v60 = vpop.f32.mrf.mxu0 }
 0x44d   :  { %v1941_v10 = vmax.f32 %v5037_v51, %v1874_v50  ;;  %v2127_v50 = vadd.f32 %v5264_v24, %v2126_v57 }
 0x44e   :  { %v2215_v22 = vpop.f32.mrf.mxu1 }
 0x44f   :  { %v2005_v46 = vmax.f32 %v1941_v10, 0.0  ;;  %v2216_v56 = vadd.f32 %v2215_v22, %v2103_v37 }
 0x451   :  { %v2285_v41 = vmax.f32 %v2216_v56, 0.0  ;;  %2262 = vmatmul.f32.gmra.mxu1 %v2005_v46  ;;  %v2130_v56 = vadd.f32 %v5264_v24, %v2129_v60 }
 0x452   :  { %v1876_v4 = vpop.f32.mrf.mxu3 }
 0x453   :  { %v1877_v34 = vadd.f32 %v1876_v4, %v1764_v27  ;;  %2720 = vmatmul.msk.f32.gmra.mxu2 %vm2316_vm1, %v2285_v41  ;;  %v2132_v54 = vpop.f32.mrf.mxu0 }
 0x455   :  { %v1943_v13 = vmax.f32 %v5050_v47, %v1877_v34 }
 0x456   :  { %v2218_v33 = vpop.f32.mrf.mxu1 }
 0x457   :  { %v2007_v39 = vmax.f32 %v1943_v13, 0.0  ;;  %v2219_v51 = vadd.f32 %v2218_v33, %v2106_v52  ;;  %v2133_v13 = vadd.f32 %v5264_v24, %v2132_v54 }
 0x459   :  { %v2286_v59 = vmax.f32 %v2219_v51, 0.0  ;;  %2265 = vmatmul.f32.gmra.mxu1 %v2007_v39 }
 0x45a   :  { %v1879_v23 = vpop.f32.mrf.mxu3 }
 0x45b   :  { %v1880_v58 = vadd.f32 %v1879_v23, %v1767_v45  ;;  %2721 = vmatmul.msk.f32.gmra.mxu2 %vm2316_vm1, %v2286_v59  ;;  %v2135_v46 = vpop.f32.mrf.mxu0 }
 0x45c   :  { %v2136_v59 = vadd.f32 %v5264_v24, %v2135_v46 }
 0x45d   :  { %v1945_v61 = vmax.f32 %v5063_v55, %v1880_v58  ;;  %v5359_v55 = vld [vmem:[%s5439_s10] ss:$0 sm:$0xff]  ;;  %s2932_s10 = smov [#allocation11]  }
 0x45e   :  { %v2221_v12 = vpop.f32.mrf.mxu1  ;;  %s2562_s3 = sshll.u32 %s2932_s10, 4  ;;  %s2563_s3 = int_to_ptr.vmem [resolvable:$true] %s2562_s3 }
 0x45f   :  { %v2009_v40 = vmax.f32 %v1945_v61, 0.0  ;;  %v2222_v47 = vadd.f32 %v2221_v12, %v2109_v9 }
 0x461   :  { %v2287_v35 = vmax.f32 %v2222_v47, 0.0  ;;  %2268 = vmatmul.f32.gmra.mxu1 %v2009_v40 }
 0x463   :  { %2722 = vmatmul.msk.f32.gmra.mxu2 %vm2316_vm1, %v2287_v35  ;;  %v2138_v8 = vpop.f32.mrf.mxu0 }
 0x464   :  { %v2139_v47 = vadd.f32 %v5264_v24, %v2138_v8 }
 0x466   :  { %v2224_v5 = vpop.f32.mrf.mxu1 }
 0x467   :  { %v2225_v17 = vadd.f32 %v2224_v5, %v2112_v30 }
 0x469   :  { %v2288_v62 = vmax.f32 %v2225_v17, 0.0 }
 0x46b   :  { %2723 = vmatmul.msk.f32.gmra.mxu2 %vm2316_vm1, %v2288_v62  ;;  %v2141_v9 = vpop.f32.mrf.mxu0 }
 0x46c   :  { %v2142_v48 = vadd.f32 %v5264_v24, %v2141_v9 }
 0x46e   :  { %v2227_v3 = vpop.f32.mrf.mxu1  ;;  %v2430_v0 = vpop.f32.mrf.mxu2 }
 0x46f   :  { %v2228_v18 = vadd.f32 %v2227_v3, %v2115_v7  ;;  %v2431_v11 = vadd.f32 %v5359_v55, %v2430_v0 }
 0x471   :  { %v2289_v14 = vmax.f32 %v2228_v18, 0.0  ;;  %2526 = vst [vmem:[#allocation11] sm:$0xff] %v2431_v11 }
 0x473   :  { %2724 = vmatmul.msk.f32.gmra.mxu2 %vm2316_vm1, %v2289_v14  ;;  %v2144_v17 = vpop.f32.mrf.mxu0 }
 0x476   :  { %v2230_v21 = vpop.f32.mrf.mxu1  ;;  %v2433_v38 = vpop.f32.mrf.mxu2 }
 0x477   :  { %v2231_v19 = vadd.f32 %v2230_v21, %v2118_v20  ;;  %v2434_v6 = vadd.f32 %v5359_v55, %v2433_v38  ;;  %v2145_v20 = vadd.f32 %v5264_v24, %v2144_v17 }
 0x479   :  { %v2290_v42 = vmax.f32 %v2231_v19, 0.0  ;;  %2527 = vst [vmem:[#allocation11 + $0x8] sm:$0xff] %v2434_v6 }
 0x47b   :  { %2725 = vmatmul.msk.f32.gmra.mxu2 %vm2316_vm1, %v2290_v42  ;;  %v2147_v14 = vpop.f32.mrf.mxu0 }
 0x47c   :  { %v2148_v42 = vadd.f32 %v5264_v24, %v2147_v14 }
 0x47e   :  { %v2233_v36 = vpop.f32.mrf.mxu1  ;;  %v2436_v28 = vpop.f32.mrf.mxu2 }
 0x47f   :  { %v2234_v44 = vadd.f32 %v2233_v36, %v2121_v53  ;;  %v2437_v2 = vadd.f32 %v5359_v55, %v2436_v28 }
 0x481   :  { %v2291_v63 = vmax.f32 %v2234_v44, 0.0  ;;  %2528 = vst [vmem:[#allocation11 + $0x10] sm:$0xff] %v2437_v2 }
 0x483   :  { %2726 = vmatmul.msk.f32.gmra.mxu2 %vm2316_vm1, %v2291_v63  ;;  %v2150_v53 = vpop.f32.mrf.mxu0 }
 0x484   :  { %v2151_v63 = vadd.f32 %v5264_v24, %v2150_v53 }
 0x486   :  { %v2236_v15 = vpop.f32.mrf.mxu1  ;;  %v2439_v25 = vpop.f32.mrf.mxu2 }
 0x487   :  { %v2237_v16 = vadd.f32 %v2236_v15, %v2124_v31  ;;  %v2440_v26 = vadd.f32 %v5359_v55, %v2439_v25 }
 0x489   :  { %v2292_v49 = vmax.f32 %v2237_v16, 0.0  ;;  %2529 = vst [vmem:[#allocation11 + $0x18] sm:$0xff] %v2440_v26 }
 0x48b   :  { %2727 = vmatmul.msk.f32.gmra.mxu2 %vm2316_vm1, %v2292_v49  ;;  %v2153_v26 = vpop.f32.mrf.mxu0 }
 0x48c   :  { %v2154_v49 = vadd.f32 %v5264_v24, %v2153_v26 }
 0x48e   :  { %v2239_v1 = vpop.f32.mrf.mxu1  ;;  %v2442_v37 = vpop.f32.mrf.mxu2 }
 0x48f   :  { %v2240_v29 = vadd.f32 %v2239_v1, %v2127_v50  ;;  %v2443_v10 = vadd.f32 %v5359_v55, %v2442_v37 }
 0x491   :  { %v2293_v22 = vmax.f32 %v2240_v29, 0.0  ;;  %2530 = vst [vmem:[#allocation11 + $0x20] sm:$0xff] %v2443_v10 }
 0x493   :  { %2728 = vmatmul.msk.f32.gmra.mxu2 %vm2316_vm1, %v2293_v22  ;;  %v2156_v22 = vpop.f32.mrf.mxu0 }
 0x494   :  { %v2157_v46 = vadd.f32 %v5264_v24, %v2156_v22 }
 0x496   :  { %v2242_v27 = vpop.f32.mrf.mxu1  ;;  %v2445_v41 = vpop.f32.mrf.mxu2 }
 0x497   :  { %v2243_v4 = vadd.f32 %v2242_v27, %v2130_v56  ;;  %v2446_v34 = vadd.f32 %v5359_v55, %v2445_v41 }
 0x499   :  { %v2294_v52 = vmax.f32 %v2243_v4, 0.0  ;;  %2531 = vst [vmem:[#allocation11 + $0x28] sm:$0xff] %v2446_v34 }
 0x49b   :  { %2729 = vmatmul.msk.f32.gmra.mxu2 %vm2316_vm1, %v2294_v52 }
 0x49e   :  { %v2245_v33 = vpop.f32.mrf.mxu1  ;;  %v2448_v32 = vpop.f32.mrf.mxu2 }
 0x49f   :  { %v2246_v39 = vadd.f32 %v2245_v33, %v2133_v13  ;;  %v2449_v51 = vadd.f32 %v5359_v55, %v2448_v32 }
 0x4a1   :  { %v2295_v45 = vmax.f32 %v2246_v39, 0.0  ;;  %2532 = vst [vmem:[#allocation11 + $0x30] sm:$0xff] %v2449_v51 }
 0x4a3   :  { %2730 = vmatmul.msk.f32.gmra.mxu2 %vm2316_vm1, %v2295_v45 }
 0x4a6   :  { %v2248_v23 = vpop.f32.mrf.mxu1  ;;  %v2451_v58 = vpop.f32.mrf.mxu2 }
 0x4a7   :  { %v2249_v61 = vadd.f32 %v2248_v23, %v2136_v59  ;;  %v2452_v12 = vadd.f32 %v5359_v55, %v2451_v58 }
 0x4a9   :  { %v2296_v40 = vmax.f32 %v2249_v61, 0.0  ;;  %2533 = vst [vmem:[#allocation11 + $0x38] sm:$0xff] %v2452_v12 }
 0x4ab   :  { %2731 = vmatmul.msk.f32.gmra.mxu2 %vm2316_vm1, %v2296_v40 }
 0x4ae   :  { %v2251_v43 = vpop.f32.mrf.mxu1  ;;  %v2454_v35 = vpop.f32.mrf.mxu2 }
 0x4af   :  { %v2252_v30 = vadd.f32 %v2251_v43, %v2139_v47  ;;  %v2455_v5 = vadd.f32 %v5359_v55, %v2454_v35 }
 0x4b1   :  { %v2297_v62 = vmax.f32 %v2252_v30, 0.0  ;;  %2534 = vst [vmem:[#allocation11 + $0x40] sm:$0xff] %v2455_v5 }
 0x4b3   :  { %2732 = vmatmul.msk.f32.gmra.mxu2 %vm2316_vm1, %v2297_v62 }
 0x4b6   :  { %v2254_v7 = vpop.f32.mrf.mxu1  ;;  %v2457_v3 = vpop.f32.mrf.mxu2 }
 0x4b7   :  { %v2255_v0 = vadd.f32 %v2254_v7, %v2142_v48  ;;  %v2458_v18 = vadd.f32 %v5359_v55, %v2457_v3 }
 0x4b9   :  { %v2298_v11 = vmax.f32 %v2255_v0, 0.0  ;;  %2535 = vst [vmem:[#allocation11 + $0x48] sm:$0xff] %v2458_v18 }
 0x4bb   :  { %2733 = vmatmul.msk.f32.gmra.mxu2 %vm2316_vm1, %v2298_v11 }
 0x4be   :  { %v2257_v57 = vpop.f32.mrf.mxu1  ;;  %v2460_v21 = vpop.f32.mrf.mxu2 }
 0x4bf   :  { %v2258_v38 = vadd.f32 %v2257_v57, %v2145_v20  ;;  %v2461_v19 = vadd.f32 %v5359_v55, %v2460_v21 }
 0x4c1   :  { %v2299_v6 = vmax.f32 %v2258_v38, 0.0  ;;  %2536 = vst [vmem:[#allocation11 + $0x50] sm:$0xff] %v2461_v19 }
 0x4c3   :  { %2734 = vmatmul.msk.f32.gmra.mxu2 %vm2316_vm1, %v2299_v6 }
 0x4c6   :  { %v2260_v36 = vpop.f32.mrf.mxu1  ;;  %v2463_v28 = vpop.f32.mrf.mxu2 }
 0x4c7   :  { %v2261_v60 = vadd.f32 %v2260_v36, %v2148_v42  ;;  %v2464_v44 = vadd.f32 %v5359_v55, %v2463_v28 }
 0x4c9   :  { %v2300_v2 = vmax.f32 %v2261_v60, 0.0  ;;  %2537 = vst [vmem:[#allocation11 + $0x58] sm:$0xff] %v2464_v44 }
 0x4cb   :  { %2735 = vmatmul.msk.f32.gmra.mxu2 %vm2316_vm1, %v2300_v2 }
 0x4ce   :  { %v2263_v31 = vpop.f32.mrf.mxu1  ;;  %v2466_v15 = vpop.f32.mrf.mxu2 }
 0x4cf   :  { %v2264_v25 = vadd.f32 %v2263_v31, %v2151_v63  ;;  %v2467_v16 = vadd.f32 %v5359_v55, %v2466_v15 }
 0x4d1   :  { %v2301_v54 = vmax.f32 %v2264_v25, 0.0  ;;  %2538 = vst [vmem:[#allocation11 + $0x60] sm:$0xff] %v2467_v16 }
 0x4d3   :  { %2736 = vmatmul.msk.f32.gmra.mxu2 %vm2316_vm1, %v2301_v54 }
 0x4d6   :  { %v2266_v50 = vpop.f32.mrf.mxu1  ;;  %v2469_v1 = vpop.f32.mrf.mxu2 }
 0x4d7   :  { %v2267_v37 = vadd.f32 %v2266_v50, %v2154_v49  ;;  %v2470_v29 = vadd.f32 %v5359_v55, %v2469_v1 }
 0x4d9   :  { %v2302_v10 = vmax.f32 %v2267_v37, 0.0  ;;  %2539 = vst [vmem:[#allocation11 + $0x68] sm:$0xff] %v2470_v29 }
 0x4db   :  { %2737 = vmatmul.msk.f32.gmra.mxu2 %vm2316_vm1, %v2302_v10 }
 0x4de   :  { %v2269_v56 = vpop.f32.mrf.mxu1  ;;  %v2472_v27 = vpop.f32.mrf.mxu2 }
 0x4df   :  { %v2270_v41 = vadd.f32 %v2269_v56, %v2157_v46  ;;  %v2473_v4 = vadd.f32 %v5359_v55, %v2472_v27 }
 0x4e1   :  { %v2303_v34 = vmax.f32 %v2270_v41, 0.0  ;;  %2540 = vst [vmem:[#allocation11 + $0x70] sm:$0xff] %v2473_v4 }
 0x4e3   :  { %2738 = vmatmul.msk.f32.gmra.mxu2 %vm2316_vm1, %v2303_v34 }
 0x4e6   :  { %v2475_v52 = vpop.f32.mrf.mxu2 }
 0x4e7   :  { %v2476_v13 = vadd.f32 %v5359_v55, %v2475_v52 }
 0x4e9   :  { %2541 = vst [vmem:[#allocation11 + $0x78] sm:$0xff] %v2476_v13 }
 0x4ee   :  { %v2478_v8 = vpop.f32.mrf.mxu2 }
 0x4ef   :  { %v2479_v33 = vadd.f32 %v5359_v55, %v2478_v8 }
 0x4f1   :  { %2542 = vst [vmem:[#allocation11 + $0x80] sm:$0xff] %v2479_v33 }
 0x4f6   :  { %v2481_v32 = vpop.f32.mrf.mxu2 }
 0x4f7   :  { %v2482_v24 = vadd.f32 %v5359_v55, %v2481_v32 }
 0x4f9   :  { %2543 = vst [vmem:[#allocation11 + $0x88] sm:$0xff] %v2482_v24 }
 0x4fe   :  { %v2484_v39 = vpop.f32.mrf.mxu2 }
 0x4ff   :  { %v2485_v51 = vadd.f32 %v5359_v55, %v2484_v39 }
 0x501   :  { %2544 = vst [vmem:[#allocation11 + $0x90] sm:$0xff] %v2485_v51 }
 0x506   :  { %v2487_v45 = vpop.f32.mrf.mxu2 }
 0x507   :  { %v2488_v59 = vadd.f32 %v5359_v55, %v2487_v45 }
 0x509   :  { %2545 = vst [vmem:[#allocation11 + $0x98] sm:$0xff] %v2488_v59 }
 0x50e   :  { %v2490_v23 = vpop.f32.mrf.mxu2 }
 0x50f   :  { %v2491_v58 = vadd.f32 %v5359_v55, %v2490_v23 }
 0x511   :  { %2546 = vst [vmem:[#allocation11 + $0xa0] sm:$0xff] %v2491_v58 }
 0x516   :  { %v2493_v9 = vpop.f32.mrf.mxu2 }
 0x517   :  { %v2494_v61 = vadd.f32 %v5359_v55, %v2493_v9 }
 0x519   :  { %2547 = vst [vmem:[#allocation11 + $0xa8] sm:$0xff] %v2494_v61 }
 0x51e   :  { %v2496_v12 = vpop.f32.mrf.mxu2 }
 0x51f   :  { %v2497_v40 = vadd.f32 %v5359_v55, %v2496_v12 }
 0x521   :  { %2548 = vst [vmem:[#allocation11 + $0xb0] sm:$0xff] %v2497_v40 }
 0x526   :  { %v2499_v47 = vpop.f32.mrf.mxu2 }
 0x527   :  { %v2500_v43 = vadd.f32 %v5359_v55, %v2499_v47 }
 0x529   :  { %2549 = vst [vmem:[#allocation11 + $0xb8] sm:$0xff] %v2500_v43 }
 0x52e   :  { %v2502_v35 = vpop.f32.mrf.mxu2 }
 0x52f   :  { %v2503_v30 = vadd.f32 %v5359_v55, %v2502_v35 }
 0x531   :  { %2550 = vst [vmem:[#allocation11 + $0xc0] sm:$0xff] %v2503_v30 }
 0x536   :  { %v2505_v5 = vpop.f32.mrf.mxu2 }
 0x537   :  { %v2506_v17 = vadd.f32 %v5359_v55, %v2505_v5 }
 0x539   :  { %2551 = vst [vmem:[#allocation11 + $0xc8] sm:$0xff] %v2506_v17 }
 0x53e   :  { %v2508_v62 = vpop.f32.mrf.mxu2 }
 0x53f   :  { %v2509_v48 = vadd.f32 %v5359_v55, %v2508_v62 }
 0x541   :  { %2552 = vst [vmem:[#allocation11 + $0xd0] sm:$0xff] %v2509_v48 }
 0x546   :  { %v2511_v7 = vpop.f32.mrf.mxu2 }
 0x547   :  { %v2512_v3 = vadd.f32 %v5359_v55, %v2511_v7 }
 0x549   :  { %2553 = vst [vmem:[#allocation11 + $0xd8] sm:$0xff] %v2512_v3 }
 0x54e   :  { %v2514_v0 = vpop.f32.mrf.mxu2 }
 0x54f   :  { %v2515_v18 = vadd.f32 %v5359_v55, %v2514_v0 }
 0x551   :  { %2554 = vst [vmem:[#allocation11 + $0xe0] sm:$0xff] %v2515_v18 }
 0x556   :  { %v2517_v11 = vpop.f32.mrf.mxu2 }
 0x557   :  { %v2518_v14 = vadd.f32 %v5359_v55, %v2517_v11 }
 0x559   :  { %2555 = vst [vmem:[#allocation11 + $0xe8] sm:$0xff] %v2518_v14 }
 0x55e   :  { %v2520_v20 = vpop.f32.mrf.mxu2 }
 0x55f   :  { %v2521_v57 = vadd.f32 %v5359_v55, %v2520_v20 }
 0x561   :  { %2556 = vst [vmem:[#allocation11 + $0xf0] sm:$0xff] %v2521_v57 }
 0x566   :  { %v2523_v21 = vpop.f32.mrf.mxu2 }
 0x567   :  { %v2524_v38 = vadd.f32 %v5359_v55, %v2523_v21 }
 0x569   :  { %2557 = vst [vmem:[#allocation11 + $0xf8] sm:$0xff] %v2524_v38 }
 0x56a   :  { %2570 = dma.vmem_to_hbm [thread:$0]  %s2563_s3, 4096, %s2565_s12, [#allocation4], %s2930_s22, %s2930_s22, %s2931_s23  }
 0x56b   :  { %2921 = dma.done.wait [#allocation4], 4096  }
 0x56c   :  { %2922 = vsyncadd [#allocation4], 4294963200 }
 0x56d   :  { %2575 = vsyncpa [#allocation3], 1 }
 0x56e   :  { %2576 = vsyncpa [#allocation6], 1 }
 0x56f   :  { %2577 = vsyncpa [#allocation9], 1 }
 0x570   :  { %2578 = vsyncpa [#allocation4], 1 }

</bundles_post_ra>
